<compile_context>
chip_gen: v6e
topology: v6e:2x2x1
jax: 0.10.0
libtpu: 0.0.40
codegen_flags: <defaults>
</compile_context>

<pallas_src>
import math

import jax
import jax.numpy as jnp
import numpy as np
from jax.experimental import pallas as pl
from jax.experimental.pallas import tpu as pltpu

NBINS = 9
POOL = 8
GAUSSIAN_WINDOW = 16


def _gaussian_kernel_2d(kernlen, std):
    n = np.arange(kernlen, dtype=np.float32)
    n = n - n.mean()
    n = n / std
    w = np.exp(-0.5 * n * n)
    g2 = w[:, None] * w[None, :]
    return (g2 / g2.sum()).astype(np.float32)


def _make_hog_kernel(C, H, W, nbins, pool, gk_rows):
    Hc, Wc = H // pool, W // pool
    reps = H // gk_rows

    def kernel(xp_ref, gk_ref, pleft_ref, prb_ref, g_ref, gt_ref, o_ref):
        # xp_ref: (C, H+2, W) row-reflect-padded planes (lane dim W stays aligned).
        xp = xp_ref[...]

        # Column neighbours with reflect boundary (col -1 -> col 1, col W -> col W-2).
        left = jnp.concatenate([xp[:, :, 1:2], xp[:, :, : W - 1]], axis=-1)
        right = jnp.concatenate([xp[:, :, 1:], xp[:, :, W - 2 : W - 1]], axis=-1)

        d = left - right                # column difference, (C, H+2, W)
        s = left + 2.0 * xp + right     # column smoothing,  (C, H+2, W)

        # Depthwise Sobel cross-correlations (weight_x / weight_y of the module).
        gx = d[:, 0:H, :] + 2.0 * d[:, 1:H + 1, :] + d[:, 2:H + 2, :]
        gy = s[:, 0:H, :] - s[:, 2:H + 2, :]

        mag = jnp.sqrt(gx * gx + gy * gy)

        # Gaussian window: (gk_rows, W) strip tiled along rows in-kernel.
        gk_full = jnp.tile(gk_ref[...], (reps, 1))          # (H, W)
        weighted = mag * gk_full                             # broadcast over C

        # --- orientation binning without atan2 --------------------------------
        # bin = floor(atan2(gx, gy)/pi*nbins) % nbins depends only on the line
        # orientation alpha = atan2(gx, gy) mod pi.  Choose (u, v) with v >= 0 so
        # alpha = atan2(v, u); then with cond_j := v*cos(j*pi/n) - u*sin(j*pi/n) >= 0
        # (monotone in j), bin b <=> cond_b & ~cond_{b+1}.  gx == 0 -> bin 0.
        neg = gx < 0.0
        u = jnp.where(neg, -gy, gy)
        v = jnp.abs(gx)
        zero = gx == 0.0

        conds = []
        for j in range(1, nbins):
            bj = j * math.pi / nbins
            conds.append((v * math.cos(bj) - u * math.sin(bj)) >= 0.0)

        masks = [jnp.logical_or(jnp.logical_not(conds[0]), zero)]
        for b in range(1, nbins - 1):
            masks.append(jnp.logical_and(conds[b - 1], jnp.logical_not(conds[b])))
        masks.append(jnp.logical_and(conds[nbins - 2], jnp.logical_not(zero)))

        # Lane-fused masked planes: (C, H, nbins*W), bin-major along lanes.
        # TODO(synk): for >= 512x512 planes, fuse bins in groups (or per-bin) to
        # keep this 9x-plane intermediate inside v7x's 64 MiB VMEM.
        m_cat = jnp.concatenate(
            [jnp.where(m, weighted, 0.0) for m in masks], axis=-1)

        pleft = pleft_ref[...]   # (Hc, H)                 left pooling
        prb = prb_ref[...]       # (nbins*W, nbins*Wc)     block-diag right pooling
        g = g_ref[...]           # (nbins*Wc, Wc)          sum-over-bins gather
        gt = gt_ref[...]         # (Wc, nbins*Wc)          broadcast-back

        for c in range(C):
            # pool x pool cell sums for all 9 bins with a single matmul pair.
            cell = jnp.dot(
                jnp.dot(pleft, m_cat[c], preferred_element_type=jnp.float32),
                prb, preferred_element_type=jnp.float32)      # (Hc, nbins*Wc)
            # F.normalize(p=2, dim=nbins) over the bin groups along lanes.
            sumsq = jnp.dot(cell * cell, g,
                            preferred_element_type=jnp.float32)  # (Hc, Wc)
            scale = 1.0 / jnp.maximum(jnp.sqrt(sumsq), 1e-12)
            o_ref[c] = cell * jnp.dot(scale, gt,
                                      preferred_element_type=jnp.float32)

    return kernel


def hog_forward(x, nbins=NBINS, pool=POOL, gaussian_window=GAUSSIAN_WINDOW):
    """x: (B, 3, H, W) float32 -> (B, 3, nbins, H//pool, W//pool) float32."""
    B, C, H, W = x.shape
    assert C == 3
    assert H % pool == 0 and W % pool == 0
    if gaussian_window:
        assert H % gaussian_window == 0 and W % gaussian_window == 0
    Hc, Wc = H // pool, W // pool

    # Reflect-pad rows only (columns are handled in-kernel to keep W lane-aligned).
    xp = jnp.pad(x, ((0, 0), (0, 0), (1, 1), (0, 0)), mode="reflect")

    # Gaussian window strip: tiled along W on host, tiled along H in-kernel.
    if gaussian_window:
        gk2 = _gaussian_kernel_2d(gaussian_window, gaussian_window // 2)
        gk_row = np.tile(gk2, (1, W // gaussian_window))
    else:
        gk_row = np.ones((8, W), dtype=np.float32)
    gk_rows = gk_row.shape[0]
    assert H % gk_rows == 0

    # Pooling / gather matrices (tiny, f32, constant).
    pleft = np.zeros((Hc, H), np.float32)
    pleft[np.arange(H) // pool, np.arange(H)] = 1.0
    pr = np.zeros((W, Wc), np.float32)
    pr[np.arange(W), np.arange(W) // pool] = 1.0
    prb = np.zeros((nbins * W, nbins * Wc), np.float32)
    for b in range(nbins):
        prb[b * W:(b + 1) * W, b * Wc:(b + 1) * Wc] = pr
    g = np.tile(np.eye(Wc, dtype=np.float32), (nbins, 1))   # (nbins*Wc, Wc)
    gt = np.ascontiguousarray(g.T)                           # (Wc, nbins*Wc)

    kernel = _make_hog_kernel(C, H, W, nbins, pool, gk_rows)

    compiler_kwargs = dict(dimension_semantics=("parallel",))
    # Raise the scoped-VMEM limit only when the full-plane temps need it
    # (v5e default scoped VMEM is 16 MiB; cap at v7x's 64 MiB physical).
    vmem_need = 4 * C * H * W * (nbins + 10)
    if vmem_need > 12 * 1024 * 1024:
        compiler_kwargs["vmem_limit_bytes"] = int(min(vmem_need, 64 * 1024 * 1024))
    # TODO(synk): for >=512x512 planes on v7x add a row-strip grid axis with a
    # 2-row halo instead of keeping the whole plane resident.

    out = pl.pallas_call(
        kernel,
        out_shape=jax.ShapeDtypeStruct((B, C, Hc, nbins * Wc), jnp.float32),
        grid=(B,),
        in_specs=[
            pl.BlockSpec((None, C, H + 2, W), lambda b: (b, 0, 0, 0)),
            pl.BlockSpec((gk_rows, W), lambda b: (0, 0)),
            pl.BlockSpec((Hc, H), lambda b: (0, 0)),
            pl.BlockSpec((nbins * W, nbins * Wc), lambda b: (0, 0)),
            pl.BlockSpec((nbins * Wc, Wc), lambda b: (0, 0)),
            pl.BlockSpec((Wc, nbins * Wc), lambda b: (0, 0)),
        ],
        out_specs=pl.BlockSpec((None, C, Hc, nbins * Wc), lambda b: (b, 0, 0, 0)),
        compiler_params=pltpu.CompilerParams(**compiler_kwargs),
    )(xp, jnp.asarray(gk_row), jnp.asarray(pleft), jnp.asarray(prb),
      jnp.asarray(g), jnp.asarray(gt))

    # Lane-dense (Hc, nbins*Wc) slab -> (nbins, Hc, Wc); trivially cheap in XLA.
    out = out.reshape(B, C, Hc, nbins, Wc).transpose(0, 1, 3, 2, 4)
    return out


if __name__ == "__main__":
    key = jax.random.PRNGKey(0)
    # Small shapes consistent with the module: 3 channels, H/W multiples of
    # gaussian_window (16) and pool (8); exercises the gaussian tiling path.
    x = jax.random.normal(key, (2, 3, 32, 32), dtype=jnp.float32)

    out = hog_forward(x)
    out = jax.block_until_ready(out)

    assert out.shape == (2, 3, NBINS, 32 // POOL, 32 // POOL)
    assert bool(jnp.all(jnp.isfinite(out)))
    print("KERNEL_OK")
</pallas_src>

<mosaic_0001>
module attributes {stable_mosaic.version = 11 : i64} {
  func.func @kernel(%arg0: i32, %arg1: memref<1x3x34x32xf32, #tpu.memory_space<vmem>>, %arg2: memref<16x32xf32, #tpu.memory_space<vmem>>, %arg3: memref<4x32xf32, #tpu.memory_space<vmem>>, %arg4: memref<288x36xf32, #tpu.memory_space<vmem>>, %arg5: memref<36x4xf32, #tpu.memory_space<vmem>>, %arg6: memref<4x36xf32, #tpu.memory_space<vmem>>, %arg7: memref<1x3x4x36xf32, #tpu.memory_space<vmem>>) attributes {dimension_semantics = [#tpu.dimension_semantics<parallel>], iteration_bounds = array<i64: 2>, scalar_prefetch = 0 : i64, scratch_operands = 0 : i64, tpu.core_type = #tpu.core_type<tc>, window_params = [{transform_indices = @transform_0, window_bounds = array<i64: 1, 3, 34, 32>}, {pipeline_mode = #tpu.pipeline_mode<synchronous>, transform_indices = @transform_1, window_bounds = array<i64: 16, 32>}, {pipeline_mode = #tpu.pipeline_mode<synchronous>, transform_indices = @transform_2, window_bounds = array<i64: 4, 32>}, {pipeline_mode = #tpu.pipeline_mode<synchronous>, transform_indices = @transform_3, window_bounds = array<i64: 288, 36>}, {pipeline_mode = #tpu.pipeline_mode<synchronous>, transform_indices = @transform_4, window_bounds = array<i64: 36, 4>}, {pipeline_mode = #tpu.pipeline_mode<synchronous>, transform_indices = @transform_5, window_bounds = array<i64: 4, 36>}, {transform_indices = @transform_6, window_bounds = array<i64: 1, 3, 4, 36>}]} {
    %c0 = arith.constant 0 : index
    %c0_0 = arith.constant 0 : index
    %c0_1 = arith.constant 0 : index
    %c0_2 = arith.constant 0 : index
    %0 = vector.load %arg1[%c0, %c0_0, %c0_1, %c0_2] : memref<1x3x34x32xf32, #tpu.memory_space<vmem>>, vector<1x3x34x32xf32>
    %1 = vector.shape_cast %0 : vector<1x3x34x32xf32> to vector<3x34x32xf32>
    %2 = vector.extract_strided_slice %1 {offsets = [0, 0, 1], sizes = [3, 34, 1], strides = [1, 1, 1]} : vector<3x34x32xf32> to vector<3x34x1xf32>
    %3 = vector.extract_strided_slice %1 {offsets = [0, 0, 0], sizes = [3, 34, 31], strides = [1, 1, 1]} : vector<3x34x32xf32> to vector<3x34x31xf32>
    %4 = tpu.concatenate %2, %3 in 2 : vector<3x34x1xf32>, vector<3x34x31xf32> -> vector<3x34x32xf32>
    %5 = vector.extract_strided_slice %1 {offsets = [0, 0, 1], sizes = [3, 34, 31], strides = [1, 1, 1]} : vector<3x34x32xf32> to vector<3x34x31xf32>
    %6 = vector.extract_strided_slice %1 {offsets = [0, 0, 30], sizes = [3, 34, 1], strides = [1, 1, 1]} : vector<3x34x32xf32> to vector<3x34x1xf32>
    %7 = tpu.concatenate %5, %6 in 2 : vector<3x34x31xf32>, vector<3x34x1xf32> -> vector<3x34x32xf32>
    %8 = arith.subf %4, %7 : vector<3x34x32xf32>
    %cst = arith.constant 2.000000e+00 : f32
    %9 = vector.broadcast %cst : f32 to vector<3x34x32xf32>
    %10 = arith.mulf %9, %1 : vector<3x34x32xf32>
    %11 = arith.addf %4, %10 : vector<3x34x32xf32>
    %12 = arith.addf %11, %7 : vector<3x34x32xf32>
    %13 = vector.extract_strided_slice %8 {offsets = [0, 0, 0], sizes = [3, 32, 32], strides = [1, 1, 1]} : vector<3x34x32xf32> to vector<3x32x32xf32>
    %14 = vector.extract_strided_slice %8 {offsets = [0, 1, 0], sizes = [3, 32, 32], strides = [1, 1, 1]} : vector<3x34x32xf32> to vector<3x32x32xf32>
    %cst_3 = arith.constant 2.000000e+00 : f32
    %15 = vector.broadcast %cst_3 : f32 to vector<3x32x32xf32>
    %16 = arith.mulf %15, %14 : vector<3x32x32xf32>
    %17 = arith.addf %13, %16 : vector<3x32x32xf32>
    %18 = vector.extract_strided_slice %8 {offsets = [0, 2, 0], sizes = [3, 32, 32], strides = [1, 1, 1]} : vector<3x34x32xf32> to vector<3x32x32xf32>
    %19 = arith.addf %17, %18 : vector<3x32x32xf32>
    %20 = vector.extract_strided_slice %12 {offsets = [0, 0, 0], sizes = [3, 32, 32], strides = [1, 1, 1]} : vector<3x34x32xf32> to vector<3x32x32xf32>
    %21 = vector.extract_strided_slice %12 {offsets = [0, 2, 0], sizes = [3, 32, 32], strides = [1, 1, 1]} : vector<3x34x32xf32> to vector<3x32x32xf32>
    %22 = arith.subf %20, %21 : vector<3x32x32xf32>
    %23 = arith.mulf %19, %19 : vector<3x32x32xf32>
    %24 = arith.mulf %22, %22 : vector<3x32x32xf32>
    %25 = arith.addf %23, %24 : vector<3x32x32xf32>
    %26 = math.sqrt %25 : vector<3x32x32xf32>
    %c0_4 = arith.constant 0 : index
    %c0_5 = arith.constant 0 : index
    %27 = vector.load %arg2[%c0_4, %c0_5] : memref<16x32xf32, #tpu.memory_space<vmem>>, vector<16x32xf32>
    %28 = tpu.concatenate %27, %27 in 0 : vector<16x32xf32>, vector<16x32xf32> -> vector<32x32xf32>
    %29 = vector.shape_cast %28 : vector<32x32xf32> to vector<1x32x32xf32>
    %30 = vector.broadcast %29 : vector<1x32x32xf32> to vector<3x32x32xf32>
    %31 = arith.mulf %26, %30 : vector<3x32x32xf32>
    %cst_6 = arith.constant 0.000000e+00 : f32
    %32 = vector.broadcast %cst_6 : f32 to vector<3x32x32xf32>
    %33 = arith.cmpf olt, %19, %32 : vector<3x32x32xf32>
    %cst_7 = arith.constant 0.000000e+00 : f32
    %34 = vector.broadcast %cst_7 : f32 to vector<3x32x32xf32>
    %35 = arith.subf %34, %22 : vector<3x32x32xf32>
    %36 = arith.select %33, %35, %22 : vector<3x32x32xi1>, vector<3x32x32xf32>
    %37 = math.absf %19 : vector<3x32x32xf32>
    %cst_8 = arith.constant 0.000000e+00 : f32
    %38 = vector.broadcast %cst_8 : f32 to vector<3x32x32xf32>
    %39 = arith.cmpf oeq, %19, %38 : vector<3x32x32xf32>
    %cst_9 = arith.constant 0.939692616 : f32
    %40 = vector.broadcast %cst_9 : f32 to vector<3x32x32xf32>
    %41 = arith.mulf %37, %40 : vector<3x32x32xf32>
    %cst_10 = arith.constant 0.342020154 : f32
    %42 = vector.broadcast %cst_10 : f32 to vector<3x32x32xf32>
    %43 = arith.mulf %36, %42 : vector<3x32x32xf32>
    %44 = arith.subf %41, %43 : vector<3x32x32xf32>
    %cst_11 = arith.constant 0.000000e+00 : f32
    %45 = vector.broadcast %cst_11 : f32 to vector<3x32x32xf32>
    %46 = arith.cmpf oge, %44, %45 : vector<3x32x32xf32>
    %cst_12 = arith.constant 0.766044437 : f32
    %47 = vector.broadcast %cst_12 : f32 to vector<3x32x32xf32>
    %48 = arith.mulf %37, %47 : vector<3x32x32xf32>
    %cst_13 = arith.constant 0.642787635 : f32
    %49 = vector.broadcast %cst_13 : f32 to vector<3x32x32xf32>
    %50 = arith.mulf %36, %49 : vector<3x32x32xf32>
    %51 = arith.subf %48, %50 : vector<3x32x32xf32>
    %cst_14 = arith.constant 0.000000e+00 : f32
    %52 = vector.broadcast %cst_14 : f32 to vector<3x32x32xf32>
    %53 = arith.cmpf oge, %51, %52 : vector<3x32x32xf32>
    %cst_15 = arith.constant 5.000000e-01 : f32
    %54 = vector.broadcast %cst_15 : f32 to vector<3x32x32xf32>
    %55 = arith.mulf %37, %54 : vector<3x32x32xf32>
    %cst_16 = arith.constant 0.866025388 : f32
    %56 = vector.broadcast %cst_16 : f32 to vector<3x32x32xf32>
    %57 = arith.mulf %36, %56 : vector<3x32x32xf32>
    %58 = arith.subf %55, %57 : vector<3x32x32xf32>
    %cst_17 = arith.constant 0.000000e+00 : f32
    %59 = vector.broadcast %cst_17 : f32 to vector<3x32x32xf32>
    %60 = arith.cmpf oge, %58, %59 : vector<3x32x32xf32>
    %cst_18 = arith.constant 0.173648179 : f32
    %61 = vector.broadcast %cst_18 : f32 to vector<3x32x32xf32>
    %62 = arith.mulf %37, %61 : vector<3x32x32xf32>
    %cst_19 = arith.constant 0.984807729 : f32
    %63 = vector.broadcast %cst_19 : f32 to vector<3x32x32xf32>
    %64 = arith.mulf %36, %63 : vector<3x32x32xf32>
    %65 = arith.subf %62, %64 : vector<3x32x32xf32>
    %cst_20 = arith.constant 0.000000e+00 : f32
    %66 = vector.broadcast %cst_20 : f32 to vector<3x32x32xf32>
    %67 = arith.cmpf oge, %65, %66 : vector<3x32x32xf32>
    %cst_21 = arith.constant -0.173648179 : f32
    %68 = vector.broadcast %cst_21 : f32 to vector<3x32x32xf32>
    %69 = arith.mulf %37, %68 : vector<3x32x32xf32>
    %cst_22 = arith.constant 0.984807729 : f32
    %70 = vector.broadcast %cst_22 : f32 to vector<3x32x32xf32>
    %71 = arith.mulf %36, %70 : vector<3x32x32xf32>
    %72 = arith.subf %69, %71 : vector<3x32x32xf32>
    %cst_23 = arith.constant 0.000000e+00 : f32
    %73 = vector.broadcast %cst_23 : f32 to vector<3x32x32xf32>
    %74 = arith.cmpf oge, %72, %73 : vector<3x32x32xf32>
    %cst_24 = arith.constant -5.000000e-01 : f32
    %75 = vector.broadcast %cst_24 : f32 to vector<3x32x32xf32>
    %76 = arith.mulf %37, %75 : vector<3x32x32xf32>
    %cst_25 = arith.constant 0.866025388 : f32
    %77 = vector.broadcast %cst_25 : f32 to vector<3x32x32xf32>
    %78 = arith.mulf %36, %77 : vector<3x32x32xf32>
    %79 = arith.subf %76, %78 : vector<3x32x32xf32>
    %cst_26 = arith.constant 0.000000e+00 : f32
    %80 = vector.broadcast %cst_26 : f32 to vector<3x32x32xf32>
    %81 = arith.cmpf oge, %79, %80 : vector<3x32x32xf32>
    %cst_27 = arith.constant -0.766044437 : f32
    %82 = vector.broadcast %cst_27 : f32 to vector<3x32x32xf32>
    %83 = arith.mulf %37, %82 : vector<3x32x32xf32>
    %cst_28 = arith.constant 0.642787635 : f32
    %84 = vector.broadcast %cst_28 : f32 to vector<3x32x32xf32>
    %85 = arith.mulf %36, %84 : vector<3x32x32xf32>
    %86 = arith.subf %83, %85 : vector<3x32x32xf32>
    %cst_29 = arith.constant 0.000000e+00 : f32
    %87 = vector.broadcast %cst_29 : f32 to vector<3x32x32xf32>
    %88 = arith.cmpf oge, %86, %87 : vector<3x32x32xf32>
    %cst_30 = arith.constant -0.939692616 : f32
    %89 = vector.broadcast %cst_30 : f32 to vector<3x32x32xf32>
    %90 = arith.mulf %37, %89 : vector<3x32x32xf32>
    %cst_31 = arith.constant 0.342020154 : f32
    %91 = vector.broadcast %cst_31 : f32 to vector<3x32x32xf32>
    %92 = arith.mulf %36, %91 : vector<3x32x32xf32>
    %93 = arith.subf %90, %92 : vector<3x32x32xf32>
    %cst_32 = arith.constant 0.000000e+00 : f32
    %94 = vector.broadcast %cst_32 : f32 to vector<3x32x32xf32>
    %95 = arith.cmpf oge, %93, %94 : vector<3x32x32xf32>
    %cst_33 = arith.constant dense<true> : vector<3x32x32xi1>
    %96 = arith.xori %46, %cst_33 : vector<3x32x32xi1>
    %97 = arith.ori %96, %39 : vector<3x32x32xi1>
    %cst_34 = arith.constant dense<true> : vector<3x32x32xi1>
    %98 = arith.xori %53, %cst_34 : vector<3x32x32xi1>
    %99 = arith.andi %46, %98 : vector<3x32x32xi1>
    %cst_35 = arith.constant dense<true> : vector<3x32x32xi1>
    %100 = arith.xori %60, %cst_35 : vector<3x32x32xi1>
    %101 = arith.andi %53, %100 : vector<3x32x32xi1>
    %cst_36 = arith.constant dense<true> : vector<3x32x32xi1>
    %102 = arith.xori %67, %cst_36 : vector<3x32x32xi1>
    %103 = arith.andi %60, %102 : vector<3x32x32xi1>
    %cst_37 = arith.constant dense<true> : vector<3x32x32xi1>
    %104 = arith.xori %74, %cst_37 : vector<3x32x32xi1>
    %105 = arith.andi %67, %104 : vector<3x32x32xi1>
    %cst_38 = arith.constant dense<true> : vector<3x32x32xi1>
    %106 = arith.xori %81, %cst_38 : vector<3x32x32xi1>
    %107 = arith.andi %74, %106 : vector<3x32x32xi1>
    %cst_39 = arith.constant dense<true> : vector<3x32x32xi1>
    %108 = arith.xori %88, %cst_39 : vector<3x32x32xi1>
    %109 = arith.andi %81, %108 : vector<3x32x32xi1>
    %cst_40 = arith.constant dense<true> : vector<3x32x32xi1>
    %110 = arith.xori %95, %cst_40 : vector<3x32x32xi1>
    %111 = arith.andi %88, %110 : vector<3x32x32xi1>
    %cst_41 = arith.constant dense<true> : vector<3x32x32xi1>
    %112 = arith.xori %39, %cst_41 : vector<3x32x32xi1>
    %113 = arith.andi %95, %112 : vector<3x32x32xi1>
    %cst_42 = arith.constant 0.000000e+00 : f32
    %114 = vector.broadcast %cst_42 : f32 to vector<3x32x32xf32>
    %115 = arith.select %97, %31, %114 : vector<3x32x32xi1>, vector<3x32x32xf32>
    %cst_43 = arith.constant 0.000000e+00 : f32
    %116 = vector.broadcast %cst_43 : f32 to vector<3x32x32xf32>
    %117 = arith.select %99, %31, %116 : vector<3x32x32xi1>, vector<3x32x32xf32>
    %cst_44 = arith.constant 0.000000e+00 : f32
    %118 = vector.broadcast %cst_44 : f32 to vector<3x32x32xf32>
    %119 = arith.select %101, %31, %118 : vector<3x32x32xi1>, vector<3x32x32xf32>
    %cst_45 = arith.constant 0.000000e+00 : f32
    %120 = vector.broadcast %cst_45 : f32 to vector<3x32x32xf32>
    %121 = arith.select %103, %31, %120 : vector<3x32x32xi1>, vector<3x32x32xf32>
    %cst_46 = arith.constant 0.000000e+00 : f32
    %122 = vector.broadcast %cst_46 : f32 to vector<3x32x32xf32>
    %123 = arith.select %105, %31, %122 : vector<3x32x32xi1>, vector<3x32x32xf32>
    %cst_47 = arith.constant 0.000000e+00 : f32
    %124 = vector.broadcast %cst_47 : f32 to vector<3x32x32xf32>
    %125 = arith.select %107, %31, %124 : vector<3x32x32xi1>, vector<3x32x32xf32>
    %cst_48 = arith.constant 0.000000e+00 : f32
    %126 = vector.broadcast %cst_48 : f32 to vector<3x32x32xf32>
    %127 = arith.select %109, %31, %126 : vector<3x32x32xi1>, vector<3x32x32xf32>
    %cst_49 = arith.constant 0.000000e+00 : f32
    %128 = vector.broadcast %cst_49 : f32 to vector<3x32x32xf32>
    %129 = arith.select %111, %31, %128 : vector<3x32x32xi1>, vector<3x32x32xf32>
    %cst_50 = arith.constant 0.000000e+00 : f32
    %130 = vector.broadcast %cst_50 : f32 to vector<3x32x32xf32>
    %131 = arith.select %113, %31, %130 : vector<3x32x32xi1>, vector<3x32x32xf32>
    %132 = tpu.concatenate %115, %117, %119, %121, %123, %125, %127, %129, %131 in 2 : vector<3x32x32xf32>, vector<3x32x32xf32>, vector<3x32x32xf32>, vector<3x32x32xf32>, vector<3x32x32xf32>, vector<3x32x32xf32>, vector<3x32x32xf32>, vector<3x32x32xf32>, vector<3x32x32xf32> -> vector<3x32x288xf32>
    %c0_51 = arith.constant 0 : index
    %c0_52 = arith.constant 0 : index
    %133 = vector.load %arg3[%c0_51, %c0_52] : memref<4x32xf32, #tpu.memory_space<vmem>>, vector<4x32xf32>
    %c0_53 = arith.constant 0 : index
    %c0_54 = arith.constant 0 : index
    %134 = vector.load %arg4[%c0_53, %c0_54] : memref<288x36xf32, #tpu.memory_space<vmem>>, vector<288x36xf32>
    %c0_55 = arith.constant 0 : index
    %c0_56 = arith.constant 0 : index
    %135 = vector.load %arg5[%c0_55, %c0_56] : memref<36x4xf32, #tpu.memory_space<vmem>>, vector<36x4xf32>
    %c0_57 = arith.constant 0 : index
    %c0_58 = arith.constant 0 : index
    %136 = vector.load %arg6[%c0_57, %c0_58] : memref<4x36xf32, #tpu.memory_space<vmem>>, vector<4x36xf32>
    %137 = vector.extract_strided_slice %132 {offsets = [0, 0, 0], sizes = [1, 32, 288], strides = [1, 1, 1]} : vector<3x32x288xf32> to vector<1x32x288xf32>
    %138 = vector.shape_cast %137 : vector<1x32x288xf32> to vector<32x288xf32>
    %cst_59 = arith.constant dense<0.000000e+00> : vector<4x288xf32>
    %139 = tpu.matmul %133, %138, %cst_59 {dimension_numbers = #tpu.dot_dimension_numbers<[1], [0], [0], [1], [0, 0, 1, 1], [], []>} : vector<4x32xf32>, vector<32x288xf32>, vector<4x288xf32> -> vector<4x288xf32>
    %cst_60 = arith.constant dense<0.000000e+00> : vector<4x36xf32>
    %140 = tpu.matmul %139, %134, %cst_60 {dimension_numbers = #tpu.dot_dimension_numbers<[1], [0], [0], [1], [0, 0, 1, 1], [], []>} : vector<4x288xf32>, vector<288x36xf32>, vector<4x36xf32> -> vector<4x36xf32>
    %141 = arith.mulf %140, %140 : vector<4x36xf32>
    %cst_61 = arith.constant dense<0.000000e+00> : vector<4x4xf32>
    %142 = tpu.matmul %141, %135, %cst_61 {dimension_numbers = #tpu.dot_dimension_numbers<[1], [0], [0], [1], [0, 0, 1, 1], [], []>} : vector<4x36xf32>, vector<36x4xf32>, vector<4x4xf32> -> vector<4x4xf32>
    %143 = math.sqrt %142 : vector<4x4xf32>
    %cst_62 = arith.constant 9.99999996E-13 : f32
    %144 = vector.broadcast %cst_62 : f32 to vector<4x4xf32>
    %145 = arith.maximumf %143, %144 : vector<4x4xf32>
    %cst_63 = arith.constant 1.000000e+00 : f32
    %146 = vector.broadcast %cst_63 : f32 to vector<4x4xf32>
    %147 = arith.divf %146, %145 : vector<4x4xf32>
    %cst_64 = arith.constant dense<0.000000e+00> : vector<4x36xf32>
    %148 = tpu.matmul %147, %136, %cst_64 {dimension_numbers = #tpu.dot_dimension_numbers<[1], [0], [0], [1], [0, 0, 1, 1], [], []>} : vector<4x4xf32>, vector<4x36xf32>, vector<4x36xf32> -> vector<4x36xf32>
    %149 = arith.mulf %140, %148 : vector<4x36xf32>
    %c0_65 = arith.constant 0 : index
    %c0_66 = arith.constant 0 : index
    %c0_67 = arith.constant 0 : index
    %c0_68 = arith.constant 0 : index
    %150 = vector.load %arg7[%c0_65, %c0_66, %c0_67, %c0_68] : memref<1x3x4x36xf32, #tpu.memory_space<vmem>>, vector<1x1x4x36xf32>
    %151 = vector.shape_cast %150 : vector<1x1x4x36xf32> to vector<4x36xf32>
    %152 = vector.shape_cast %149 : vector<4x36xf32> to vector<1x1x4x36xf32>
    tpu.vector_store %arg7[%c0_65, %c0_66, %c0_67, %c0_68], %152 {strides = array<i32>} : memref<1x3x4x36xf32, #tpu.memory_space<vmem>>, vector<1x1x4x36xf32>,
    %153 = vector.extract_strided_slice %132 {offsets = [1, 0, 0], sizes = [1, 32, 288], strides = [1, 1, 1]} : vector<3x32x288xf32> to vector<1x32x288xf32>
    %154 = vector.shape_cast %153 : vector<1x32x288xf32> to vector<32x288xf32>
    %cst_69 = arith.constant dense<0.000000e+00> : vector<4x288xf32>
    %155 = tpu.matmul %133, %154, %cst_69 {dimension_numbers = #tpu.dot_dimension_numbers<[1], [0], [0], [1], [0, 0, 1, 1], [], []>} : vector<4x32xf32>, vector<32x288xf32>, vector<4x288xf32> -> vector<4x288xf32>
    %cst_70 = arith.constant dense<0.000000e+00> : vector<4x36xf32>
    %156 = tpu.matmul %155, %134, %cst_70 {dimension_numbers = #tpu.dot_dimension_numbers<[1], [0], [0], [1], [0, 0, 1, 1], [], []>} : vector<4x288xf32>, vector<288x36xf32>, vector<4x36xf32> -> vector<4x36xf32>
    %157 = arith.mulf %156, %156 : vector<4x36xf32>
    %cst_71 = arith.constant dense<0.000000e+00> : vector<4x4xf32>
    %158 = tpu.matmul %157, %135, %cst_71 {dimension_numbers = #tpu.dot_dimension_numbers<[1], [0], [0], [1], [0, 0, 1, 1], [], []>} : vector<4x36xf32>, vector<36x4xf32>, vector<4x4xf32> -> vector<4x4xf32>
    %159 = math.sqrt %158 : vector<4x4xf32>
    %cst_72 = arith.constant 9.99999996E-13 : f32
    %160 = vector.broadcast %cst_72 : f32 to vector<4x4xf32>
    %161 = arith.maximumf %159, %160 : vector<4x4xf32>
    %cst_73 = arith.constant 1.000000e+00 : f32
    %162 = vector.broadcast %cst_73 : f32 to vector<4x4xf32>
    %163 = arith.divf %162, %161 : vector<4x4xf32>
    %cst_74 = arith.constant dense<0.000000e+00> : vector<4x36xf32>
    %164 = tpu.matmul %163, %136, %cst_74 {dimension_numbers = #tpu.dot_dimension_numbers<[1], [0], [0], [1], [0, 0, 1, 1], [], []>} : vector<4x4xf32>, vector<4x36xf32>, vector<4x36xf32> -> vector<4x36xf32>
    %165 = arith.mulf %156, %164 : vector<4x36xf32>
    %c0_75 = arith.constant 0 : index
    %c1 = arith.constant 1 : index
    %c0_76 = arith.constant 0 : index
    %c0_77 = arith.constant 0 : index
    %166 = vector.load %arg7[%c0_75, %c1, %c0_76, %c0_77] : memref<1x3x4x36xf32, #tpu.memory_space<vmem>>, vector<1x1x4x36xf32>
    %167 = vector.shape_cast %166 : vector<1x1x4x36xf32> to vector<4x36xf32>
    %168 = vector.shape_cast %165 : vector<4x36xf32> to vector<1x1x4x36xf32>
    tpu.vector_store %arg7[%c0_75, %c1, %c0_76, %c0_77], %168 {strides = array<i32>} : memref<1x3x4x36xf32, #tpu.memory_space<vmem>>, vector<1x1x4x36xf32>,
    %169 = vector.extract_strided_slice %132 {offsets = [2, 0, 0], sizes = [1, 32, 288], strides = [1, 1, 1]} : vector<3x32x288xf32> to vector<1x32x288xf32>
    %170 = vector.shape_cast %169 : vector<1x32x288xf32> to vector<32x288xf32>
    %cst_78 = arith.constant dense<0.000000e+00> : vector<4x288xf32>
    %171 = tpu.matmul %133, %170, %cst_78 {dimension_numbers = #tpu.dot_dimension_numbers<[1], [0], [0], [1], [0, 0, 1, 1], [], []>} : vector<4x32xf32>, vector<32x288xf32>, vector<4x288xf32> -> vector<4x288xf32>
    %cst_79 = arith.constant dense<0.000000e+00> : vector<4x36xf32>
    %172 = tpu.matmul %171, %134, %cst_79 {dimension_numbers = #tpu.dot_dimension_numbers<[1], [0], [0], [1], [0, 0, 1, 1], [], []>} : vector<4x288xf32>, vector<288x36xf32>, vector<4x36xf32> -> vector<4x36xf32>
    %173 = arith.mulf %172, %172 : vector<4x36xf32>
    %cst_80 = arith.constant dense<0.000000e+00> : vector<4x4xf32>
    %174 = tpu.matmul %173, %135, %cst_80 {dimension_numbers = #tpu.dot_dimension_numbers<[1], [0], [0], [1], [0, 0, 1, 1], [], []>} : vector<4x36xf32>, vector<36x4xf32>, vector<4x4xf32> -> vector<4x4xf32>
    %175 = math.sqrt %174 : vector<4x4xf32>
    %cst_81 = arith.constant 9.99999996E-13 : f32
    %176 = vector.broadcast %cst_81 : f32 to vector<4x4xf32>
    %177 = arith.maximumf %175, %176 : vector<4x4xf32>
    %cst_82 = arith.constant 1.000000e+00 : f32
    %178 = vector.broadcast %cst_82 : f32 to vector<4x4xf32>
    %179 = arith.divf %178, %177 : vector<4x4xf32>
    %cst_83 = arith.constant dense<0.000000e+00> : vector<4x36xf32>
    %180 = tpu.matmul %179, %136, %cst_83 {dimension_numbers = #tpu.dot_dimension_numbers<[1], [0], [0], [1], [0, 0, 1, 1], [], []>} : vector<4x4xf32>, vector<4x36xf32>, vector<4x36xf32> -> vector<4x36xf32>
    %181 = arith.mulf %172, %180 : vector<4x36xf32>
    %c0_84 = arith.constant 0 : index
    %c2 = arith.constant 2 : index
    %c0_85 = arith.constant 0 : index
    %c0_86 = arith.constant 0 : index
    %182 = vector.load %arg7[%c0_84, %c2, %c0_85, %c0_86] : memref<1x3x4x36xf32, #tpu.memory_space<vmem>>, vector<1x1x4x36xf32>
    %183 = vector.shape_cast %182 : vector<1x1x4x36xf32> to vector<4x36xf32>
    %184 = vector.shape_cast %181 : vector<4x36xf32> to vector<1x1x4x36xf32>
    tpu.vector_store %arg7[%c0_84, %c2, %c0_85, %c0_86], %184 {strides = array<i32>} : memref<1x3x4x36xf32, #tpu.memory_space<vmem>>, vector<1x1x4x36xf32>,
    return
  }
  func.func @transform_0(%arg0: i32) -> (i32, i32, i32, i32) {
    %c0_i32 = arith.constant 0 : i32
    %c0_i32_0 = arith.constant 0 : i32
    %c0_i32_1 = arith.constant 0 : i32
    %c0_i32_2 = arith.constant 0 : i32
    return %arg0, %c0_i32, %c0_i32_0, %c0_i32_1 : i32, i32, i32, i32
  }
  func.func @transform_1(%arg0: i32) -> (i32, i32) {
    %c0_i32 = arith.constant 0 : i32
    %c0_i32_0 = arith.constant 0 : i32
    %c0_i32_1 = arith.constant 0 : i32
    return %c0_i32, %c0_i32_0 : i32, i32
  }
  func.func @transform_2(%arg0: i32) -> (i32, i32) {
    %c0_i32 = arith.constant 0 : i32
    %c0_i32_0 = arith.constant 0 : i32
    %c0_i32_1 = arith.constant 0 : i32
    return %c0_i32, %c0_i32_0 : i32, i32
  }
  func.func @transform_3(%arg0: i32) -> (i32, i32) {
    %c0_i32 = arith.constant 0 : i32
    %c0_i32_0 = arith.constant 0 : i32
    %c0_i32_1 = arith.constant 0 : i32
    return %c0_i32, %c0_i32_0 : i32, i32
  }
  func.func @transform_4(%arg0: i32) -> (i32, i32) {
    %c0_i32 = arith.constant 0 : i32
    %c0_i32_0 = arith.constant 0 : i32
    %c0_i32_1 = arith.constant 0 : i32
    return %c0_i32, %c0_i32_0 : i32, i32
  }
  func.func @transform_5(%arg0: i32) -> (i32, i32) {
    %c0_i32 = arith.constant 0 : i32
    %c0_i32_0 = arith.constant 0 : i32
    %c0_i32_1 = arith.constant 0 : i32
    return %c0_i32, %c0_i32_0 : i32, i32
  }
  func.func @transform_6(%arg0: i32) -> (i32, i32, i32, i32) {
    %c0_i32 = arith.constant 0 : i32
    %c0_i32_0 = arith.constant 0 : i32
    %c0_i32_1 = arith.constant 0 : i32
    %c0_i32_2 = arith.constant 0 : i32
    return %arg0, %c0_i32, %c0_i32_0, %c0_i32_1 : i32, i32, i32, i32
  }
}

</mosaic_0001>

<bundles_post_ra>
// kernel: tpu_custom_call.1
= control target key start
LH: loop header
LB: loop body
LE: loop exit
PB: predicated region body
PF: predicated region fallthrough
CT: control target
= control target key end

     0   :  { %11 = vsyncpa [#allocation3], 0  ;;  %s7038_s0 = inlined_call_operand.vmem [shape: f32[2,3,34,32], index: 0, kind: input, shape index: {}]   ;;  %s7039_s1 = inlined_call_operand.vmem [shape: f32[16,32], index: 1, kind: input, shape index: {}]   ;;  %s7040_s2 = inlined_call_operand.vmem [shape: f32[4,32], index: 2, kind: input, shape index: {}]   ;;  %s7041_s3 = inlined_call_operand.vmem [shape: f32[288,36], index: 3, kind: input, shape index: {}]   ;;  %s7042_s4 = inlined_call_operand.vmem [shape: f32[36,4], index: 4, kind: input, shape index: {}]   ;;  %s7043_s5 = inlined_call_operand.vmem [shape: f32[4,36], index: 5, kind: input, shape index: {}]   ;;  %s7044_s6 = inlined_call_operand.hbm [shape: f32[2,3,4,36], index: 6, kind: output, shape index: {}]  }
   0x1   :  { %13 = vsyncpa [#allocation3 + $0x1], 0  ;;  %s3922_s21 = smov 0   ;;  %s3924_s22 = smov 0  }
   0x2   :  { %s3926_s23 = smov 0   ;;  %s3928_s24 = smov 0  }
   0x3 LB: > { %s3943_s25 = sadd.s32 4294967295, %s3875_s24   ;;  %s3357_s26 = sadd.s32 4294967294, %s3875_s24   ;;  %s3875_s24 = sphi %s3928_s24, %s7659_s24   ;;  %s3871_s23 = sphi %s3926_s23, %s7658_s23   ;;  %s3867_s22 = sphi %s3924_s22, %s7657_s22   ;;  %s3863_s21 = sphi %s3922_s21, %s7656_s21  }
   0x4   : > { %s3947_s27 = sadd.s32 1, %s3875_s24   ;;  %s157_s28 = sadd.s32 1, %s3871_s23 }
   0x5   : > { %s154_s29 = ssub.s32 %s3875_s24, %s3947_s27  ;;  %p167_p0 = scmp.ne.s32.totalorder %s3871_s23, %s3867_s22 }
   0x6   : > { %p155_p1 = scmp.eq.s32.totalorder %s154_s29, 0  ;;  %p168_p2 = scmp.eq.s32.totalorder %s3943_s25, 1 }
   0x7   : > { %p173_p3 = scmp.ne.s32.totalorder %s3867_s22, %s3863_s21  ;;  %p174_p4 = scmp.eq.s32.totalorder %s3357_s26, 1 }
   0x8   : > { %s3958_s30 = scalar_select %p155_p1, %s3871_s23, %s157_s28  }
   0x9   : > { %p3960_p5 = por %p168_p2, %p167_p0  ;;  %p3964_p6 = por %p174_p4, %p173_p3 }
   0xa   : > { %p3360_p7 = scmp.ge.s32.totalorder %s3875_s24, 1  ;;  %p215_p8 = scmp.lt.s32.totalorder %s3875_s24, 3 }
   0xc   : > { %p216_p9 = pnand %p3360_p7, %p215_p8 }
   0xe   : > { %219 = sbr.rel (%p216_p9) target bundleno = 2291 (0x8f3), region = 44 }
  0x13   : > { %p245_p10 = scmp.lt.s32.totalorder %s3943_s25, 1  ;;  %s3877_s14 = smov 1   ;;  %v7087_v5 = vmov 0.0   ;;  %vm7048_vm0 = vcmask 7168   ;;  %vm7047_vm1 = vcmask 252928   ;;  %vm7045_vm2 = vcmask 1046528  }
  0x14   : > { %s3878_s15 = smov 127   ;;  %3559 = vmatprep.subr.mxu1 %v7087_v5  ;;  %2004 = vmatprep.mubr.f32.mxu0 %v7087_v5  ;;  %vm7046_vm3 = vcmask 1045504   ;;  %s3881_s20 = smov 32  }
  0x15   : > { %s246_s9 = scalar_select %p245_p10, %s3943_s25, 1 }
  0x16   : > { %s3882_s26 = smov 64   ;;  %s3883_s28 = smov 96  }
  0x17   : > { %s3680_s10 = smul.u32 120, %s246_s9  ;;  %s242_s12 = sand.u32 1, %s3867_s22  }
  0x18   : > { %s3679_s16 = smul.u32 12, %s242_s12 }
  0x19   : > { %s3975_s13 = scalar_lea.vmem %s7038_s0, %s3680_s10  ;;  %s6996_s10 = scalar_lea.sflag [#allocation3], %s242_s12 }
  0x1a   : > { %v253_v0 = vld [vmem:[%s3975_s13 + $0x18] sm:$0xff]  ;;  %v254_v1 = vld [vmem:[%s3975_s13 + $0x20] sm:$0x3]  ;;  %v252_v2 = vld [vmem:[%s3975_s13 + $0x10] sm:$0xff] }
  0x1b   : > { %331 = vrot.lane.b32.xlu1 %v253_v0, %s3877_s14  ;;  %286 = vrot.lane.b32.xlu0 %v253_v0, %s3878_s15  ;;  %v251_v3 = vld [vmem:[%s3975_s13 + $0x8] sm:$0xff]  ;;  %v250_v4 = vld [vmem:[%s3975_s13] sm:$0xff]  ;;  %v420_v6 = vmul.f32 2.0, %v253_v0  ;;  %v421_v11 = vmul.f32 2.0, %v254_v1  ;;  %v419_v22 = vmul.f32 2.0, %v252_v2 }
  0x1c   : > { %v418_v27 = vmul.f32 2.0, %v251_v3  ;;  %v417_v51 = vmul.f32 2.0, %v250_v4 }
  0x1f   : > { %333 = vrot.lane.b32.xlu1 %v254_v1, %s3877_s14  ;;  %288 = vrot.lane.b32.xlu0 %v254_v1, %s3878_s15 }
  0x23   : > { %329 = vrot.lane.b32.xlu1 %v252_v2, %s3877_s14  ;;  %284 = vrot.lane.b32.xlu0 %v252_v2, %s3878_s15 }
  0x27   : > { %327 = vrot.lane.b32.xlu1 %v251_v3, %s3877_s14  ;;  %282 = vrot.lane.b32.xlu0 %v251_v3, %s3878_s15 }
  0x2b   : > { %325 = vrot.lane.b32.xlu1 %v250_v4, %s3877_s14  ;;  %280 = vrot.lane.b32.xlu0 %v250_v4, %s3878_s15 }
  0x8d   : > { %v332_v7 = vpop.permute.xlu1 %331  ;;  %v287_v8 = vpop.permute.xlu0 %286 }
  0x8e   : > { %v374_v9 = vsel %vm7048_vm0, %v287_v8, %v332_v7  ;;  %v390_v10 = vsel %vm7047_vm1, %v287_v8, %v332_v7 }
  0x8f   : > { %v405_v12 = vsub.f32 %v374_v9, %v390_v10  ;;  %v435_v13 = vadd.f32 %v420_v6, %v374_v9 }
  0x91   : > { %v334_v14 = vpop.permute.xlu1 %333  ;;  %v289_v15 = vpop.permute.xlu0 %288  ;;  %v465_v16 = vmul.f32 2.0, %v405_v12  ;;  %v450_v19 = vadd.f32 %v435_v13, %v390_v10  ;;  %v565_v47 = vrot.slane %v405_v12, 2 }
  0x92   : > { %v375_v17 = vsel %vm7048_vm0, %v289_v15, %v334_v14  ;;  %v391_v18 = vsel %vm7047_vm1, %v289_v15, %v334_v14 }
  0x93   : > { %v406_v20 = vsub.f32 %v375_v17, %v391_v18  ;;  %v436_v21 = vadd.f32 %v421_v11, %v375_v17  ;;  %v498_v28 = vrot.slane %v465_v16, 1  ;;  %v631_v31 = vrot.slane %v450_v19, 2 }
  0x95   : > { %v451_v23 = vadd.f32 %v436_v21, %v391_v18  ;;  %v466_v24 = vmul.f32 2.0, %v406_v20  ;;  %v330_v25 = vpop.permute.xlu1 %329  ;;  %v285_v26 = vpop.permute.xlu0 %284  ;;  %v567_v35 = vrot.slane %v406_v20, 2 }
  0x96   : > { %v373_v29 = vsel %vm7048_vm0, %v285_v26, %v330_v25  ;;  %v389_v30 = vsel %vm7047_vm1, %v285_v26, %v330_v25 }
  0x97   : > { %v500_v32 = vrot.slane %v466_v24, 1  ;;  %v633_v33 = vrot.slane %v451_v23, 2  ;;  %v404_v34 = vsub.f32 %v373_v29, %v389_v30  ;;  %v434_v36 = vadd.f32 %v419_v22, %v373_v29 }
  0x98   : > { %v568_v54 = vsel %vm7046_vm3, %v565_v47, %v567_v35 }
  0x99   : > { %v501_v37 = vsel %vm7045_vm2, %v498_v28, %v500_v32  ;;  %v634_v38 = vsel %vm7046_vm3, %v631_v31, %v633_v33  ;;  %v464_v39 = vmul.f32 2.0, %v404_v34  ;;  %v563_v40 = vrot.slane %v404_v34, 2  ;;  %v328_v41 = vpop.permute.xlu1 %327  ;;  %v283_v42 = vpop.permute.xlu0 %282 }
  0x9a   : > { %v535_v43 = vadd.f32 %v501_v37, %v405_v12  ;;  %v4002_v44 = vsub.f32 %v450_v19, %v634_v38  ;;  %v449_v45 = vadd.f32 %v434_v36, %v389_v30  ;;  %v372_v46 = vsel %vm7048_vm0, %v283_v42, %v328_v41 }
  0x9b   : > { %v496_v48 = vrot.slane %v464_v39, 1  ;;  %v388_v49 = vsel %vm7047_vm1, %v283_v42, %v328_v41  ;;  %v433_v50 = vadd.f32 %v418_v27, %v372_v46  ;;  %v566_v56 = vsel %vm7046_vm3, %v563_v40, %v565_v47 }
  0x9c   : > { %v629_v52 = vrot.slane %v449_v45, 2  ;;  %v403_v53 = vsub.f32 %v372_v46, %v388_v49  ;;  %v4010_v63 = vadd.f32 %v568_v54, %v535_v43  ;;  %v692_v24 = vmul.f32 %v4002_v44, %v4002_v44 }
  0x9d   : > { %v499_v55 = vsel %vm7045_vm2, %v496_v48, %v498_v28  ;;  %v448_v57 = vadd.f32 %v433_v50, %v388_v49  ;;  %v326_v58 = vpop.permute.xlu1 %325  ;;  %v281_v59 = vpop.permute.xlu0 %280  ;;  %v826_v28 = vsub.f32 0.0, %v4002_v44 }
  0x9e   : > { %v534_v60 = vadd.f32 %v499_v55, %v404_v34  ;;  %v632_v61 = vsel %vm7046_vm3, %v629_v52, %v631_v31  ;;  %v463_v62 = vmul.f32 2.0, %v403_v53  ;;  %v371_v2 = vsel %vm7048_vm0, %v281_v59, %v326_v58 }
  0x9f   : > { %v667_v0 = vsub.f32 %v449_v45, %v632_v61  ;;  %v627_v1 = vrot.slane %v448_v57, 2  ;;  %v387_v3 = vsel %vm7047_vm1, %v281_v59, %v326_v58  ;;  %v561_v7 = vrot.slane %v403_v53, 2 }
  0xa0   : > { %v4014_v4 = vadd.f32 %v566_v56, %v534_v60  ;;  %v494_v6 = vrot.slane %v463_v62, 1  ;;  %v402_v8 = vsub.f32 %v371_v2, %v387_v3  ;;  %v432_v10 = vadd.f32 %v417_v51, %v371_v2 }
  0xa1   : > { %v630_v9 = vsel %vm7046_vm3, %v627_v1, %v629_v52  ;;  %v691_v12 = vmul.f32 %v667_v0, %v667_v0  ;;  %v564_v18 = vsel %vm7046_vm3, %v561_v7, %v563_v40  ;;  %v680_v20 = vmul.f32 %v4010_v63, %v4010_v63 }
  0xa2   : > { %v679_v11 = vmul.f32 %v4014_v4, %v4014_v4  ;;  %v497_v13 = vsel %vm7045_vm2, %v494_v6, %v496_v48  ;;  %v666_v15 = vsub.f32 %v448_v57, %v630_v9  ;;  %v447_v16 = vadd.f32 %v432_v10, %v387_v3 }
  0xa3   : > { %v533_v14 = vadd.f32 %v497_v13, %v403_v53  ;;  %v462_v19 = vmul.f32 2.0, %v402_v8  ;;  %v560_v22 = vrot.slane %v402_v8, 2  ;;  %vm813_vm4 = vcmp.lt.f32.partialorder %v4014_v4, 0.0 }
  0xa4   : > { %v4020_v17 = vadd.f32 %v691_v12, %v679_v11  ;;  %v626_v23 = vrot.slane %v447_v16, 2  ;;  %v690_v26 = vmul.f32 %v666_v15, %v666_v15  ;;  %v825_v29 = vsub.f32 0.0, %v667_v0 }
  0xa5   : > { %v4025_v21 = vadd.f32 %v564_v18, %v533_v14  ;;  %v493_v27 = vrot.slane %v462_v19, 1  ;;  %v4035_v31 = vadd.f32 %v692_v24, %v680_v20  ;;  %v562_v34 = vsel %vm7046_vm3, %v560_v22, %v561_v7 }
  0xa6   : > { %3730 = vrsqrt.f32 %v4020_v17  ;;  %v628_v30 = vsel %vm7046_vm3, %v626_v23, %v627_v1  ;;  %vm814_vm5 = vcmp.lt.f32.partialorder %v4010_v63, 0.0  ;;  %v4044_v37 = vand.u32 2147483647, %v4014_v4 }
  0xa7   : > { %v678_v25 = vmul.f32 %v4025_v21, %v4025_v21  ;;  %v495_v33 = vsel %vm7045_vm2, %v493_v27, %v494_v6  ;;  %v665_v35 = vsub.f32 %v447_v16, %v628_v30  ;;  %3732 = vrsqrt.f32 %v4035_v31 }
  0xa8   : > { %v532_v36 = vadd.f32 %v495_v33, %v402_v8  ;;  %v824_v38 = vsub.f32 0.0, %v666_v15  ;;  %v4047_v39 = vsel %vm813_vm4, %v825_v29, %v667_v0  ;;  %vm812_vm6 = vcmp.lt.f32.partialorder %v4025_v21, 0.0 }
  0xa9   : > { %v4037_v32 = vadd.f32 %v690_v26, %v678_v25  ;;  %v689_v41 = vmul.f32 %v665_v35, %v665_v35  ;;  %vm729_vm7 = vcmp.eq.f32.partialorder %v4020_v17, inf  ;;  %v732_v42 = vand.u32 2147483648, %v4020_v17 }
  0xaa   : > { %v4050_v40 = vadd.f32 %v562_v34, %v532_v36  ;;  %v838_v43 = vsel %vm814_vm5, %v826_v28, %v4002_v44  ;;  %v4056_v45 = vand.u32 2147483647, %v4010_v63  ;;  %v4060_v47 = vand.u32 2147483647, %v4025_v21  ;;  %v4156_v34 = vld [vmem:[%s7039_s1] sm:$0xff]  ;;  %v798_v36 = vld [vmem:[%s7039_s1 + $0x8] sm:$0xff] }
  0xab   : > { %3734 = vrsqrt.f32 %v4037_v32  ;;  %v725_v46 = vand.u32 2147483648, %v4037_v32  ;;  %v886_v49 = vmul.f32 0.34202015, %v838_v43  ;;  %v4064_v50 = vsel %vm812_vm6, %v824_v38, %v666_v15 }
  0xac   : > { %v677_v48 = vmul.f32 %v4050_v40, %v4050_v40  ;;  %v1174_v51 = vmul.f32 -0.9396926, %v4056_v45  ;;  %v874_v52 = vmul.f32 0.9396926, %v4056_v45  ;;  %v922_v44 = vmul.f32 0.76604444, %v4056_v45 }
  0xad   : > { %vm731_vm8 = vcmp.eq.f32.partialorder %v4020_v17, 0.0  ;;  %v934_v54 = vmul.f32 0.64278764, %v838_v43  ;;  %v982_v55 = vmul.f32 0.8660254, %v838_v43  ;;  %v823_v57 = vsub.f32 0.0, %v665_v35 }
  0xae   : > { %v4070_v53 = vadd.f32 %v689_v41, %v677_v48  ;;  %v4072_v56 = vmul.f32 0.9848077, %v838_v43  ;;  %vm736_vm9 = vcmp.eq.f32.partialorder %v4035_v31, inf  ;;  %v1186_v58 = vsub.f32 %v1174_v51, %v886_v49 }
  0xaf   : > { %v1066_v59 = vmul.f32 -0.17364818, %v4056_v45  ;;  %v1102_v60 = vmul.f32 -0.5, %v4056_v45  ;;  %vm722_vm10 = vcmp.eq.f32.partialorder %v4037_v32, inf  ;;  %vm738_vm11 = vcmp.eq.f32.partialorder %v4035_v31, 0.0 }
  0xb0   : > { %3736 = vrsqrt.f32 %v4070_v53  ;;  %v739_v61 = vand.u32 2147483648, %v4035_v31  ;;  %vm7050_vm12 = vcmp.eq.f32.partialorder %v4010_v63, 0.0  ;;  %vm7049_vm13 = vcmp.eq.f32.partialorder %v4014_v4, 0.0 }
  0xb1   : > { %vm811_vm14 = vcmp.lt.f32.partialorder %v4050_v40, 0.0  ;;  %v898_v0 = vsub.f32 %v874_v52, %v886_v49  ;;  %v946_v1 = vsub.f32 %v922_v44, %v934_v54  ;;  %v1078_v2 = vsub.f32 %v1066_v59, %v4072_v56 }
  0xb2   : > { %v1114_v6 = vsub.f32 %v1102_v60, %v982_v55  ;;  %v4087_v7 = vmul.f32 0.34202015, %v4047_v39  ;;  %v1173_v8 = vmul.f32 -0.9396926, %v4044_v37  ;;  %vm4090_vm15 = vcmp.ge.f32.partialorder %v1186_v58, 0.0 }
  0xb3   : > { %v3731_v62 = vpop.eup %3730  ;;  %vm7051_vm4 = vmmov 1   ;;  %vm4101_vm6 = vcmp.ge.f32.partialorder %v946_v1, 0.0  ;;  %v970_v12 = vmul.f32 0.5, %v4056_v45  ;;  %v1138_v13 = vmul.f32 -0.76604444, %v4056_v45 }
  0xb4   : > { %v728_v3 = vmul.f32 %v3731_v62, %v4020_v17  ;;  %vm4097_vm5 = vmxor %vm7050_vm12, %vm7051_vm4  ;;  %v4111_v15 = vand.u32 2147483647, %v4050_v40  ;;  %vm4113_vm2 = vcmp.ge.f32.partialorder %v1114_v6, 0.0  ;;  %v1185_v18 = vsub.f32 %v1173_v8, %v4087_v7  ;;  %v3733_v20 = vpop.eup %3732 }
  0xb5   : > { %vm4121_vm3 = vmxor %vm7049_vm13, %vm7051_vm4  ;;  %v7127_v19 = vmov 0  ;;  %v4127_v22 = vsel %vm811_vm14, %v823_v57, %v665_v35  ;;  %v994_v25 = vsub.f32 %v970_v12, %v982_v55  ;;  %v1150_v26 = vsub.f32 %v1138_v13, %v934_v54 }
  0xb6   : > { %v730_v14 = vsel %vm729_vm7, %v4020_v17, %v728_v3  ;;  %v7128_v19 = vsel %vm4121_vm3, 4294967295, %v7127_v19  ;;  %vm4129_vm7 = vcmp.ge.f32.partialorder %v898_v0, 0.0  ;;  %vm4136_vm1 = vmxor %vm4101_vm6, %vm7051_vm4  ;;  %v735_v28 = vmul.f32 %v3733_v20, %v4035_v31 }
  0xb7   : > { %vm4145_vm0 = vcmp.ge.f32.partialorder %v1078_v2, 0.0  ;;  %v4150_v30 = vmul.f32 0.34202015, %v4064_v50  ;;  %v1172_v33 = vmul.f32 -0.9396926, %v4060_v47  ;;  %v733_v35 = vsel %vm731_vm8, %v732_v42, %v730_v14  ;;  %vm4167_vm13 = vmxor %vm4113_vm2, %vm7051_vm4 }
  0xb8   : > { %v3735_v27 = vpop.eup %3734  ;;  %vm4171_vm12 = vcmp.ge.f32.partialorder %v994_v25, 0.0  ;;  %v7137_v43 = vmov 0  ;;  %v4176_v17 = vmul.f32 0.8660254, %v4047_v39  ;;  %v737_v42 = vsel %vm736_vm9, %v4035_v31, %v735_v28  ;;  %vm7147_vm9 = vmand %vm4129_vm7, %vm4136_vm1 }
  0xb9   : > { %v721_v38 = vmul.f32 %v3735_v27, %v4037_v32  ;;  %v7138_v43 = vsel %vm4171_vm12, 4294967295, %v7137_v43  ;;  %vm4185_vm14 = vcmp.ge.f32.partialorder %v1185_v18, 0.0  ;;  %vm4189_vm4 = vcmp.ge.f32.partialorder %v1150_v26, 0.0 }
  0xba   : > { %v4194_v51 = vmul.f32 0.9848077, %v4047_v39  ;;  %v740_v44 = vsel %vm738_vm11, %v739_v61, %v737_v42  ;;  %v1065_v54 = vmul.f32 -0.17364818, %v4044_v37  ;;  %v1101_v55 = vmul.f32 -0.5, %v4044_v37 }
  0xbb   : > { %v723_v52 = vsel %vm722_vm10, %v4037_v32, %v721_v38  ;;  %v4208_v57 = vmul.f32 %v4156_v34, %v733_v35  ;;  %vm724_vm8 = vcmp.eq.f32.partialorder %v4037_v32, 0.0  ;;  %v4211_v58 = vmul.f32 %v798_v36, %v740_v44 }
  0xbc   : > { %vm7143_vm10 = vmmov 1   ;;  %v1184_v59 = vsub.f32 %v1172_v33, %v4150_v30  ;;  %v726_v60 = vsel %vm724_vm8, %v725_v46, %v723_v52  ;;  %v1113_v61 = vsub.f32 %v1101_v55, %v4176_v17  ;;  %vm7146_vm8 = vmand %vm4090_vm15, %vm4097_vm5 }
  0xbd   : > { %vm4216_vm11 = vmxor %vm4171_vm12, %vm7143_vm10  ;;  %v4229_v62 = vmul.f32 0.34202015, %v4127_v22  ;;  %v1171_v0 = vmul.f32 -0.9396926, %v4111_v15  ;;  %3560 = vmatpush3.msk.msra.mxu1 %vm7146_vm8, %v4211_v58  ;;  %v1438_v32 = vsel %vm7147_vm9, %v4211_v58, 0.0  ;;  %vm7056_vm5 = vcmp.eq.f32.partialorder %v4025_v21, 0.0  ;;  %v3737_v2 = vpop.eup %3736 }
  0xbe   : > { %vm7148_vm12 = vmand %vm4145_vm0, %vm4167_vm13  ;;  %vm717_vm1 = vcmp.eq.f32.partialorder %v4070_v53, 0.0  ;;  %v718_v3 = vand.u32 2147483648, %v4070_v53  ;;  %1549 = vrot.lane.b32.xlu1 %v1438_v32, %s3881_s20  ;;  %v1077_v6 = vsub.f32 %v1065_v54, %v4194_v51  ;;  %v1018_v8 = vmul.f32 0.17364818, %v4056_v45  ;;  %3561 = vmatprep.subr.mxu1 %v7087_v5 }
  0xbf   : > { %v1486_v46 = vsel %vm7148_vm12, %v4211_v58, 0.0  ;;  %vm4254_vm3 = vmxor %vm4189_vm4, %vm7143_vm10  ;;  %v4269_v10 = vmul.f32 %v798_v36, %v726_v60  ;;  %v714_v12 = vmul.f32 %v3737_v2, %v4070_v53  ;;  %vm4278_vm9 = vcmp.ge.f32.partialorder %v1184_v59, 0.0 }
  0xc0   : > { %1693 = vrot.lane.b32.xlu0 %v1486_v46, %s3881_s20  ;;  %vm1270_vm12 = vmand %vm4101_vm6, %vm4216_vm11  ;;  %vm7153_vm6 = vnez %v7128_v19  ;;  %v1183_v16 = vsub.f32 %v1171_v0, %v4229_v62  ;;  %v921_v18 = vmul.f32 0.76604444, %v4044_v37  ;;  %v933_v20 = vmul.f32 0.64278764, %v4047_v39 }
  0xc1   : > { %v1450_v13 = vsel %vm1270_vm12, %v4211_v58, 0.0  ;;  %vm1366_vm13 = vmand %vm4113_vm2, %vm4254_vm3  ;;  %vm4295_vm12 = vcmp.ge.f32.partialorder %v1113_v61, 0.0  ;;  %vm7159_vm2 = vcmp.eq.f32.partialorder %v4070_v53, inf  ;;  %v1042_v26 = vsub.f32 %v1018_v8, %v4072_v56 }
  0xc2   : > { %vm7154_vm11 = vmand %vm4185_vm14, %vm7153_vm6  ;;  %v716_v19 = vsel %vm7159_vm2, %v4070_v53, %v714_v12  ;;  %v1498_v24 = vsel %vm1366_vm13, %v4211_v58, 0.0  ;;  %v873_v27 = vmul.f32 0.9396926, %v4044_v37  ;;  %1597 = vrot.lane.b32.xlu1 %v1450_v13, %s3882_s26  ;;  %vm4324_vm13 = vcmp.ge.f32.partialorder %v1077_v6, 0.0 }
  0xc3   : > { %3562 = vmatpush3.msk.msra.mxu1 %vm7154_vm11, %v4208_v57  ;;  %vm4291_vm8 = vmxor %vm7056_vm5, %vm7143_vm10  ;;  %v719_v39 = vsel %vm717_vm1, %v718_v3, %v716_v19  ;;  %v969_v56 = vmul.f32 0.5, %v4044_v37  ;;  %vm7055_vm6 = vcmp.eq.f32.partialorder %v4050_v40, 0.0  ;;  %v7164_v28 = vmov 0  ;;  %v4675_v19 = vld [vmem:[%s3975_s13 + $0x48] sm:$0x3] }
  0xc4   : > { %3563 = vmatprep.subr.mxu1 %v7087_v5  ;;  %vm4310_vm3 = vmxor %vm4090_vm15, %vm7143_vm10  ;;  %1741 = vrot.lane.b32.xlu0 %v1498_v24, %s3882_s26  ;;  %v4336_v53 = vmul.f32 %v4156_v34, %v719_v39  ;;  %v945_v33 = vsub.f32 %v921_v18, %v933_v20  ;;  %v1137_v35 = vmul.f32 -0.76604444, %v4044_v37  ;;  %vm4350_vm2 = vcmp.ge.f32.partialorder %v1042_v26, 0.0 }
  0xc5   : > { %vm1412_vm15 = vmand %vm4278_vm9, %vm4291_vm8  ;;  %vm4342_vm8 = vcmp.ge.f32.partialorder %v1183_v16, 0.0  ;;  %v7166_v34 = vmov 0  ;;  %v897_v38 = vsub.f32 %v873_v27, %v4087_v7  ;;  %v993_v42 = vsub.f32 %v969_v56, %v4176_v17  ;;  %v4746_v27 = vld [vmem:[%s3975_s13 + $0x38] sm:$0xff] }
  0xc6   : > { %3564 = vmatpush3.msk.msra.mxu1 %vm1412_vm15, %v4269_v10  ;;  %vm1390_vm1 = vmand %vm4189_vm4, %vm4310_vm3  ;;  %v7165_v28 = vsel %vm4342_vm8, 4294967295, %v7164_v28  ;;  %v7167_v34 = vsel %vm4350_vm2, 4294967295, %v7166_v34  ;;  %v1149_v49 = vsub.f32 %v1137_v35, %v933_v20  ;;  %v980_v52 = vmul.f32 0.8660254, %v4064_v50 }
  0xc7   : > { %vm1329_vm11 = vmxor %vm4295_vm12, %vm7143_vm10  ;;  %3565 = vmatprep.subr.mxu1 %v7087_v5  ;;  %v1510_v36 = vsel %vm1390_vm1, %v4211_v58, 0.0  ;;  %vm4374_vm5 = vcmp.ge.f32.partialorder %v897_v38, 0.0  ;;  %v1100_v44 = vmul.f32 -0.5, %v4060_v47  ;;  %v4387_v31 = vmul.f32 0.9848077, %v4064_v50 }
  0xc8   : > { %vm1341_vm4 = vmand %vm4324_vm13, %vm1329_vm11  ;;  %1789 = vrot.lane.b32.xlu1 %v1510_v36, %s3883_s28  ;;  %vm4368_vm11 = vcmp.ge.f32.partialorder %v945_v33, 0.0  ;;  %v1017_v59 = vmul.f32 0.17364818, %v4044_v37  ;;  %v920_v32 = vmul.f32 0.76604444, %v4060_v47  ;;  %v968_v6 = vmul.f32 0.5, %v4060_v47 }
  0xc9   : > { %v1485_v41 = vsel %vm1341_vm4, %v4208_v57, 0.0  ;;  %vm1399_vm3 = vmxor %vm7055_vm6, %vm7143_vm10  ;;  %vm7170_vm4 = vnez %v7138_v43  ;;  %v1064_v43 = vmul.f32 -0.17364818, %v4060_v47  ;;  %v1112_v0 = vsub.f32 %v1100_v44, %v980_v52 }
  0xca   : > { %1691 = vrot.lane.b32.xlu0 %v1485_v41, %s3881_s20  ;;  %vm1411_vm15 = vmand %vm4342_vm8, %vm1399_vm3  ;;  %vm4382_vm3 = vcmp.ge.f32.partialorder %v993_v42, 0.0  ;;  %v932_v46 = vmul.f32 0.64278764, %v4064_v50  ;;  %v1041_v2 = vsub.f32 %v1017_v59, %v4194_v51  ;;  %v872_v3 = vmul.f32 0.9396926, %v4060_v47 }
  0xcb   : > { %3566 = vmatpush3.msk.msra.mxu1 %vm1411_vm15, %v4336_v53  ;;  %vm1282_vm1 = vmxor %vm4350_vm2, %vm7143_vm10  ;;  %v1076_v37 = vsub.f32 %v1064_v43, %v4387_v31  ;;  %v1136_v13 = vmul.f32 -0.76604444, %v4060_v47  ;;  %v7181_v48 = vmov 0  ;;  %v992_v16 = vsub.f32 %v968_v6, %v980_v52  ;;  %v4601_v50 = vld [vmem:[%s7040_s2] sm:$0xf] }
  0xcc   : > { %vm1294_vm6 = vmand %vm7170_vm4, %vm1282_vm1  ;;  %3570 = vmatprep.subr.mxu1 %v7087_v5  ;;  %vm4397_vm1 = vcmp.ge.f32.partialorder %v1149_v49, 0.0  ;;  %v944_v12 = vsub.f32 %v920_v32, %v932_v46  ;;  %v896_v14 = vsub.f32 %v872_v3, %v4150_v30  ;;  %v979_v24 = vmul.f32 0.8660254, %v4127_v22 }
  0xcd   : > { %v1462_v54 = vsel %vm1294_vm6, %v4211_v58, 0.0  ;;  %vm1233_vm15 = vmxor %vm4368_vm11, %vm7143_vm10  ;;  %vm4432_vm8 = vcmp.ge.f32.partialorder %v1076_v37, 0.0  ;;  %v1148_v30 = vsub.f32 %v1136_v13, %v932_v46  ;;  %v1099_v25 = vmul.f32 -0.5, %v4111_v15 }
  0xce   : > { %1645 = vrot.lane.b32.xlu1 %v1462_v54, %s3883_s28  ;;  %vm1245_vm6 = vmand %vm4374_vm5, %vm1233_vm15  ;;  %v4472_v39 = vmul.f32 0.9848077, %v4127_v22  ;;  %v1063_v56 = vmul.f32 -0.17364818, %v4111_v15  ;;  %v1016_v33 = vmul.f32 0.17364818, %v4060_v47 }
  0xcf   : > { %v1437_v61 = vsel %vm1245_vm6, %v4208_v57, 0.0  ;;  %vm1257_vm4 = vmxor %vm4382_vm3, %vm7143_vm10  ;;  %vm4425_vm6 = vcmp.ge.f32.partialorder %v1112_v0, 0.0  ;;  %v1111_v38 = vsub.f32 %v1099_v25, %v979_v24  ;;  %v919_v41 = vmul.f32 0.76604444, %v4111_v15 }
  0xd0   : > { %1547 = vrot.lane.b32.xlu0 %v1437_v61, %s3881_s20  ;;  %vm1269_vm2 = vmand %vm4368_vm11, %vm1257_vm4  ;;  %v1075_v47 = vsub.f32 %v1063_v56, %v4472_v39  ;;  %v931_v42 = vmul.f32 0.64278764, %v4127_v22  ;;  %v1040_v49 = vsub.f32 %v1016_v33, %v4387_v31  ;;  %v967_v52 = vmul.f32 0.5, %v4111_v15 }
  0xd1   : > { %v1449_v1 = vsel %vm1269_vm2, %v4208_v57, 0.0  ;;  %vm1353_vm15 = vmxor %vm4397_vm1, %vm7143_vm10  ;;  %v871_v54 = vmul.f32 0.9396926, %v4111_v15  ;;  %v1135_v43 = vmul.f32 -0.76604444, %v4111_v15  ;;  %v7195_v59 = vmov 0 }
  0xd2   : > { %1595 = vrot.lane.b32.xlu1 %v1449_v1, %s3882_s26  ;;  %vm1365_vm11 = vmand %vm4295_vm12, %vm1353_vm15  ;;  %vm4438_vm12 = vcmp.ge.f32.partialorder %v1041_v2, 0.0  ;;  %v943_v31 = vsub.f32 %v919_v41, %v931_v42  ;;  %v991_v60 = vsub.f32 %v967_v52, %v979_v24  ;;  %v1015_v61 = vmul.f32 0.17364818, %v4111_v15  ;;  %v4691_v24 = vld [vmem:[%s3975_s13 + $0x40] sm:$0xff] }
  0xd3   : > { %v1497_v8 = vsel %vm1365_vm11, %v4208_v57, 0.0  ;;  %vm1377_vm2 = vmxor %vm4185_vm14, %vm7143_vm10  ;;  %v7182_v48 = vsel %vm4438_vm12, 4294967295, %v7181_v48  ;;  %vm4453_vm11 = vcmp.ge.f32.partialorder %v944_v12, 0.0  ;;  %v895_v0 = vsub.f32 %v871_v54, %v4229_v62 }
  0xd4   : > { %1739 = vrot.lane.b32.xlu0 %v1497_v8, %s3882_s26  ;;  %vm1389_vm4 = vmand %vm4397_vm1, %vm1377_vm2  ;;  %v1147_v46 = vsub.f32 %v1135_v43, %v931_v42  ;;  %v1039_v2 = vsub.f32 %v1015_v61, %v4472_v39  ;;  %v7203_v3 = vmov 0  ;;  %v7207_v6 = vmov 0  ;;  %v4753_v39 = vld [vmem:[%s3975_s13 + $0x30] sm:$0xff] }
  0xd5   : > { %v1509_v45 = vsel %vm1389_vm4, %v4208_v57, 0.0  ;;  %vm1328_vm14 = vmxor %vm4425_vm6, %vm7143_vm10  ;;  %vm4460_vm4 = vcmp.ge.f32.partialorder %v896_v14, 0.0  ;;  %v7211_v8 = vmov 0 }
  0xd6   : > { %1787 = vrot.lane.b32.xlu1 %v1509_v45, %s3883_s28  ;;  %vm1340_vm1 = vmand %vm4432_vm8, %vm1328_vm14  ;;  %vm4467_vm14 = vcmp.ge.f32.partialorder %v992_v16, 0.0 }
  0xd7   : > { %v1484_v18 = vsel %vm1340_vm1, %v4269_v10, 0.0  ;;  %vm1281_vm15 = vmxor %vm4438_vm12, %vm7143_vm10 }
  0xd8   : > { %1689 = vrot.lane.b32.xlu0 %v1484_v18, %s3881_s20  ;;  %vm1293_vm2 = vmand %vm4382_vm3, %vm1281_vm15  ;;  %vm4482_vm15 = vcmp.ge.f32.partialorder %v1148_v30, 0.0 }
  0xd9   : > { %v1461_v26 = vsel %vm1293_vm2, %v4208_v57, 0.0  ;;  %vm1232_vm3 = vmxor %vm4453_vm11, %vm7143_vm10 }
  0xda   : > { %1643 = vrot.lane.b32.xlu1 %v1461_v26, %s3883_s28  ;;  %vm1244_vm1 = vmand %vm4460_vm4, %vm1232_vm3 }
  0xdb   : > { %v1436_v36 = vsel %vm1244_vm1, %v4269_v10, 0.0  ;;  %vm1256_vm2 = vmxor %vm4467_vm14, %vm7143_vm10 }
  0xdc   : > { %1545 = vrot.lane.b32.xlu0 %v1436_v36, %s3881_s20  ;;  %vm1268_vm12 = vmand %vm4453_vm11, %vm1256_vm2 }
  0xdd   : > { %v1448_v7 = vsel %vm1268_vm12, %v4269_v10, 0.0  ;;  %vm1352_vm3 = vmxor %vm4482_vm15, %vm7143_vm10  ;;  %vm4509_vm12 = vcmp.ge.f32.partialorder %v1111_v38, 0.0 }
  0xde   : > { %1593 = vrot.lane.b32.xlu1 %v1448_v7, %s3882_s26  ;;  %vm1364_vm1 = vmand %vm4425_vm6, %vm1352_vm3  ;;  %vm4517_vm6 = vcmp.ge.f32.partialorder %v1075_v47, 0.0 }
  0xdf   : > { %v1496_v44 = vsel %vm1364_vm1, %v4269_v10, 0.0  ;;  %vm1376_vm11 = vmxor %vm4278_vm9, %vm7143_vm10  ;;  %vm4523_vm9 = vcmp.ge.f32.partialorder %v1040_v49, 0.0 }
  0xe0   : > { %1737 = vrot.lane.b32.xlu0 %v1496_v44, %s3882_s26  ;;  %vm1388_vm2 = vmand %vm4482_vm15, %vm1376_vm11  ;;  %v7196_v59 = vsel %vm4523_vm9, 4294967295, %v7195_v59  ;;  %vm4539_vm11 = vcmp.ge.f32.partialorder %v943_v31, 0.0 }
  0xe1   : > { %v1508_v11 = vsel %vm1388_vm2, %v4269_v10, 0.0  ;;  %vm1327_vm3 = vmxor %vm4509_vm12, %vm7143_vm10 }
  0xe2   : > { %1785 = vrot.lane.b32.xlu1 %v1508_v11, %s3883_s28  ;;  %vm1339_vm15 = vmand %vm4517_vm6, %vm1327_vm3 }
  0xe3   : > { %v1483_v37 = vsel %vm1339_vm15, %v4336_v53, 0.0  ;;  %vm1280_vm1 = vmxor %vm4523_vm9, %vm7143_vm10  ;;  %vm4554_vm15 = vcmp.ge.f32.partialorder %v991_v60, 0.0 }
  0xe4   : > { %1687 = vrot.lane.b32.xlu0 %v1483_v37, %s3881_s20  ;;  %vm1292_vm2 = vmand %vm4467_vm14, %vm1280_vm1  ;;  %v1930_v37 = vld [vmem:[%s7041_s3 + $0x118] sm:$0xff] }
  0xe5   : > { %vm4549_vm3 = vmxor %vm4129_vm7, %vm7143_vm10  ;;  %v1460_v62 = vsel %vm1292_vm2, %v4269_v10, 0.0  ;;  %vm4567_vm7 = vcmp.ge.f32.partialorder %v895_v0, 0.0  ;;  %vm4583_vm2 = vcmp.ge.f32.partialorder %v1147_v46, 0.0 }
  0xe6   : > { %vm4562_vm9 = vmxor %vm4145_vm0, %vm7143_vm10  ;;  %1641 = vrot.lane.b32.xlu1 %v1460_v62, %s3883_s28 }
  0xe7   : > { %v7204_v3 = vsel %vm4562_vm9, 4294967295, %v7203_v3  ;;  %vm1231_vm14 = vmxor %vm4539_vm11, %vm7143_vm10 }
  0xe8   : > { %vm4577_vm1 = vmxor %vm4324_vm13, %vm7143_vm10 }
  0xe9   : > { %v7208_v6 = vsel %vm4577_vm1, 4294967295, %v7207_v6  ;;  %vm1243_vm0 = vmand %vm4567_vm7, %vm1231_vm14  ;;  %vm7061_vm14 = vmmov 0   ;;  %vm4615_vm1 = vcmp.ge.f32.partialorder %v1039_v2, 0.0 }
  0xea   : > { %vm4590_vm9 = vmxor %vm4374_vm5, %vm7143_vm10  ;;  %v1435_v9 = vsel %vm1243_vm0, %v4336_v53, 0.0  ;;  %3567 = vmatprep.mubr.msk.f32.mxu1 %vm7061_vm14, %v7087_v5 }
  0xeb   : > { %v7212_v8 = vsel %vm4590_vm9, 4294967295, %v7211_v8  ;;  %vm1255_vm13 = vmxor %vm4554_vm15, %vm7143_vm10  ;;  %1543 = vrot.lane.b32.xlu0 %v1435_v9, %s3881_s20  ;;  %vm7217_vm9 = vcmask 261120  }
  0xec   : > { %vm4608_vm5 = vmxor %vm4432_vm8, %vm7143_vm10  ;;  %3568 = vmatmul.mubr.msk.f32.vlgmr.msra.gmra.mxu1 %vm7217_vm9, %v4601_v50 }
  0xed   : > { %vm1267_vm0 = vmand %vm4539_vm11, %vm1255_vm13  ;;  %vm7220_vm11 = vmmov 0   ;;  %3571 = vmatpush3.msra.mxu1 %v1930_v37  ;;  %v1905_v37 = vld [vmem:[%s7041_s3 + $0x50] sm:$0xff] }
  0xee   : > { %vm4624_vm14 = vmxor %vm4460_vm4, %vm7143_vm10  ;;  %v1447_v13 = vsel %vm1267_vm0, %v4336_v53, 0.0  ;;  %3578 = vmatprep.mubr.msk.f32.mxu1 %vm7220_vm11, %v7087_v5  ;;  %3572 = vmatprep.subr.mxu1 %v7087_v5 }
  0xef   : > { %vm1351_vm8 = vmxor %vm4583_vm2, %vm7143_vm10  ;;  %1591 = vrot.lane.b32.xlu1 %v1447_v13, %s3882_s26 }
  0xf0   : > { %vm4637_vm9 = vmxor %vm4517_vm6, %vm7143_vm10 }
  0xf1   : > { %vm1363_vm4 = vmand %vm4509_vm12, %vm1351_vm8  ;;  %vm7225_vm12 = vnez %v7165_v28 }
  0xf2   : > { %vm4647_vm13 = vmxor %vm4567_vm7, %vm7143_vm10  ;;  %v1495_v16 = vsel %vm1363_vm4, %v4336_v53, 0.0  ;;  %vm7226_vm4 = vcmp.eq.f32.partialorder %v4010_v63, 0.0 }
  0xf3   : > { %vm1279_vm6 = vmxor %vm4615_vm1, %vm7143_vm10  ;;  %1735 = vrot.lane.b32.xlu0 %v1495_v16, %s3882_s26 }
  0xf4   : > { %vm1291_vm0 = vmand %vm4554_vm15, %vm1279_vm6  ;;  %vm7229_vm15 = vnez %v7204_v3 }
  0xf5   : > { %v1459_v18 = vsel %vm1291_vm0, %v4336_v53, 0.0  ;;  %vm1375_vm7 = vmxor %vm7225_vm12, %vm7143_vm10  ;;  %vm7232_vm0 = vnez %v7182_v48  ;;  %v1909_v48 = vld [vmem:[%s7041_s3 + $0x70] sm:$0xff] }
  0xf6   : > { %1639 = vrot.lane.b32.xlu1 %v1459_v18, %s3883_s28  ;;  %vm1387_vm8 = vmand %vm4583_vm2, %vm1375_vm7  ;;  %vm7230_vm2 = vnez %v7167_v34  ;;  %vm7233_vm7 = vcmp.eq.f32.partialorder %v4014_v4, 0.0  ;;  %v1925_v34 = vld [vmem:[%s7041_s3 + $0xf0] sm:$0xff] }
  0xf7   : > { %v1507_v20 = vsel %vm1387_vm8, %v4336_v53, 0.0  ;;  %vm4670_vm11 = vmor %vm4549_vm3, %vm7226_vm4  ;;  %vm7231_vm3 = vnez %v7208_v6  ;;  %vm7237_vm4 = vnez %v7196_v59 }
  0xf8   : > { %1783 = vrot.lane.b32.xlu0 %v1507_v20, %s3883_s28  ;;  %v1426_v28 = vsel %vm4670_vm11, %v4211_v58, 0.0  ;;  %vm1318_vm6 = vmand %vm7230_vm2, %vm7229_vm15  ;;  %vm7234_vm11 = vnez %v7212_v8  ;;  %vm7238_vm2 = vcmp.eq.f32.partialorder %v4025_v21, 0.0 }
  0xf9   : > { %v1474_v63 = vsel %vm1318_vm6, %v4211_v58, 0.0  ;;  %vm1317_vm12 = vmand %vm7232_vm0, %vm7231_vm3 }
  0xfa   : > { %v1473_v25 = vsel %vm1317_vm12, %v4208_v57, 0.0  ;;  %vm4698_vm8 = vmor %vm7234_vm11, %vm7233_vm7  ;;  %298 = vrot.lane.b32.xlu1 %v4675_v19, %s3878_s15 }
  0xfb   : > { %v1425_v58 = vsel %vm4698_vm8, %v4208_v57, 0.0  ;;  %vm1316_vm15 = vmand %vm7237_vm4, %vm4608_vm5 }
  0xfc   : > { %v1472_v4 = vsel %vm1316_vm15, %v4269_v10, 0.0  ;;  %296 = vrot.lane.b32.xlu0 %v4691_v24, %s3878_s15  ;;  %vm4718_vm6 = vmor %vm4624_vm14, %vm7238_vm2  ;;  %vm7241_vm14 = vcmp.eq.f32.partialorder %v4050_v40, 0.0  ;;  %v4760_v40 = vld [vmem:[%s3975_s13 + $0x28] sm:$0xff] }
  0xfd   : > { %v1424_v57 = vsel %vm4718_vm6, %v4269_v10, 0.0  ;;  %vm1315_vm5 = vmand %vm4615_vm1, %vm4637_vm9  ;;  %vm7064_vm1 = vcmask 523264   ;;  %vm7063_vm9 = vcmask 785408   ;;  %vm7253_vm6 = vcmask 7168  }
  0xfe   : > { %343 = vrot.lane.b32.xlu1 %v4675_v19, %s3877_s14  ;;  %v4732_v21 = vsel %vm1315_vm5, %v4336_v53, 0.0  ;;  %vm4738_vm3 = vmor %vm4647_vm13, %vm7241_vm14  ;;  %vm7244_vm13 = vcmask 261120   ;;  %vm7254_vm5 = vcmask 252928  }
  0xff   : > { %v1423_v10 = vsel %vm4738_vm3, %v4336_v53, 0.0  ;;  %vm7245_vm0 = vmmov %vm7244_vm13 }
 0x100   : > { %341 = vrot.lane.b32.xlu0 %v4691_v24, %s3877_s14  ;;  %vm7246_vm12 = vmmov %vm7245_vm0 }
 0x101   : > { %vm7247_vm7 = vmmov %vm7245_vm0 }
 0x102   : > { %339 = vrot.lane.b32.xlu1 %v4746_v27, %s3877_s14  ;;  %vm7248_vm11 = vmmov %vm7245_vm0 }
 0x103   : > { %vm7249_vm8 = vmmov %vm7245_vm0 }
 0x104   : > { %294 = vrot.lane.b32.xlu0 %v4746_v27, %s3878_s15  ;;  %vm7250_vm4 = vmmov %vm7245_vm0 }
 0x105   : > { %vm7251_vm15 = vmmov %vm7245_vm0 }
 0x106   : > { %337 = vrot.lane.b32.xlu1 %v4753_v39, %s3877_s14  ;;  %vm7252_vm2 = vmmov %vm7245_vm0 }
 0x107   : > { %vm7255_vm14 = vmmov %vm7253_vm6 }
 0x108   : > { %292 = vrot.lane.b32.xlu0 %v4753_v39, %s3878_s15  ;;  %vm7256_vm3 = vmmov %vm7254_vm5 }
 0x10a   : > { %335 = vrot.lane.b32.xlu1 %v4760_v40, %s3877_s14 }
 0x10c   : > { %290 = vrot.lane.b32.xlu0 %v4760_v40, %s3878_s15 }
 0x130   : > { %v1550_v56 = vpop.permute.xlu1 %1549 }
 0x131   : > { %v1823_v49 = vsel %vm7245_vm0, %v1426_v28, %v1550_v56  ;;  %vm7258_vm0 = vmmov %vm7256_vm3 }
 0x132   : > { %v1694_v33 = vpop.permute.xlu0 %1693 }
 0x133   : > { %v1861_v38 = vsel %vm7244_vm13, %v1474_v63, %v1694_v33  ;;  %v425_v33 = vmul.f32 2.0, %v4691_v24  ;;  %vm7257_vm13 = vmmov %vm7253_vm6 }
 0x134   : > { %v1598_v35 = vpop.permute.xlu1 %1597 }
 0x135   : > { %v1836_v52 = vsel %vm7064_vm1, %v1823_v49, %v1598_v35  ;;  %v1922_v49 = vld [vmem:[%s7041_s3 + $0xd8] sm:$0xff] }
 0x136   : > { %v1742_v36 = vpop.permute.xlu0 %1741 }
 0x137   : > { %v1873_v47 = vsel %vm7064_vm1, %v1861_v38, %v1742_v36  ;;  %v1923_v36 = vld [vmem:[%s7041_s3 + $0xe0] sm:$0xff] }
 0x13a   : > { %v1790_v41 = vpop.permute.xlu1 %1789 }
 0x13b   : > { %v1885_v42 = vsel %vm7063_vm9, %v1873_v47, %v1790_v41 }
 0x13c   : > { %v1692_v7 = vpop.permute.xlu0 %1691  ;;  %1964 = vmatprep.subr.mxu0 %v1885_v42  ;;  %v1907_v42 = vld [vmem:[%s7041_s3 + $0x60] sm:$0xff] }
 0x13d   : > { %v1860_v43 = vsel %vm7246_vm12, %v1473_v25, %v1692_v7  ;;  %vm7259_vm12 = vcmask 1045504  }
 0x140   : > { %v1646_v44 = vpop.permute.xlu1 %1645 }
 0x141   : > { %v1849_v22 = vsel %vm7063_vm9, %v1836_v52, %v1646_v44  ;;  %v424_v52 = vmul.f32 2.0, %v4746_v27 }
 0x142   : > { %1965 = vmatpush1.msra.mxu0 %v1849_v22  ;;  %v1548_v54 = vpop.permute.xlu0 %1547 }
 0x143   : > { %v1822_v0 = vsel %vm7247_vm7, %v1425_v58, %v1548_v54  ;;  %v1926_v58 = vld [vmem:[%s7041_s3 + $0xf8] sm:$0xff]  ;;  %vm7260_vm7 = vcmask 1046528  }
 0x144   : > { %v1596_v55 = vpop.permute.xlu1 %1595 }
 0x145   : > { %v1835_v32 = vsel %vm7064_vm1, %v1822_v0, %v1596_v55 }
 0x146   : > { %v1740_v31 = vpop.permute.xlu0 %1739 }
 0x147   : > { %v1872_v11 = vsel %vm7064_vm1, %v1860_v43, %v1740_v31  ;;  %v1906_v31 = vld [vmem:[%s7041_s3 + $0x58] sm:$0xff] }
 0x148   : > { %v1788_v59 = vpop.permute.xlu1 %1787 }
 0x149   : > { %v1884_v60 = vsel %vm7063_vm9, %v1872_v11, %v1788_v59  ;;  %v1921_v59 = vld [vmem:[%s7041_s3 + $0xd0] sm:$0xff] }
 0x14a   : > { %1966 = vmatprep.subr.mxu0 %v1884_v60  ;;  %v1690_v61 = vpop.permute.xlu0 %1689 }
 0x14b   : > { %v1859_v3 = vsel %vm7248_vm11, %v1472_v4, %v1690_v61  ;;  %v1910_v4 = vld [vmem:[%s7041_s3 + $0x78] sm:$0xff]  ;;  %vm7261_vm11 = vmmov %vm7259_vm12 }
 0x14c   : > { %v1644_v46 = vpop.permute.xlu1 %1643 }
 0x14d   : > { %v1848_v15 = vsel %vm7063_vm9, %v1835_v32, %v1644_v46 }
 0x14e   : > { %1967 = vmatpush1.msra.mxu0 %v1848_v15  ;;  %v1546_v62 = vpop.permute.xlu0 %1545 }
 0x14f   : > { %v1821_v9 = vsel %vm7249_vm8, %v1424_v57, %v1546_v62  ;;  %v426_v57 = vmul.f32 2.0, %v4675_v19  ;;  %v1908_v19 = vld [vmem:[%s7041_s3 + $0x68] sm:$0xff]  ;;  %vm7262_vm8 = vmmov %vm7253_vm6 }
 0x150   : > { %v1594_v1 = vpop.permute.xlu1 %1593 }
 0x151   : > { %v1834_v17 = vsel %vm7064_vm1, %v1821_v9, %v1594_v1  ;;  %v1920_v1 = vld [vmem:[%s7041_s3 + $0xc8] sm:$0xff] }
 0x152   : > { %v1738_v2 = vpop.permute.xlu0 %1737 }
 0x153   : > { %v1871_v23 = vsel %vm7064_vm1, %v1859_v3, %v1738_v2 }
 0x154   : > { %v1786_v6 = vpop.permute.xlu1 %1785 }
 0x155   : > { %v1883_v29 = vsel %vm7063_vm9, %v1871_v23, %v1786_v6 }
 0x156   : > { %1968 = vmatprep.subr.mxu0 %v1883_v29  ;;  %v1688_v8 = vpop.permute.xlu0 %1687  ;;  %v1904_v29 = vld [vmem:[%s7041_s3 + $0x48] sm:$0xff] }
 0x157   : > { %v1858_v20 = vsel %vm7251_vm15, %v4732_v21, %v1688_v8  ;;  %v423_v8 = vmul.f32 2.0, %v4753_v39  ;;  %v1903_v39 = vld [vmem:[%s7041_s3 + $0x40] sm:$0xff]  ;;  %vm7264_vm15 = vmmov %vm7260_vm7 }
 0x158   : > { %v1642_v12 = vpop.permute.xlu1 %1641 }
 0x159   : > { %v1847_v51 = vsel %vm7063_vm9, %v1834_v17, %v1642_v12  ;;  %v1919_v12 = vld [vmem:[%s7041_s3 + $0xc0] sm:$0xff] }
 0x15a   : > { %1969 = vmatpush1.msra.mxu0 %v1847_v51 }
 0x15d   : > { %v1544_v13 = vpop.permute.xlu0 %1543 }
 0x15e   : > { %v1820_v16 = vsel %vm7250_vm4, %v1423_v10, %v1544_v13  ;;  %v1924_v10 = vld [vmem:[%s7041_s3 + $0xe8] sm:$0xff]  ;;  %vm7263_vm4 = vmmov %vm7258_vm0 }
 0x161   : > { %v1592_v45 = vpop.permute.xlu1 %1591 }
 0x162   : > { %v1833_v30 = vsel %vm7064_vm1, %v1820_v16, %v1592_v45 }
 0x165   : > { %v1736_v14 = vpop.permute.xlu0 %1735 }
 0x166   : > { %v1870_v28 = vsel %vm7064_vm1, %v1858_v20, %v1736_v14 }
 0x168   : > { %v1640_v18 = vpop.permute.xlu1 %1639 }
 0x169   : > { %v1846_v25 = vsel %vm7063_vm9, %v1833_v30, %v1640_v18 }
 0x16a   : > { %v1784_v63 = vpop.permute.xlu0 %1783 }
 0x16b   : > { %v1882_v26 = vsel %vm7063_vm9, %v1870_v28, %v1784_v63  ;;  %v1918_v63 = vld [vmem:[%s7041_s3 + $0xb8] sm:$0xff] }
 0x16c   : > { %1970 = vmatprep.subr.mxu0 %v1882_v26  ;;  %v299_v53 = vpop.permute.xlu1 %298 }
 0x16d   : > { %1971 = vmatpush1.msra.mxu0 %v1846_v25 }
 0x16e   : > { %3362 = vmatmul.mubr.msk.f32.vlgmr.msra.gmra.mxu0 %vm7252_vm2, %v4601_v50  ;;  %v297_v21 = vpop.permute.xlu0 %296  ;;  %3405 = vmatprep.subr.mxu0 %v1926_v58  ;;  %vm7265_vm2 = vmmov %vm7261_vm11 }
 0x16f   : > { %3406 = vmatpush3.msra.mxu0 %v1910_v4 }
 0x170   : > { %v344_v56 = vpop.permute.xlu1 %343  ;;  %3407 = vmatprep.subr.mxu0 %v1925_v34 }
 0x171   : > { %v380_v50 = vsel %vm7253_vm6, %v299_v53, %v344_v56  ;;  %v396_v35 = vsel %vm7254_vm5, %v299_v53, %v344_v56  ;;  %3408 = vmatpush3.msra.mxu0 %v1909_v48  ;;  %v1902_v53 = vld [vmem:[%s7041_s3 + $0x38] sm:$0xff]  ;;  %vm7266_vm6 = vmmov %vm7265_vm2 }
 0x172   : > { %v411_v38 = vsub.f32 %v380_v50, %v396_v35  ;;  %v441_v47 = vadd.f32 %v426_v57, %v380_v50  ;;  %v342_v41 = vpop.permute.xlu0 %341  ;;  %3409 = vmatprep.subr.mxu0 %v1924_v10 }
 0x173   : > { %v379_v7 = vsel %vm7255_vm14, %v297_v21, %v342_v41  ;;  %v395_v24 = vsel %vm7256_vm3, %v297_v21, %v342_v41  ;;  %3410 = vmatpush3.msra.mxu0 %v1908_v19  ;;  %v1917_v21 = vld [vmem:[%s7041_s3 + $0xb0] sm:$0xff]  ;;  %vm7267_vm14 = vmmov %vm7260_vm7 }
 0x174   : > { %v456_v44 = vadd.f32 %v441_v47, %v396_v35  ;;  %v471_v22 = vmul.f32 2.0, %v411_v38  ;;  %v410_v54 = vsub.f32 %v379_v7, %v395_v24  ;;  %v340_v55 = vpop.permute.xlu1 %339  ;;  %3411 = vmatprep.subr.mxu0 %v1923_v36  ;;  %v576_v43 = vrot.slane %v411_v38, 2  ;;  %v1916_v38 = vld [vmem:[%s7041_s3 + $0xa8] sm:$0xff]  ;;  %vm7268_vm3 = vmmov %vm7265_vm2 }
 0x175   : > { %v440_v11 = vadd.f32 %v425_v33, %v379_v7  ;;  %3412 = vmatpush3.msra.mxu0 %v1907_v42  ;;  %v1901_v33 = vld [vmem:[%s7041_s3 + $0x30] sm:$0xff]  ;;  %v1900_v7 = vld [vmem:[%s7041_s3 + $0x28] sm:$0xff] }
 0x176   : > { %v509_v60 = vrot.slane %v471_v22, 1  ;;  %v470_v61 = vmul.f32 2.0, %v410_v54  ;;  %v574_v0 = vrot.slane %v410_v54, 2  ;;  %v295_v27 = vpop.permute.xlu0 %294  ;;  %3413 = vmatprep.subr.mxu0 %v1922_v49  ;;  %v642_v32 = vrot.slane %v456_v44, 2  ;;  %v1915_v22 = vld [vmem:[%s7041_s3 + $0xa0] sm:$0xff] }
 0x177   : > { %v455_v46 = vadd.f32 %v440_v11, %v395_v24  ;;  %v378_v15 = vsel %vm7257_vm13, %v295_v27, %v340_v55  ;;  %v394_v62 = vsel %vm7258_vm0, %v295_v27, %v340_v55  ;;  %3414 = vmatpush3.msra.mxu0 %v1906_v31  ;;  %vm7269_vm13 = vmmov %vm7265_vm2 }
 0x178   : > { %v507_v2 = vrot.slane %v470_v61, 1  ;;  %v4851_v3 = vsub.f32 %v378_v15, %v394_v62  ;;  %v439_v23 = vadd.f32 %v424_v52, %v378_v15  ;;  %v338_v6 = vpop.permute.xlu1 %337  ;;  %3415 = vmatprep.subr.mxu0 %v1921_v59  ;;  %v577_v9 = vsel %vm7259_vm12, %v574_v0, %v576_v43  ;;  %v1899_v43 = vld [vmem:[%s7041_s3 + $0x20] sm:$0xff]  ;;  %v1914_v59 = vld [vmem:[%s7041_s3 + $0x98] sm:$0xff]  ;;  %vm7270_vm0 = vmmov %vm7262_vm8 }
 0x179   : > { %v640_v17 = vrot.slane %v455_v46, 2  ;;  %3416 = vmatpush3.msra.mxu0 %v1905_v37  ;;  %vm7271_vm12 = vmmov %vm7263_vm4 }
 0x17a   : > { %v510_v51 = vsel %vm7260_vm7, %v507_v2, %v509_v60  ;;  %v4862_v13 = vadd.f32 %v439_v23, %v394_v62  ;;  %v469_v45 = vmul.f32 2.0, %v4851_v3  ;;  %v572_v14 = vrot.slane %v4851_v3, 2  ;;  %v293_v16 = vpop.permute.xlu0 %292  ;;  %3417 = vmatprep.subr.mxu0 %v1920_v1  ;;  %v1913_v1 = vld [vmem:[%s7041_s3 + $0x90] sm:$0xff] }
 0x17b   : > { %v539_v18 = vadd.f32 %v510_v51, %v410_v54  ;;  %v643_v20 = vsel %vm7261_vm11, %v640_v17, %v642_v32  ;;  %v377_v30 = vsel %vm7262_vm8, %v293_v16, %v338_v6  ;;  %v393_v28 = vsel %vm7263_vm4, %v293_v16, %v338_v6  ;;  %3418 = vmatpush3.msra.mxu0 %v1904_v29  ;;  %v1898_v32 = vld [vmem:[%s7041_s3 + $0x18] sm:$0xff]  ;;  %v1897_v29 = vld [vmem:[%s7041_s3 + $0x10] sm:$0xff] }
 0x17c   : > { %v672_v25 = vsub.f32 %v455_v46, %v643_v20  ;;  %v505_v26 = vrot.slane %v469_v45, 1  ;;  %v638_v58 = vrot.slane %v4862_v13, 2  ;;  %3419 = vmatprep.subr.mxu0 %v1919_v12  ;;  %v4881_v34 = vsub.f32 %v377_v30, %v393_v28  ;;  %v336_v27 = vpop.permute.xlu1 %335 }
 0x17d   : > { %v4879_v4 = vadd.f32 %v577_v9, %v539_v18  ;;  %v438_v57 = vadd.f32 %v423_v8, %v377_v30  ;;  %3420 = vmatpush3.msra.mxu0 %v1903_v39  ;;  %v575_v56 = vsel %vm7265_vm2, %v572_v14, %v574_v0  ;;  %v422_v60 = vmul.f32 2.0, %v4760_v40 }
 0x17e   : > { %v696_v48 = vmul.f32 %v672_v25, %v672_v25  ;;  %v508_v10 = vsel %vm7264_vm15, %v505_v26, %v507_v2  ;;  %v641_v19 = vsel %vm7266_vm6, %v638_v58, %v640_v17  ;;  %3421 = vmatprep.subr.mxu0 %v1918_v63  ;;  %v830_v35 = vsub.f32 0.0, %v672_v25  ;;  %v291_v37 = vpop.permute.xlu0 %290  ;;  %vm7276_vm15 = vmmov %vm7265_vm2 }
 0x17f   : > { %v684_v50 = vmul.f32 %v4879_v4, %v4879_v4  ;;  %v538_v36 = vadd.f32 %v508_v10, %v4851_v3  ;;  %3422 = vmatpush3.msra.mxu0 %v1902_v53  ;;  %vm818_vm5 = vcmp.lt.f32.partialorder %v4879_v4, 0.0  ;;  %v4900_v47 = vsub.f32 %v4862_v13, %v641_v19  ;;  %vm7277_vm2 = vmmov %vm7267_vm14 }
 0x180   : > { %v4902_v41 = vadd.f32 %v438_v57, %v393_v28  ;;  %v4905_v42 = vmul.f32 2.0, %v4881_v34  ;;  %3423 = vmatprep.subr.mxu0 %v1917_v21  ;;  %v4913_v49 = vand.u32 2147483647, %v4879_v4  ;;  %v570_v44 = vrot.slane %v4881_v34, 2 }
 0x181   : > { %v4910_v24 = vadd.f32 %v696_v48, %v684_v50  ;;  %v4915_v52 = vadd.f32 %v575_v56, %v538_v36  ;;  %3424 = vmatpush3.msra.mxu0 %v1901_v33  ;;  %v695_v54 = vmul.f32 %v4900_v47, %v4900_v47  ;;  %v842_v11 = vsel %vm818_vm5, %v830_v35, %v672_v25  ;;  %vm7280_vm5 = vmmov %vm7268_vm3 }
 0x182   : > { %v503_v55 = vrot.slane %v4905_v42, 1  ;;  %v636_v31 = vrot.slane %v4902_v41, 2  ;;  %3425 = vmatprep.subr.mxu0 %v1916_v38  ;;  %v573_v15 = vsel %vm7268_vm3, %v570_v44, %v572_v14  ;;  %v878_v62 = vmul.f32 0.9396926, %v4913_v49  ;;  %v5159_v42 = vld [vmem:[%s7039_s1] sm:$0xff] }
 0x183   : > { %3738 = vrsqrt.f32 %v4910_v24  ;;  %3426 = vmatpush3.msra.mxu0 %v1900_v7  ;;  %v683_v61 = vmul.f32 %v4915_v52, %v4915_v52  ;;  %v890_v23 = vmul.f32 0.34202015, %v842_v11  ;;  %v926_v6 = vmul.f32 0.76604444, %v4913_v49 }
 0x184   : > { %v506_v0 = vsel %vm7267_vm14, %v503_v55, %v505_v26  ;;  %3427 = vmatprep.subr.mxu0 %v1915_v22  ;;  %v639_v40 = vsel %vm7269_vm13, %v636_v31, %v638_v58  ;;  %v938_v9 = vmul.f32 0.64278764, %v842_v11  ;;  %v376_v17 = vsel %vm7270_vm0, %v291_v37, %v336_v27 }
 0x185   : > { %v537_v46 = vadd.f32 %v506_v0, %v4881_v34  ;;  %3428 = vmatpush3.msra.mxu0 %v1899_v43  ;;  %v4950_v2 = vadd.f32 %v695_v54, %v683_v61  ;;  %v4953_v3 = vsub.f32 %v4902_v41, %v639_v40  ;;  %v392_v12 = vsel %vm7271_vm12, %v291_v37, %v336_v27 }
 0x186   : > { %3429 = vmatprep.subr.mxu0 %v1914_v59  ;;  %v902_v45 = vsub.f32 %v878_v62, %v890_v23  ;;  %v950_v14 = vsub.f32 %v926_v6, %v938_v9  ;;  %v407_v16 = vsub.f32 %v376_v17, %v392_v12  ;;  %v829_v39 = vsub.f32 0.0, %v4900_v47 }
 0x187   : > { %v4959_v8 = vadd.f32 %v573_v15, %v537_v46  ;;  %3430 = vmatpush3.msra.mxu0 %v1898_v32  ;;  %3740 = vrsqrt.f32 %v4950_v2  ;;  %v694_v13 = vmul.f32 %v4953_v3, %v4953_v3  ;;  %v437_v20 = vadd.f32 %v422_v60, %v376_v17 }
 0x188   : > { %3431 = vmatprep.subr.mxu0 %v1913_v1  ;;  %vm764_vm7 = vcmp.eq.f32.partialorder %v4910_v24, inf  ;;  %v467_v30 = vmul.f32 2.0, %v407_v16  ;;  %v569_v28 = vrot.slane %v407_v16, 2  ;;  %v974_v63 = vmul.f32 0.5, %v4913_v49 }
 0x189   : > { %v682_v51 = vmul.f32 %v4959_v8, %v4959_v8  ;;  %3432 = vmatpush3.msra.mxu0 %v1897_v29  ;;  %vm766_vm11 = vcmp.eq.f32.partialorder %v4910_v24, 0.0  ;;  %v767_v25 = vand.u32 2147483648, %v4910_v24  ;;  %vm4975_vm8 = vcmp.ge.f32.partialorder %v902_v45, 0.0 }
 0x18a   : > { %vm4979_vm4 = vcmp.ge.f32.partialorder %v950_v14, 0.0  ;;  %v452_v53 = vadd.f32 %v437_v20, %v392_v12  ;;  %v502_v34 = vrot.slane %v467_v30, 1  ;;  %v986_v57 = vmul.f32 0.8660254, %v842_v11 }
 0x18b   : > { %v4969_v18 = vadd.f32 %v694_v13, %v682_v51  ;;  %v571_v21 = vsel %vm7276_vm15, %v569_v28, %v570_v44  ;;  %v1142_v48 = vmul.f32 -0.76604444, %v4913_v49  ;;  %v1178_v10 = vmul.f32 -0.9396926, %v4913_v49  ;;  %vm4995_vm6 = vmxor %vm4979_vm4, %vm7143_vm10 }
 0x18c   : > { %v4987_v56 = vmul.f32 0.9848077, %v842_v11  ;;  %v504_v33 = vsel %vm7277_vm2, %v502_v34, %v503_v55  ;;  %v635_v50 = vrot.slane %v452_v53, 2  ;;  %v998_v35 = vsub.f32 %v974_v63, %v986_v57  ;;  %vm1250_vm0 = vmand %vm4975_vm8, %vm4995_vm6 }
 0x18d   : > { %3742 = vrsqrt.f32 %v4969_v18  ;;  %v1070_v36 = vmul.f32 -0.17364818, %v4913_v49  ;;  %v536_v7 = vadd.f32 %v504_v33, %v407_v16  ;;  %v1154_v44 = vsub.f32 %v1142_v48, %v938_v9 }
 0x18e   : > { %v1190_v22 = vsub.f32 %v1178_v10, %v890_v23  ;;  %v637_v54 = vsel %vm7280_vm5, %v635_v50, %v636_v31  ;;  %vm5002_vm14 = vcmp.ge.f32.partialorder %v998_v35, 0.0  ;;  %v1106_v11 = vmul.f32 -0.5, %v4913_v49 }
 0x18f   : > { %v1082_v43 = vsub.f32 %v1070_v36, %v4987_v56  ;;  %vm817_vm3 = vcmp.lt.f32.partialorder %v4915_v52, 0.0  ;;  %v5012_v60 = vadd.f32 %v571_v21, %v536_v7  ;;  %v5014_v61 = vsub.f32 %v452_v53, %v637_v54  ;;  %vm5019_vm13 = vmxor %vm5002_vm14, %vm7143_vm10 }
 0x190   : > { %v3739_v19 = vpop.eup %3738  ;;  %vm5029_vm12 = vcmp.ge.f32.partialorder %v1154_v44, 0.0  ;;  %v7287_v27 = vmov 0  ;;  %v1118_v37 = vsub.f32 %v1106_v11, %v986_v57  ;;  %v5046_v15 = vand.u32 2147483647, %v4915_v52  ;;  %vm1274_vm2 = vmand %vm4979_vm4, %vm5019_vm13 }
 0x191   : > { %v763_v38 = vmul.f32 %v3739_v19, %v4910_v24  ;;  %vm5055_vm15 = vcmp.ge.f32.partialorder %v1082_v43, 0.0  ;;  %v681_v23 = vmul.f32 %v5012_v60, %v5012_v60  ;;  %v693_v6 = vmul.f32 %v5014_v61, %v5014_v61 }
 0x192   : > { %vm5068_vm5 = vcmp.ge.f32.partialorder %v1118_v37, 0.0  ;;  %vm757_vm9 = vcmp.eq.f32.partialorder %v4950_v2, inf  ;;  %v841_v9 = vsel %vm817_vm3, %v829_v39, %v4900_v47  ;;  %vm759_vm13 = vcmp.eq.f32.partialorder %v4950_v2, 0.0 }
 0x193   : > { %v765_v59 = vsel %vm764_vm7, %v4910_v24, %v763_v38  ;;  %vm5033_vm7 = vcmp.ge.f32.partialorder %v1190_v22, 0.0  ;;  %v5040_v24 = vld [vmem:[%s7039_s1 + $0x8] sm:$0xff]  ;;  %v760_v12 = vand.u32 2147483648, %v4950_v2  ;;  %vm816_vm1 = vcmp.lt.f32.partialorder %v4959_v8, 0.0  ;;  %vm1334_vm3 = vmxor %vm5068_vm5, %vm7143_vm10 }
 0x194   : > { %v768_v31 = vsel %vm766_vm11, %v767_v25, %v765_v59  ;;  %v7288_v27 = vsel %vm5033_vm7, 4294967295, %v7287_v27  ;;  %v3741_v32 = vpop.eup %3740  ;;  %vm5051_vm11 = vmxor %vm5033_vm7, %vm7143_vm10  ;;  %v1022_v47 = vmul.f32 0.17364818, %v4913_v49  ;;  %v828_v51 = vsub.f32 0.0, %v4953_v3 }
 0x195   : > { %v5043_v46 = vmul.f32 %v5040_v24, %v768_v31  ;;  %v756_v1 = vmul.f32 %v3741_v32, %v4950_v2  ;;  %vm1394_vm4 = vmand %vm5029_vm12, %vm5051_vm11  ;;  %v5096_v13 = vand.u32 2147483647, %v4959_v8  ;;  %v925_v14 = vmul.f32 0.76604444, %v5046_v15 }
 0x196   : > { %vm1346_vm6 = vmand %vm5055_vm15, %vm1334_vm3  ;;  %v5103_v39 = vadd.f32 %v693_v6, %v681_v23  ;;  %v1046_v49 = vsub.f32 %v1022_v47, %v4987_v56  ;;  %v937_v63 = vmul.f32 0.64278764, %v841_v9  ;;  %v973_v25 = vmul.f32 0.5, %v5046_v15 }
 0x197   : > { %v1442_v17 = vsel %vm1250_vm0, %v5043_v46, 0.0  ;;  %v1454_v45 = vsel %vm1274_vm2, %v5043_v46, 0.0  ;;  %v758_v16 = vsel %vm757_vm9, %v4950_v2, %v756_v1  ;;  %v1490_v20 = vsel %vm1346_vm6, %v5043_v46, 0.0  ;;  %vm1358_vm0 = vmxor %vm5029_vm12, %vm7143_vm10 }
 0x198   : > { %1557 = vrot.lane.b32.xlu1 %v1442_v17, %s3881_s20  ;;  %v1514_v28 = vsel %vm1394_vm4, %v5043_v46, 0.0  ;;  %1701 = vrot.lane.b32.xlu0 %v1490_v20, %s3881_s20  ;;  %vm1370_vm9 = vmand %vm5068_vm5, %vm1358_vm0  ;;  %v985_v58 = vmul.f32 0.8660254, %v841_v9  ;;  %vm5121_vm2 = vcmp.ge.f32.partialorder %v1046_v49, 0.0  ;;  %v7295_v53 = vmov 0 }
 0x199   : > { %v7296_v53 = vsel %vm5121_vm2, 4294967295, %v7295_v53  ;;  %v1502_v34 = vsel %vm1370_vm9, %v5043_v46, 0.0  ;;  %v1033_v57 = vmul.f32 0.9848077, %v841_v9  ;;  %v1069_v21 = vmul.f32 -0.17364818, %v5046_v15  ;;  %vm5132_vm12 = vmxor %vm5121_vm2, %vm7143_vm10 }
 0x19a   : > { %v3743_v30 = vpop.eup %3742  ;;  %v761_v48 = vsel %vm759_vm13, %v760_v12, %v758_v16  ;;  %v949_v56 = vsub.f32 %v925_v14, %v937_v63  ;;  %v997_v19 = vsub.f32 %v973_v25, %v985_v58  ;;  %v1105_v33 = vmul.f32 -0.5, %v5046_v15  ;;  %vm1298_vm11 = vmand %vm5002_vm14, %vm5132_vm12 }
 0x19b   : > { %v840_v50 = vsel %vm816_vm1, %v828_v51, %v4953_v3  ;;  %v1081_v2 = vsub.f32 %v1069_v21, %v1033_v57  ;;  %v889_v35 = vmul.f32 0.34202015, %v841_v9  ;;  %v1141_v36 = vmul.f32 -0.76604444, %v5046_v15 }
 0x19c   : > { %1605 = vrot.lane.b32.xlu1 %v1454_v45, %s3882_s26  ;;  %3744 = vrsqrt.f32 %v5103_v39  ;;  %1749 = vrot.lane.b32.xlu0 %v1502_v34, %s3882_s26  ;;  %vm5148_vm4 = vcmp.ge.f32.partialorder %v949_v56, 0.0  ;;  %vm5152_vm1 = vcmp.ge.f32.partialorder %v997_v19, 0.0  ;;  %v5162_v7 = vmul.f32 %v5159_v42, %v761_v48 }
 0x19d   : > { %vm5168_vm13 = vmxor %vm5152_vm1, %vm7143_vm10  ;;  %v1117_v22 = vsub.f32 %v1105_v33, %v985_v58  ;;  %v1153_v54 = vsub.f32 %v1141_v36, %v937_v63  ;;  %v1177_v43 = vmul.f32 -0.9396926, %v5046_v15  ;;  %v1466_v11 = vsel %vm1298_vm11, %v5043_v46, 0.0 }
 0x19e   : > { %vm5179_vm3 = vcmp.ge.f32.partialorder %v1081_v2, 0.0  ;;  %v877_v41 = vmul.f32 0.9396926, %v5046_v15  ;;  %v1021_v31 = vmul.f32 0.17364818, %v5046_v15  ;;  %v749_v0 = vmul.f32 %v3743_v30, %v4969_v18  ;;  %vm1273_vm6 = vmand %vm5148_vm4, %vm5168_vm13  ;;  %v5342_v15 = vld [vmem:[%s7041_s3 + $0x110] sm:$0xff] }
 0x19f   : > { %vm5190_vm0 = vcmp.ge.f32.partialorder %v1117_v22, 0.0  ;;  %v1189_v37 = vsub.f32 %v1177_v43, %v889_v35  ;;  %v924_v32 = vmul.f32 0.76604444, %v5096_v13  ;;  %vm5198_vm9 = vcmp.ge.f32.partialorder %v1153_v54, 0.0  ;;  %3573 = vmatpush3.msra.mxu1 %v5342_v15  ;;  %v5433_v2 = vld [vmem:[%s7042_s4 + $0x18] sm:$0xff] }
 0x1a0   : > { %1797 = vrot.lane.b32.xlu1 %v1514_v28, %s3883_s28  ;;  %vm1333_vm14 = vmxor %vm5190_vm0, %vm7143_vm10  ;;  %v901_v40 = vsub.f32 %v877_v41, %v889_v35  ;;  %v1045_v1 = vsub.f32 %v1021_v31, %v1033_v57  ;;  %v972_v23 = vmul.f32 0.5, %v5096_v13  ;;  %v7311_v6 = vmov 0  ;;  %3574 = vmatprep.subr.mxu1 %v7087_v5 }
 0x1a1   : > { %vm1345_vm12 = vmand %vm5179_vm3, %vm1333_vm14  ;;  %vm5206_vm11 = vcmp.ge.f32.partialorder %v1189_v37, 0.0  ;;  %v5210_v29 = vmul.f32 0.64278764, %v840_v50  ;;  %v984_v9 = vmul.f32 0.8660254, %v840_v50  ;;  %v1453_v17 = vsel %vm1273_vm6, %v5162_v7, 0.0 }
 0x1a2   : > { %v7312_v6 = vsel %vm5206_vm11, 4294967295, %v7311_v6  ;;  %v1489_v12 = vsel %vm1345_vm12, %v5162_v7, 0.0  ;;  %vm5218_vm5 = vmxor %vm5206_vm11, %vm7143_vm10  ;;  %vm7315_vm14 = vcmp.eq.f32.partialorder %v4969_v18, inf  ;;  %v753_v45 = vand.u32 2147483648, %v4969_v18 }
 0x1a3   : > { %v751_v51 = vsel %vm7315_vm14, %v4969_v18, %v749_v0  ;;  %1699 = vrot.lane.b32.xlu0 %v1489_v12, %s3881_s20  ;;  %vm1393_vm6 = vmand %vm5198_vm9, %vm5218_vm5  ;;  %vm5231_vm12 = vcmp.ge.f32.partialorder %v901_v40, 0.0  ;;  %v1104_v16 = vmul.f32 -0.5, %v5096_v13  ;;  %vm5236_vm13 = vcmp.ge.f32.partialorder %v1045_v1, 0.0  ;;  %v1912_v0 = vld [vmem:[%s7041_s3 + $0x88] sm:$0xff]  ;;  %v1911_v40 = vld [vmem:[%s7041_s3 + $0x80] sm:$0xff] }
 0x1a4   : > { %1653 = vrot.lane.b32.xlu1 %v1466_v11, %s3883_s28  ;;  %v7318_v20 = vmov 0  ;;  %v996_v49 = vsub.f32 %v972_v23, %v984_v9  ;;  %v5240_v30 = vmul.f32 0.9848077, %v840_v50  ;;  %v1068_v28 = vmul.f32 -0.17364818, %v5096_v13  ;;  %vm1237_vm5 = vmxor %vm5148_vm4, %vm7143_vm10  ;;  %3433 = vmatprep.subr.mxu0 %v1912_v0  ;;  %v5503_v23 = vld [vmem:[%s7042_s4] sm:$0xff] }
 0x1a5   : > { %v7319_v20 = vsel %vm5236_vm13, 4294967295, %v7318_v20  ;;  %v948_v63 = vsub.f32 %v924_v32, %v5210_v29  ;;  %v5248_v25 = vmul.f32 0.34202015, %v840_v50  ;;  %v1176_v58 = vmul.f32 -0.9396926, %v5096_v13  ;;  %vm1249_vm14 = vmand %vm5231_vm12, %vm1237_vm5 }
 0x1a6   : > { %v1513_v34 = vsel %vm1393_vm6, %v5162_v7, 0.0  ;;  %v1140_v57 = vmul.f32 -0.76604444, %v5096_v13  ;;  %vm7320_vm11 = vcmp.eq.f32.partialorder %v4969_v18, 0.0  ;;  %v1441_v48 = vsel %vm1249_vm14, %v5162_v7, 0.0  ;;  %vm5261_vm4 = vmxor %vm5236_vm13, %vm7143_vm10 }
 0x1a7   : > { %v754_v21 = vsel %vm7320_vm11, %v753_v45, %v751_v51  ;;  %v1116_v56 = vsub.f32 %v1104_v16, %v984_v9  ;;  %v827_v19 = vsub.f32 0.0, %v5014_v61  ;;  %1555 = vrot.lane.b32.xlu0 %v1441_v48, %s3881_s20  ;;  %vm1297_vm11 = vmand %vm5152_vm1, %vm5261_vm4  ;;  %vm5272_vm5 = vcmp.ge.f32.partialorder %v996_v49, 0.0  ;;  %v1895_v9 = vld [vmem:[%s7041_s3] sm:$0xff] }
 0x1a8   : > { %1603 = vrot.lane.b32.xlu1 %v1453_v17, %s3882_s26  ;;  %v1080_v33 = vsub.f32 %v1068_v28, %v5240_v30  ;;  %vm1357_vm14 = vmxor %vm5198_vm9, %vm7143_vm10  ;;  %vm5281_vm6 = vcmp.ge.f32.partialorder %v948_v63, 0.0  ;;  %v1188_v35 = vsub.f32 %v1176_v58, %v5248_v25  ;;  %v876_v36 = vmul.f32 0.9396926, %v5096_v13  ;;  %v5366_v17 = vld [vmem:[%s7041_s3 + $0x108] sm:$0xff]  ;;  %v5392_v63 = vld [vmem:[%s7041_s3 + $0x100] sm:$0xff] }
 0x1a9   : > { %v3745_v50 = vpop.eup %3744  ;;  %v1020_v38 = vmul.f32 0.17364818, %v5096_v13  ;;  %v5289_v3 = vmul.f32 %v5040_v24, %v754_v21  ;;  %v1465_v44 = vsel %vm1297_vm11, %v5162_v7, 0.0  ;;  %vm1369_vm1 = vmand %vm5190_vm0, %vm1357_vm14  ;;  %v1152_v22 = vsub.f32 %v1140_v57, %v5210_v29  ;;  %3575 = vmatpush3.msra.mxu1 %v5366_v17 }
 0x1aa   : > { %v5296_v54 = vand.u32 2147483647, %v5012_v60  ;;  %v1501_v43 = vsel %vm1369_vm1, %v5162_v7, 0.0  ;;  %vm5302_vm9 = vmxor %vm5272_vm5, %vm7143_vm10  ;;  %vm5306_vm4 = vcmp.ge.f32.partialorder %v1116_v56, 0.0  ;;  %v742_v11 = vmul.f32 %v3745_v50, %v5103_v39  ;;  %3576 = vmatprep.subr.mxu1 %v7087_v5  ;;  %v5416_v56 = vld [vmem:[%s7042_s4 + $0x20] sm:$0xf] }
 0x1ab   : > { %vm7331_vm0 = vcmp.lt.f32.partialorder %v5012_v60, 0.0  ;;  %1747 = vrot.lane.b32.xlu0 %v1501_v43, %s3882_s26  ;;  %vm1272_vm11 = vmand %vm5281_vm6, %vm5302_vm9  ;;  %vm5321_vm14 = vcmp.ge.f32.partialorder %v1080_v33, 0.0  ;;  %v7332_v31 = vmov 0  ;;  %v7334_v55 = vmov 0  ;;  %3577 = vmatpush3.msra.mxu1 %v5392_v63  ;;  %v5453_v43 = vld [vmem:[%s7042_s4 + $0x10] sm:$0xff] }
 0x1ac   : > { %1795 = vrot.lane.b32.xlu1 %v1513_v34, %s3883_s28  ;;  %v5314_v41 = vsel %vm7331_vm0, %v827_v19, %v5014_v61  ;;  %v7333_v31 = vsel %vm5321_vm14, 4294967295, %v7332_v31  ;;  %v1896_v61 = vld [vmem:[%s7041_s3 + $0x8] sm:$0xff]  ;;  %vm5333_vm0 = vcmp.ge.f32.partialorder %v1188_v35, 0.0  ;;  %v900_v37 = vsub.f32 %v876_v36, %v5248_v25  ;;  %vm5351_vm9 = vmxor %vm5306_vm4, %vm7143_vm10  ;;  %v2077_v45 = vpop.f32.mrf.mxu1  ;;  %3581 = vmatprep.subr.mxu1 %v7087_v5 }
 0x1ad   : > { %v7335_v55 = vsel %vm5333_vm0, 4294967295, %v7334_v55  ;;  %v1044_v32 = vsub.f32 %v1020_v38, %v5240_v30  ;;  %v1452_v1 = vsel %vm1272_vm11, %v5289_v3, 0.0  ;;  %vm5355_vm1 = vcmp.ge.f32.partialorder %v1152_v22, 0.0  ;;  %3434 = vmatpush3.msra.mxu0 %v1896_v61  ;;  %vm1344_vm7 = vmand %vm5321_vm14, %vm5351_vm9  ;;  %v5480_v61 = vld [vmem:[%s7042_s4 + $0x8] sm:$0xff] }
 0x1ae   : > { %v746_v12 = vand.u32 2147483648, %v5103_v39  ;;  %v983_v47 = vmul.f32 0.8660254, %v5314_v41  ;;  %v1103_v51 = vmul.f32 -0.5, %v5296_v54  ;;  %3435 = vmatprep.subr.mxu0 %v1911_v40  ;;  %vm7340_vm13 = vcmp.eq.f32.partialorder %v5103_v39, inf  ;;  %vm1380_vm11 = vmxor %vm5333_vm0, %vm7143_vm10  ;;  %v3569_v21 = vpop.f32.mrf.mxu1 }
 0x1af   : > { %v744_v16 = vsel %vm7340_vm13, %v5103_v39, %v742_v11  ;;  %v1488_v49 = vsel %vm1344_vm7, %v5289_v3, 0.0  ;;  %v5385_v30 = vmul.f32 0.9848077, %v5314_v41  ;;  %v1067_v28 = vmul.f32 -0.17364818, %v5296_v54  ;;  %3436 = vmatpush3.msra.mxu0 %v1895_v9  ;;  %vm1392_vm7 = vmand %vm5355_vm1, %vm1380_vm11 }
 0x1b0   : > { %1651 = vrot.lane.b32.xlu1 %v1465_v44, %s3883_s28  ;;  %1697 = vrot.lane.b32.xlu0 %v1488_v49, %s3881_s20  ;;  %vm5398_vm13 = vcmp.ge.f32.partialorder %v900_v37, 0.0  ;;  %vm5402_vm9 = vcmp.ge.f32.partialorder %v1044_v32, 0.0  ;;  %v7343_v58 = vmov 0  ;;  %v923_v34 = vmul.f32 0.76604444, %v5296_v54  ;;  %vm1236_vm0 = vmxor %vm5281_vm6, %vm7143_vm10 }
 0x1b1   : > { %v7344_v58 = vsel %vm5402_vm9, 4294967295, %v7343_v58  ;;  %v971_v57 = vmul.f32 0.5, %v5296_v54  ;;  %v1512_v48 = vsel %vm1392_vm7, %v5289_v3, 0.0  ;;  %v5410_v10 = vmul.f32 0.64278764, %v5314_v41  ;;  %3594 = vmatprep.subr.mxu0 %v7087_v5  ;;  %vm1248_vm2 = vmand %vm5398_vm13, %vm1236_vm0 }
 0x1b2   : > { %vm7072_vm11 = vcmask 1043456   ;;  %v1115_v19 = vsub.f32 %v1103_v51, %v983_v47  ;;  %vm7345_vm7 = vcmp.eq.f32.partialorder %v5103_v39, 0.0  ;;  %v1079_v50 = vsub.f32 %v1067_v28, %v5385_v30  ;;  %vm1284_vm6 = vmxor %vm5402_vm9, %vm7143_vm10 }
 0x1b3   : > { %v747_v33 = vsel %vm7345_vm7, %v746_v12, %v744_v16  ;;  %vm7346_vm14 = vcmask 261120   ;;  %v1440_v35 = vsel %vm1248_vm2, %v5289_v3, 0.0  ;;  %v995_v39 = vsub.f32 %v971_v57, %v983_v47  ;;  %vm1356_vm2 = vmxor %vm5355_vm1, %vm7143_vm10 }
 0x1b4   : > { %1601 = vrot.lane.b32.xlu1 %v1452_v1, %s3882_s26  ;;  %3579 = vmatmul.mubr.msk.f32.vlgmr.msra.gmra.mxu1 %vm7346_vm14, %v2077_v45  ;;  %v875_v36 = vmul.f32 0.9396926, %v5296_v54  ;;  %v887_v38 = vmul.f32 0.34202015, %v5314_v41  ;;  %vm1296_vm14 = vmand %vm5272_vm5, %vm1284_vm6  ;;  %v947_v44 = vsub.f32 %v923_v34, %v5410_v10  ;;  %v1019_v22 = vmul.f32 0.17364818, %v5296_v54 }
 0x1b5   : > { %3582 = vmatpush3.msk.msra.mxu1 %vm7072_vm11, %v5416_v56  ;;  %1553 = vrot.lane.b32.xlu0 %v1440_v35, %s3881_s20  ;;  %v1464_v13 = vsel %vm1296_vm14, %v5289_v3, 0.0  ;;  %vm5459_vm0 = vcmp.ge.f32.partialorder %v1115_v19, 0.0  ;;  %vm7349_vm5 = vmmov 0   ;;  %v5467_v11 = vmul.f32 %v5159_v42, %v747_v33  ;;  %vm1368_vm7 = vmand %vm5306_vm4, %vm1356_vm2 }
 0x1b6   : > { %3583 = vmatprep.subr.mxu1 %v7087_v5  ;;  %3591 = vmatprep.mubr.msk.f32.mxu1 %vm7349_vm5, %v7087_v5  ;;  %vm5471_vm6 = vcmp.ge.f32.partialorder %v1079_v50, 0.0  ;;  %v1139_v0 = vmul.f32 -0.76604444, %v5296_v54  ;;  %v1500_v42 = vsel %vm1368_vm7, %v5289_v3, 0.0  ;;  %vm5484_vm1 = vcmp.ge.f32.partialorder %v995_v39, 0.0  ;;  %vm1331_vm4 = vmxor %vm5459_vm0, %vm7143_vm10 }
 0x1b7   : > { %3584 = vmatpush3.msra.mxu1 %v5433_v2  ;;  %v899_v37 = vsub.f32 %v875_v36, %v887_v38  ;;  %vm5493_vm14 = vcmp.ge.f32.partialorder %v947_v44, 0.0  ;;  %v1043_v40 = vsub.f32 %v1019_v22, %v5385_v30  ;;  %v1175_v1 = vmul.f32 -0.9396926, %v5296_v54  ;;  %vm1343_vm2 = vmand %vm5471_vm6, %vm1331_vm4 }
 0x1b8   : > { %1793 = vrot.lane.b32.xlu1 %v1512_v48, %s3883_s28  ;;  %3585 = vmatprep.subr.mxu1 %v7087_v5  ;;  %vm5511_vm7 = vmxor %vm4975_vm8, %vm7143_vm10  ;;  %v1487_v54 = vsel %vm1343_vm2, %v5467_v11, 0.0  ;;  %v1151_v9 = vsub.f32 %v1139_v0, %v5410_v10  ;;  %v7362_v47 = vmov 0  ;;  %v7366_v16 = vmov 0 }
 0x1b9   : > { %3586 = vmatpush3.msra.mxu1 %v5453_v43  ;;  %1745 = vrot.lane.b32.xlu0 %v1500_v42, %s3882_s26  ;;  %vm1259_vm11 = vmxor %vm5484_vm1, %vm7143_vm10  ;;  %vm5530_vm5 = vcmp.ge.f32.partialorder %v899_v37, 0.0  ;;  %v1187_v45 = vsub.f32 %v1175_v1, %v887_v38  ;;  %v7375_v30 = vmov 0  ;;  %v7377_v28 = vmov 0 }
 0x1ba   : > { %3587 = vmatprep.subr.mxu1 %v7087_v5  ;;  %vm5524_vm4 = vmxor %vm5055_vm15, %vm7143_vm10  ;;  %vm5544_vm15 = vcmp.ge.f32.partialorder %v1043_v40, 0.0  ;;  %v7379_v25 = vmov 0 }
 0x1bb   : > { %3588 = vmatpush3.msra.mxu1 %v5480_v61  ;;  %vm1271_vm8 = vmand %vm5493_vm14, %vm1259_vm11 }
 0x1bc   : > { %1649 = vrot.lane.b32.xlu1 %v1464_v13, %s3883_s28  ;;  %3589 = vmatprep.subr.mxu1 %v7087_v5  ;;  %vm5538_vm2 = vmxor %vm5179_vm3, %vm7143_vm10  ;;  %v1451_v62 = vsel %vm1271_vm8, %v5467_v11, 0.0  ;;  %vm7368_vm8 = vnez %v7333_v31 }
 0x1bd   : > { %3590 = vmatpush3.msra.mxu1 %v5503_v23  ;;  %v7363_v47 = vsel %vm5538_vm2, 4294967295, %v7362_v47  ;;  %1695 = vrot.lane.b32.xlu0 %v1487_v54, %s3881_s20  ;;  %vm5551_vm11 = vmxor %vm5231_vm12, %vm7143_vm10  ;;  %vm5568_vm12 = vcmp.ge.f32.partialorder %v1151_v9, 0.0 }
 0x1be   : > { %v7367_v16 = vsel %vm5551_vm11, 4294967295, %v7366_v16  ;;  %vm1235_vm3 = vmxor %vm5493_vm14, %vm7143_vm10 }
 0x1bf   : > { %vm5562_vm9 = vmxor %vm7368_vm8, %vm7143_vm10  ;;  %vm5593_vm8 = vcmp.ge.f32.partialorder %v1187_v45, 0.0 }
 0x1c0   : > { %1599 = vrot.lane.b32.xlu1 %v1451_v62, %s3882_s26  ;;  %vm1247_vm2 = vmand %vm5530_vm5, %vm1235_vm3  ;;  %v7378_v28 = vsel %vm5593_vm8, 4294967295, %v7377_v28 }
 0x1c1   : > { %vm5575_vm11 = vmxor %vm5398_vm13, %vm7143_vm10  ;;  %v1439_v31 = vsel %vm1247_vm2, %v5467_v11, 0.0 }
 0x1c2   : > { %vm1283_vm14 = vmxor %vm5544_vm15, %vm7143_vm10  ;;  %1551 = vrot.lane.b32.xlu0 %v1439_v31, %s3881_s20 }
 0x1c3   : > { %vm5586_vm3 = vmxor %vm5471_vm6, %vm7143_vm10 }
 0x1c4   : > { %v7376_v30 = vsel %vm5586_vm3, 4294967295, %v7375_v30  ;;  %vm1295_vm13 = vmand %vm5484_vm1, %vm1283_vm14  ;;  %vm7080_vm14 = vcmp.eq.f32.partialorder %v4879_v4, 0.0 }
 0x1c5   : > { %vm5600_vm2 = vmxor %vm5530_vm5, %vm7143_vm10  ;;  %v1463_v34 = vsel %vm1295_vm13, %v5467_v11, 0.0 }
 0x1c6   : > { %v7380_v25 = vsel %vm5600_vm2, 4294967295, %v7379_v25  ;;  %vm1355_vm6 = vmxor %vm5568_vm12, %vm7143_vm10  ;;  %1647 = vrot.lane.b32.xlu1 %v1463_v34, %s3883_s28 }
 0x1c7   : > { %vm1367_vm1 = vmand %vm5459_vm0, %vm1355_vm6  ;;  %vm7081_vm6 = vcmp.eq.f32.partialorder %v4915_v52, 0.0 }
 0x1c8   : > { %v1499_v57 = vsel %vm1367_vm1, %v5467_v11, 0.0  ;;  %vm1379_vm5 = vmxor %vm5593_vm8, %vm7143_vm10  ;;  %vm7381_vm1 = vnez %v7296_v53  ;;  %vm7382_vm8 = vnez %v7363_v47  ;;  %vm7383_vm10 = vnez %v7319_v20 }
 0x1c9   : > { %1743 = vrot.lane.b32.xlu0 %v1499_v57, %s3882_s26  ;;  %vm1391_vm13 = vmand %vm5568_vm12, %vm1379_vm5  ;;  %vm7082_vm12 = vcmp.eq.f32.partialorder %v4959_v8, 0.0 }
 0x1ca   : > { %v1511_v21 = vsel %vm1391_vm13, %v5467_v11, 0.0  ;;  %vm1226_vm0 = vmor %vm5511_vm7, %vm7080_vm14  ;;  %vm7384_vm7 = vnez %v7367_v16 }
 0x1cb   : > { %vm1322_vm2 = vmand %vm7381_vm1, %vm5524_vm4  ;;  %vm7387_vm4 = vnez %v7344_v58  ;;  %vm863_vm1 = vcmp.eq.f32.partialorder %v5012_v60, 0.0  ;;  %v1430_v19 = vsel %vm1226_vm0, %v5043_v46, 0.0  ;;  %vm7399_vm0 = vmmov 0   ;;  %v5789_v60 = vld [vmem:[%s7043_s5] sm:$0xf] }
 0x1cc   : > { %vm5639_vm5 = vmor %vm7384_vm7, %vm7081_vm6  ;;  %v1478_v35 = vsel %vm1322_vm2, %v5043_v46, 0.0 }
 0x1cd   : > { %1791 = vrot.lane.b32.xlu0 %v1511_v21, %s3883_s28  ;;  %vm5652_vm14 = vmor %vm5575_vm11, %vm7082_vm12  ;;  %vm7394_vm11 = vcmask 261120   ;;  %vm7395_vm12 = vcmask 523264   ;;  %v1429_v57 = vsel %vm5639_vm5, %v5162_v7, 0.0  ;;  %vm7406_vm5 = vcmask 523264  }
 0x1ce   : > { %vm7390_vm7 = vmmov %vm5544_vm15  ;;  %vm7391_vm15 = vnez %v7380_v25  ;;  %v1428_v47 = vsel %vm5652_vm14, %v5289_v3, 0.0  ;;  %vm7085_vm14 = vcmask 293888  }
 0x1cf   : > { %vm5664_vm13 = vmor %vm7391_vm15, %vm863_vm1  ;;  %vm7398_vm15 = vcmask 785408  }
 0x1d0   : > { %vm7396_vm6 = vmmov %vm7394_vm11  ;;  %v1427_v53 = vsel %vm5664_vm13, %v5467_v11, 0.0 }
 0x1d1   : > { %vm7397_vm3 = vmmov %vm7395_vm12 }
 0x1d2   : > { %vm7401_vm2 = vmand %vm7387_vm4, %vm5562_vm9 }
 0x1d3   : > { %vm7405_vm9 = vmmov %vm7396_vm6 }
 0x1d4   : > { %vm7407_vm4 = vmmov %vm7396_vm6 }
 0x20a   : > { %v1558_v33 = vpop.permute.xlu1 %1557  ;;  %v1702_v39 = vpop.permute.xlu0 %1701 }
 0x20b   : > { %v1827_v50 = vsel %vm7394_vm11, %v1430_v19, %v1558_v33  ;;  %v1865_v44 = vsel %vm7396_vm6, %v1478_v35, %v1702_v39  ;;  %v1476_v33 = vsel %vm7401_vm2, %v5289_v3, 0.0  ;;  %vm7409_vm11 = vmmov %vm7407_vm4 }
 0x20c   : > { %vm7411_vm2 = vmmov %vm7407_vm4 }
 0x20e   : > { %v1606_v36 = vpop.permute.xlu1 %1605  ;;  %v1750_v22 = vpop.permute.xlu0 %1749 }
 0x20f   : > { %v1840_v38 = vsel %vm7395_vm12, %v1827_v50, %v1606_v36  ;;  %v1877_v18 = vsel %vm7397_vm3, %v1865_v44, %v1750_v22  ;;  %vm7400_vm3 = vmand %vm7383_vm10, %vm7382_vm8  ;;  %vm7403_vm8 = vnez %v7376_v30 }
 0x210   : > { %v1477_v34 = vsel %vm7400_vm3, %v5162_v7, 0.0  ;;  %vm7402_vm10 = vmmov %vm7396_vm6 }
 0x211   : > { %vm7404_vm12 = vmand %vm7390_vm7, %vm7403_vm8 }
 0x212   : > { %v1798_v13 = vpop.permute.xlu1 %1797  ;;  %v1475_v58 = vsel %vm7404_vm12, %v5467_v11, 0.0  ;;  %vm7408_vm7 = vmmov %vm7406_vm5 }
 0x213   : > { %v1889_v41 = vsel %vm7398_vm15, %v1877_v18, %v1798_v13  ;;  %vm7410_vm3 = vmmov %vm7406_vm5 }
 0x214   : > { %2417 = vmatprep.subr.mxu1 %v1889_v41  ;;  %vm7412_vm13 = vmmov %vm7410_vm3 }
 0x215   : > { %v1700_v32 = vpop.permute.xlu0 %1699  ;;  %vm7415_vm8 = vmmov %vm7410_vm3 }
 0x216   : > { %v1654_v1 = vpop.permute.xlu1 %1653  ;;  %v1864_v20 = vsel %vm7396_vm6, %v1477_v34, %v1700_v32  ;;  %vm7413_vm6 = vmmov %vm7398_vm15 }
 0x217   : > { %v1853_v18 = vsel %vm7398_vm15, %v1840_v38, %v1654_v1  ;;  %vm7416_vm12 = vmmov %vm7410_vm3 }
 0x219   : > { %v1556_v40 = vpop.permute.xlu0 %1555 }
 0x21a   : > { %v1604_v54 = vpop.permute.xlu1 %1603  ;;  %v1826_v35 = vsel %vm7402_vm10, %v1429_v57, %v1556_v40  ;;  %vm7414_vm10 = vmmov %vm7413_vm6 }
 0x21b   : > { %v1839_v30 = vsel %vm7408_vm7, %v1826_v35, %v1604_v54  ;;  %vm7420_vm7 = vmmov 1  }
 0x21d   : > { %v1748_v29 = vpop.permute.xlu0 %1747 }
 0x21e   : > { %v1796_v12 = vpop.permute.xlu1 %1795  ;;  %v1876_v44 = vsel %vm7406_vm5, %v1864_v20, %v1748_v29  ;;  %vm7418_vm5 = vmmov %vm7413_vm6 }
 0x222   : > { %v1698_v9 = vpop.permute.xlu0 %1697  ;;  %v1652_v62 = vpop.permute.xlu1 %1651 }
 0x223   : > { %v1863_v39 = vsel %vm7405_vm9, %v1476_v33, %v1698_v9  ;;  %vm7417_vm9 = vmmov %vm7413_vm6 }
 0x226   : > { %v1602_v16 = vpop.permute.xlu1 %1601 }
 0x227   : > { %v1554_v26 = vpop.permute.xlu0 %1553 }
 0x228   : > { %v1825_v22 = vsel %vm7407_vm4, %v1428_v47, %v1554_v26  ;;  %vm7419_vm4 = vmmov %vm7418_vm5 }
 0x229   : > { %v1838_v10 = vsel %vm7412_vm13, %v1825_v22, %v1602_v16 }
 0x22a   : > { %v1794_v49 = vpop.permute.xlu1 %1793 }
 0x22b   : > { %v1746_v45 = vpop.permute.xlu0 %1745 }
 0x22c   : > { %v1875_v41 = vsel %vm7410_vm3, %v1863_v39, %v1746_v45  ;;  %vm7422_vm3 = vmmov %vm7419_vm4 }
 0x22d   : > { %v1887_v1 = vsel %vm7417_vm9, %v1875_v41, %v1794_v49 }
 0x22e   : > { %v2006_v0 = vpop.f32.mrf.mxu0  ;;  %v1650_v21 = vpop.permute.xlu1 %1649 }
 0x22f   : > { %v1696_v14 = vpop.permute.xlu0 %1695  ;;  %v1851_v29 = vsel %vm7418_vm5, %v1838_v10, %v1650_v21  ;;  %vm7427_vm5 = vnez %v7312_v6  ;;  %v5811_v6 = vld [vmem:[%s3975_s13 + $0x50] sm:$0xff] }
 0x230   : > { %v2008_v42 = vpop.f32.mrf.mxu0  ;;  %v1862_v13 = vsel %vm7409_vm11, %v1475_v58, %v1696_v14  ;;  %vm7421_vm11 = vcmp.eq.f32.partialorder %v4879_v4, 0.0  ;;  %v5772_v4 = vld [vmem:[%s7041_s3 + $0x118] sm:$0xff] }
 0x231   : > { %2148 = vmatprep.mubr.f32.mxu0 %v2008_v42  ;;  %v1888_v42 = vsel %vm7413_vm6, %v1876_v44, %v1796_v12  ;;  %vm1406_vm15 = vmxor %vm7421_vm11, %vm7420_vm7  ;;  %v5739_v12 = vld [vmem:[%s7040_s2] sm:$0xf]  ;;  %vm7424_vm6 = vcmask 261120  }
 0x232   : > { %2149 = vmatmul.mubr.f32.vlgmr.msra.gmra.mxu0 %v2006_v0  ;;  %v1600_v36 = vpop.permute.xlu1 %1599  ;;  %vm1403_vm11 = vmxor %vm863_vm1, %vm7420_vm7  ;;  %vm7430_vm1 = vcmask 1043456  }
 0x233   : > { %3596 = vmatprep.mubr.msk.f32.mxu0 %vm7399_vm0, %v7087_v5  ;;  %3595 = vmatpush3.msk.msra.mxu0 %vm7430_vm1, %v5789_v60 }
 0x234   : > { %v1552_v31 = vpop.permute.xlu0 %1551 }
 0x235   : > { %v1824_v0 = vsel %vm7411_vm2, %v1427_v53, %v1552_v31  ;;  %vm7423_vm2 = vcmp.eq.f32.partialorder %v4915_v52, 0.0  ;;  %v264_v52 = vld [vmem:[%s3975_s13 + $0x70] sm:$0x3] }
 0x236   : > { %v1837_v40 = vsel %vm7416_vm12, %v1824_v0, %v1600_v36  ;;  %vm1405_vm13 = vmxor %vm7423_vm2, %vm7420_vm7  ;;  %vm7426_vm12 = vcmp.eq.f32.partialorder %v4959_v8, 0.0  ;;  %vm7429_vm2 = vnez %v7378_v28  ;;  %v263_v8 = vld [vmem:[%s3975_s13 + $0x68] sm:$0xff]  ;;  %308 = vrot.lane.b32.xlu1 %v264_v52, %s3878_s15 }
 0x237   : > { %vm1404_vm9 = vmxor %vm7426_vm12, %vm7420_vm7  ;;  %306 = vrot.lane.b32.xlu0 %v263_v8, %s3878_s15  ;;  %v430_v28 = vmul.f32 2.0, %v263_v8  ;;  %vm7432_vm12 = vcmask 252928  }
 0x238   : > { %v1648_v38 = vpop.permute.xlu1 %1647 }
 0x239   : > { %v1850_v9 = vsel %vm7422_vm3, %v1837_v40, %v1648_v38 }
 0x23a   : > { %353 = vrot.lane.b32.xlu1 %v264_v52, %s3877_s14 }
 0x23b   : > { %v1744_v48 = vpop.permute.xlu0 %1743  ;;  %351 = vrot.lane.b32.xlu0 %v263_v8, %s3877_s14 }
 0x23f   : > { %v1792_v32 = vpop.permute.xlu0 %1791 }
 0x274   : > { %v2220_v24 = vpop.f32.mrf.mxu1 }
 0x276   : > { %v3580_v37 = vpop.f32.mrf.mxu1 }
 0x277   : > { %v1874_v37 = vsel %vm7415_vm8, %v1862_v13, %v1744_v48 }
 0x278   : > { %v1886_v54 = vsel %vm7419_vm4, %v1874_v37, %v1792_v32  ;;  %vm1417_vm4 = vmand %vm7427_vm5, %vm1405_vm13 }
 0x279   : > { %vm1415_vm13 = vmand %vm7429_vm2, %vm1403_vm11  ;;  %vm7438_vm2 = vcmask 1045504  }
 0x27a   : > { %vm7434_vm5 = vmmov %vm7432_vm12 }
 0x27b   : > { %vm7435_vm11 = vmmov %vm7424_vm6 }
 0x2f2   : > { %v3437_v25 = vpop.f32.mrf.mxu0 }
 0x2f4   : > { %v3438_v19 = vpop.f32.mrf.mxu0 }
 0x2f5   : > { %v3439_v50 = vadd.f32 %v3438_v19, %v3437_v25 }
 0x2f7   : > { %v5703_v59 = vadd.f32 %v3439_v50, %v2220_v24  ;;  %v1852_v24 = vsel %vm7414_vm10, %v1839_v30, %v1652_v62  ;;  %vm7425_vm10 = vnez %v7288_v27  ;;  %v3770_v27 = vld [vmem:[%s7041_s3 + $0xf8] sm:$0xff] }
 0x2f8   : > { %vm1418_vm8 = vmand %vm7425_vm10, %vm1406_vm15  ;;  %vm7428_vm15 = vnez %v7335_v55  ;;  %3458 = vmatprep.subr.mxu0 %v3770_v27 }
 0x2f9   : > { %v2224_v51 = vmul.f32 %v5703_v59, %v5703_v59  ;;  %vm1416_vm3 = vmand %vm7428_vm15, %vm1404_vm9 }
 0x2fa   : > { %vm7436_vm15 = vmmov %vm7430_vm1 }
 0x2fb   : > { %3592 = vmatmul.mubr.msk.f32.vlgmr.msra.gmra.mxu1 %vm7085_vm14, %v2224_v51  ;;  %vm7441_vm1 = vmmov %vm7434_vm5 }
 0x2fc   : > { %2418 = vmatpush1.msra.mxu1 %v1853_v18  ;;  %2457 = vmatprep.mubr.f32.mxu1 %v7087_v5 }
 0x2fd   : > { %2419 = vmatprep.subr.mxu1 %v1888_v42 }
 0x2fe   : > { %2420 = vmatpush1.msra.mxu1 %v1852_v24 }
 0x2ff   : > { %2421 = vmatprep.subr.mxu1 %v1887_v1 }
 0x300   : > { %2422 = vmatpush1.msra.mxu1 %v1851_v29 }
 0x301   : > { %2423 = vmatprep.subr.mxu1 %v1886_v54 }
 0x302   : > { %2424 = vmatpush1.msra.mxu1 %v1850_v9 }
 0x303   : > { %3599 = vmatprep.subr.mxu1 %v7087_v5  ;;  %3373 = vmatmul.mubr.msk.f32.vlgmr.msra.gmra.mxu1 %vm7424_vm6, %v5739_v12 }
 0x304   : > { %3600 = vmatpush3.msk.msra.mxu1 %vm1418_vm8, %v5043_v46  ;;  %3607 = vmatprep.mubr.msk.f32.mxu1 %vm7399_vm0, %v7087_v5  ;;  %v262_v46 = vld [vmem:[%s3975_s13 + $0x60] sm:$0xff]  ;;  %vm7431_vm8 = vcmask 7168  }
 0x305   : > { %3601 = vmatprep.subr.mxu1 %v7087_v5  ;;  %349 = vrot.lane.b32.xlu1 %v262_v46, %s3877_s14  ;;  %vm7433_vm9 = vmmov %vm7431_vm8  ;;  %v429_v0 = vmul.f32 2.0, %v262_v46 }
 0x306   : > { %3602 = vmatpush3.msk.msra.mxu1 %vm1417_vm4, %v5162_v7  ;;  %304 = vrot.lane.b32.xlu0 %v262_v46, %s3878_s15  ;;  %v5804_v7 = vld [vmem:[%s3975_s13 + $0x58] sm:$0xff]  ;;  %s6839_s13 = scalar_lea.vmem [#allocation2], %s3679_s16 }
 0x307   : > { %3603 = vmatprep.subr.mxu1 %v7087_v5  ;;  %s3295_s19 = sshll.u32 %s6839_s13, 4  ;;  %s6985_s19 = int_to_ptr.vmem [resolvable:$true] %s3295_s19 }
 0x308   : > { %3604 = vmatpush3.msk.msra.mxu1 %vm1416_vm3, %v5289_v3  ;;  %vm7437_vm3 = vcmask 1046528   ;;  %s3815_s11 = scalar_lea.vmem %s6985_s19, 192 }
 0x309   : > { %3605 = vmatprep.subr.mxu1 %v7087_v5  ;;  %347 = vrot.lane.b32.xlu1 %v5804_v7, %s3877_s14  ;;  %p3816_p11 = scmp.ne.s32.totalorder %s6985_s19, %s3815_s11 }
 0x30a   : > { %3606 = vmatpush3.msk.msra.mxu1 %vm1415_vm13, %v5467_v11  ;;  %302 = vrot.lane.b32.xlu0 %v5804_v7, %s3878_s15  ;;  %vm7439_vm13 = vmmov %vm7438_vm2 }
 0x30b   : > { %3608 = vmatmul.mubr.msk.f32.vlgmr.msra.gmra.mxu1 %vm7424_vm6, %v5739_v12  ;;  %3610 = vmatprep.subr.mxu1 %v7087_v5  ;;  %vm7440_vm6 = vmmov %vm7431_vm8  ;;  %p3817_p12 = pnand %p3816_p11, %p3960_p5 }
 0x30c   : > { %3611 = vmatpush3.msra.mxu1 %v5772_v4  ;;  %3618 = vmatprep.mubr.msk.f32.mxu1 %vm7399_vm0, %v7087_v5 }
 0x30d   : > { %3612 = vmatprep.subr.mxu1 %v7087_v5  ;;  %345 = vrot.lane.b32.xlu1 %v5811_v6, %s3877_s14  ;;  %p3818_p13 = pneg %p3817_p12 }
 0x30e   : > { %3613 = vmatpush3.msra.mxu1 %v5342_v15  ;;  %300 = vrot.lane.b32.xlu0 %v5811_v6, %s3878_s15  ;;  %v309_v15 = vpop.permute.xlu1 %308 }
 0x30f   : > { %3614 = vmatprep.subr.mxu1 %v7087_v5 }
 0x310   : > { %3615 = vmatpush3.msra.mxu1 %v5366_v17  ;;  %v307_v17 = vpop.permute.xlu0 %306 }
 0x311   : > { %3616 = vmatprep.subr.mxu1 %v7087_v5 }
 0x312   : > { %3617 = vmatpush3.msra.mxu1 %v5392_v63  ;;  %v431_v63 = vmul.f32 2.0, %v264_v52  ;;  %v354_v26 = vpop.permute.xlu1 %353 }
 0x313   : > { %3621 = vmatprep.subr.mxu1 %v7087_v5  ;;  %v385_v62 = vsel %vm7431_vm8, %v309_v15, %v354_v26  ;;  %v401_v45 = vsel %vm7432_vm12, %v309_v15, %v354_v26  ;;  %vm7084_vm8 = vcmask 31744   ;;  %vm7442_vm12 = vmmov %vm7438_vm2 }
 0x314   : > { %v352_v16 = vpop.permute.xlu0 %351  ;;  %v416_v31 = vsub.f32 %v385_v62, %v401_v45  ;;  %v446_v25 = vadd.f32 %v431_v63, %v385_v62 }
 0x315   : > { %v384_v34 = vsel %vm7433_vm9, %v307_v17, %v352_v16  ;;  %v400_v57 = vsel %vm7434_vm5, %v307_v17, %v352_v16  ;;  %vm7443_vm9 = vmmov %vm7437_vm3 }
 0x316   : > { %v5825_v19 = vsub.f32 %v384_v34, %v400_v57  ;;  %v445_v33 = vadd.f32 %v430_v28, %v384_v34  ;;  %v461_v47 = vadd.f32 %v446_v25, %v401_v45  ;;  %v476_v35 = vmul.f32 2.0, %v416_v31  ;;  %vm7444_vm5 = vmmov %vm7438_vm2 }
 0x317   : > { %v585_v58 = vrot.slane %v416_v31, 2  ;;  %v428_v45 = vmul.f32 2.0, %v5804_v7  ;;  %v5888_v25 = vmul.f32 2.0, %v5811_v6 }
 0x318   : > { %v460_v39 = vadd.f32 %v445_v33, %v400_v57  ;;  %v475_v36 = vmul.f32 2.0, %v5825_v19  ;;  %v583_v53 = vrot.slane %v5825_v19, 2  ;;  %v518_v51 = vrot.slane %v476_v35, 1 }
 0x319   : > { %v651_v30 = vrot.slane %v461_v47, 2 }
 0x31a   : > { %v516_v18 = vrot.slane %v475_v36, 1  ;;  %v649_v41 = vrot.slane %v460_v39, 2  ;;  %v586_v42 = vsel %vm7438_vm2, %v583_v53, %v585_v58  ;;  %v5914_v36 = vld [vmem:[%s7041_s3 + $0x78] sm:$0xff] }
 0x31c   : > { %v519_v10 = vsel %vm7437_vm3, %v516_v18, %v518_v51  ;;  %v652_v24 = vsel %vm7439_vm13, %v649_v41, %v651_v30  ;;  %vm7446_vm3 = vmmov %vm7441_vm1  ;;  %v5927_v30 = vld [vmem:[%s7041_s3 + $0xf0] sm:$0xff] }
 0x31d   : > { %v676_v37 = vsub.f32 %v460_v39, %v652_v24 }
 0x31f   : > { %v834_v1 = vsub.f32 0.0, %v676_v37 }
 0x377   : > { %v350_v32 = vpop.permute.xlu1 %349 }
 0x378   : > { %v305_v38 = vpop.permute.xlu0 %304 }
 0x379   : > { %v383_v29 = vsel %vm7440_vm6, %v305_v38, %v350_v32  ;;  %v399_v54 = vsel %vm7441_vm1, %v305_v38, %v350_v32 }
 0x37a   : > { %v444_v9 = vadd.f32 %v429_v0, %v383_v29  ;;  %v5856_v8 = vsub.f32 %v383_v29, %v399_v54  ;;  %v5940_v0 = vld [vmem:[%s7041_s3 + $0x70] sm:$0xff] }
 0x37b   : > { %v348_v47 = vpop.permute.xlu1 %347 }
 0x37c   : > { %v5859_v46 = vadd.f32 %v444_v9, %v399_v54  ;;  %v303_v35 = vpop.permute.xlu0 %302 }
 0x37e   : > { %v647_v15 = vrot.slane %v5859_v46, 2 }
 0x380   : > { %v650_v26 = vsel %vm7442_vm12, %v647_v15, %v649_v41 }
 0x381   : > { %v5881_v16 = vsub.f32 %v5859_v46, %v650_v26 }
 0x3bb   : > { %v2299_v3 = vpop.f32.mrf.mxu1 }
 0x3bc   : > { %3746 = vrsqrt.f32 %v2299_v3  ;;  %vm2305_vm10 = vcmp.eq.f32.partialorder %v2299_v3, inf  ;;  %vm2307_vm4 = vcmp.eq.f32.partialorder %v2299_v3, 0.0  ;;  %v2308_v50 = vand.u32 2147483648, %v2299_v3 }
 0x3bd   : > { %v3593_v55 = vpop.f32.mrf.mxu1 }
 0x3be   : > { %v581_v55 = vrot.slane %v5856_v8, 2 }
 0x3c0   : > { %v584_v57 = vsel %vm7444_vm5, %v581_v55, %v583_v53 }
 0x3c3   : > { %v5817_v11 = vpop.f32.mrf.mxu1 }
 0x3c5   : > { %v5821_v49 = vpop.f32.mrf.mxu1 }
 0x3c9   : > { %v3747_v14 = vpop.eup %3746 }
 0x3ca   : > { %v2304_v21 = vmul.f32 %v3747_v14, %v2299_v3 }
 0x3cb   : > { %v2530_v20 = vpop.f32.mrf.mxu1 }
 0x3cc   : > { %v2306_v48 = vsel %vm2305_vm10, %v2299_v3, %v2304_v21  ;;  %3619 = vmatmul.mubr.msk.f32.vlgmr.msra.gmra.mxu1 %vm7435_vm11, %v2530_v20  ;;  %v5865_v3 = vmul.f32 2.0, %v5856_v8  ;;  %v699_v20 = vmul.f32 %v5881_v16, %v5881_v16 }
 0x3cd   : > { %v2309_v44 = vsel %vm2307_vm4, %v2308_v50, %v2306_v48  ;;  %v3609_v22 = vpop.f32.mrf.mxu1  ;;  %3622 = vmatpush3.msk.msra.mxu1 %vm7436_vm15, %v5416_v56  ;;  %3631 = vmatprep.mubr.msk.f32.mxu1 %vm7399_vm0, %v7087_v5  ;;  %v543_v56 = vadd.f32 %v519_v10, %v5825_v19  ;;  %vm7445_vm15 = vmmov %vm7440_vm6 }
 0x3ce   : > { %v2310_v13 = vmax.f32 %v2309_v44, 1e-12  ;;  %3623 = vmatprep.subr.mxu1 %v7087_v5  ;;  %v514_v28 = vrot.slane %v5865_v3, 1  ;;  %v382_v44 = vsel %vm7445_vm15, %v303_v35, %v348_v47  ;;  %v398_v22 = vsel %vm7446_vm3, %v303_v35, %v348_v47  ;;  %vm7460_vm3 = vmmov %vm7444_vm5  ;;  %v6055_v3 = vld [vmem:[%s7041_s3 + $0x58] sm:$0xff] }
 0x3cf   : > { %3624 = vmatpush3.msra.mxu1 %v5433_v2  ;;  %v5844_v40 = vadd.f32 %v586_v42, %v543_v56  ;;  %v700_v2 = vmul.f32 %v676_v37, %v676_v37  ;;  %v833_v42 = vsub.f32 0.0, %v5881_v16  ;;  %v5954_v56 = vld [vmem:[%s7041_s3 + $0xe8] sm:$0xff]  ;;  %vm7459_vm15 = vcmask 1046528  }
 0x3d0   : > { %3748 = vrcp.f32 %v2310_v13  ;;  %3625 = vmatprep.subr.mxu1 %v7087_v5  ;;  %v517_v34 = vsel %vm7443_vm9, %v514_v28, %v516_v18  ;;  %v5930_v13 = vsub.f32 %v382_v44, %v398_v22  ;;  %v6246_v18 = vld [vmem:[%s7041_s3 + $0xb0] sm:$0xff] }
 0x3d1   : > { %3626 = vmatpush3.msra.mxu1 %v5453_v43  ;;  %v688_v43 = vmul.f32 %v5844_v40, %v5844_v40  ;;  %vm822_vm10 = vcmp.lt.f32.partialorder %v5844_v40, 0.0  ;;  %v5854_v52 = vand.u32 2147483647, %v5844_v40  ;;  %v542_v33 = vadd.f32 %v517_v34, %v5856_v8  ;;  %v6011_v34 = vld [vmem:[%s7041_s3 + $0x60] sm:$0xff]  ;;  %7485 = vst [vmem:[#allocation6_spill] sm:$0xff] %v6246_v18 }
 0x3d2   : > { %3627 = vmatprep.subr.mxu1 %v7087_v5  ;;  %v846_v27 = vsel %vm822_vm10, %v834_v1, %v676_v37  ;;  %v5963_v38 = vmul.f32 2.0, %v5930_v13  ;;  %v5969_v1 = vld [vmem:[%s7041_s3 + $0x68] sm:$0xff] }
 0x3d3   : > { %3628 = vmatpush3.msra.mxu1 %v5480_v61  ;;  %v5862_v61 = vadd.f32 %v700_v2, %v688_v43  ;;  %v882_v17 = vmul.f32 0.9396926, %v5854_v52  ;;  %v5871_v63 = vmul.f32 0.34202015, %v846_v27  ;;  %v978_v62 = vmul.f32 0.5, %v5854_v52 }
 0x3d4   : > { %3629 = vmatprep.subr.mxu1 %v7087_v5  ;;  %v5883_v14 = vmul.f32 0.64278764, %v846_v27  ;;  %v5885_v31 = vmul.f32 0.8660254, %v846_v27  ;;  %v1182_v7 = vmul.f32 -0.9396926, %v5854_v52  ;;  %v5919_v53 = vadd.f32 %v584_v57, %v542_v33 }
 0x3d5   : > { %3630 = vmatpush3.msra.mxu1 %v5503_v23  ;;  %3750 = vrsqrt.f32 %v5862_v61  ;;  %v930_v23 = vmul.f32 0.76604444, %v5854_v52  ;;  %v795_v19 = vand.u32 2147483648, %v5862_v61  ;;  %v906_v50 = vsub.f32 %v882_v17, %v5871_v63  ;;  %v5990_v17 = vld [vmem:[%s7041_s3 + $0xe0] sm:$0xff]  ;;  %v6031_v33 = vld [vmem:[%s7041_s3 + $0xd8] sm:$0xff] }
 0x3d6   : > { %3634 = vmatprep.subr.mxu1 %v7087_v5  ;;  %vm792_vm4 = vcmp.eq.f32.partialorder %v5862_v61, inf  ;;  %v1002_v58 = vsub.f32 %v978_v62, %v5885_v31  ;;  %v5907_v48 = vmul.f32 -0.76604444, %v5854_v52  ;;  %v5909_v39 = vmul.f32 0.9848077, %v846_v27 }
 0x3d7   : > { %v954_v6 = vsub.f32 %v930_v23, %v5883_v14  ;;  %vm794_vm11 = vcmp.eq.f32.partialorder %v5862_v61, 0.0  ;;  %v1074_v51 = vmul.f32 -0.17364818, %v5854_v52  ;;  %v1194_v41 = vsub.f32 %v1182_v7, %v5871_v63 }
 0x3d8   : > { %v687_v10 = vmul.f32 %v5919_v53, %v5919_v53  ;;  %vm821_vm13 = vcmp.lt.f32.partialorder %v5919_v53, 0.0  ;;  %vm5947_vm6 = vcmp.ge.f32.partialorder %v1002_v58, 0.0  ;;  %v5958_v37 = vand.u32 2147483647, %v5919_v53 }
 0x3d9   : > { %vm5932_vm2 = vcmp.ge.f32.partialorder %v954_v6, 0.0  ;;  %v579_v2 = vrot.slane %v5930_v13, 2  ;;  %vm5974_vm1 = vcmp.ge.f32.partialorder %v906_v50, 0.0  ;;  %v1086_v43 = vsub.f32 %v1074_v51, %v5909_v39  ;;  %vm5998_vm12 = vmxor %vm5947_vm6, %vm7420_vm7  ;;  %v6072_v50 = vld [vmem:[%s7041_s3 + $0xd0] sm:$0xff] }
 0x3da   : > { %v5972_v29 = vadd.f32 %v699_v20, %v687_v10  ;;  %vm5981_vm10 = vmxor %vm5932_vm2, %vm7420_vm7  ;;  %v1110_v27 = vmul.f32 -0.5, %v5854_v52  ;;  %v7090_v63 = vrot.slane %v5963_v38, 1  ;;  %v1158_v62 = vsub.f32 %v5907_v48, %v5883_v14  ;;  %v6098_v48 = vld [vmem:[%s7041_s3 + $0x50] sm:$0xff]  ;;  %v6120_v10 = vld [vmem:[%s7041_s3 + $0xc8] sm:$0xff] }
 0x3db   : > { %vm6004_vm9 = vcmp.ge.f32.partialorder %v1194_v41, 0.0  ;;  %v6018_v57 = vsel %vm821_vm13, %v833_v42, %v5881_v16  ;;  %v582_v14 = vsel %vm7444_vm5, %v579_v2, %v581_v55  ;;  %v6026_v7 = vmul.f32 0.17364818, %v5854_v52 }
 0x3dc   : > { %3752 = vrsqrt.f32 %v5972_v29  ;;  %v515_v8 = vsel %vm7459_vm15, %v7090_v63, %v514_v28  ;;  %v1122_v55 = vsub.f32 %v1110_v27, %v5885_v31  ;;  %v6050_v16 = vmul.f32 0.76604444, %v5958_v37 }
 0x3dd   : > { %v3749_v21 = vpop.eup %3748  ;;  %vm6065_vm15 = vcmp.ge.f32.partialorder %v1086_v43, 0.0  ;;  %v7461_v31 = vmov 0  ;;  %v6087_v47 = vmul.f32 0.64278764, %v6018_v57  ;;  %v6090_v35 = vmul.f32 0.5, %v5958_v37 }
 0x3de   : > { %3597 = vmatmul.mubr.msk.f32.vlgmr.msra.gmra.mxu0 %vm7084_vm8, %v3749_v21  ;;  %v7462_v31 = vsel %vm6065_vm15, 4294967295, %v7461_v31  ;;  %vm6082_vm8 = vcmp.ge.f32.partialorder %v1122_v55, 0.0  ;;  %v6093_v58 = vmul.f32 0.8660254, %v6018_v57  ;;  %vm6106_vm14 = vcmp.ge.f32.partialorder %v1158_v62, 0.0  ;;  %v6280_v55 = vld [vmem:[%s7041_s3 + $0xa8] sm:$0xff] }
 0x3df   : > { %3459 = vmatpush3.msra.mxu0 %v5914_v36  ;;  %2601 = vmatprep.mubr.f32.mxu0 %v5821_v49  ;;  %v443_v49 = vadd.f32 %v428_v45, %v382_v44  ;;  %v7457_v45 = vmov 0  ;;  %vm6113_vm5 = vmxor %vm6082_vm8, %vm7420_vm7  ;;  %v1050_v27 = vsub.f32 %v6026_v7, %v5909_v39  ;;  %v346_v7 = vpop.permute.xlu1 %345  ;;  %v6273_v62 = vmul.f32 0.9848077, %v6018_v57  ;;  %7491 = vst [vmem:[#allocation8_spill] sm:$0xff] %v6280_v55 }
 0x3e0   : > { %3460 = vmatprep.subr.mxu0 %v5927_v30  ;;  %v7458_v45 = vsel %vm6004_vm9, 4294967295, %v7457_v45  ;;  %vm6133_vm13 = vmxor %vm6106_vm14, %vm7420_vm7 }
 0x3e1   : > { %3461 = vmatpush3.msra.mxu0 %v5940_v0  ;;  %v5960_v32 = vadd.f32 %v443_v49, %v398_v22 }
 0x3e2   : > { %3462 = vmatprep.subr.mxu0 %v5954_v56  ;;  %v3751_v21 = vpop.eup %3750 }
 0x3e3   : > { %3463 = vmatpush3.msra.mxu0 %v5969_v1  ;;  %v7089_v23 = vrot.slane %v5960_v32, 2  ;;  %v791_v46 = vmul.f32 %v3751_v21, %v5862_v61  ;;  %v301_v21 = vpop.permute.xlu0 %300 }
 0x3e4   : > { %3464 = vmatprep.subr.mxu0 %v5990_v17 }
 0x3e5   : > { %3465 = vmatpush3.msra.mxu0 %v6011_v34  ;;  %v648_v52 = vsel %vm7460_vm3, %v7089_v23, %v647_v15  ;;  %v541_v15 = vadd.f32 %v515_v8, %v5930_v13  ;;  %vm6078_vm3 = vmxor %vm6004_vm9, %vm7420_vm7  ;;  %v793_v44 = vsel %vm792_vm4, %v5862_v61, %v791_v46  ;;  %v6146_v61 = vld [vmem:[%s7039_s1 + $0x8] sm:$0xff]  ;;  %v953_v8 = vsub.f32 %v6050_v16, %v6087_v47 }
 0x3e6   : > { %3466 = vmatprep.subr.mxu0 %v6031_v33  ;;  %v674_v28 = vsub.f32 %v5960_v32, %v648_v52  ;;  %v796_v42 = vsel %vm794_vm11, %v795_v19, %v793_v44  ;;  %v6164_v52 = vld [vmem:[%s7041_s3 + $0xc0] sm:$0xff]  ;;  %vm7473_vm11 = vcmask 7168   ;;  %vm7474_vm4 = vcmask 252928  }
 0x3e7   : > { %3467 = vmatpush3.msra.mxu0 %v6055_v3  ;;  %v6104_v22 = vadd.f32 %v582_v14, %v541_v15  ;;  %v6140_v14 = vld [vmem:[%s7041_s3 + $0x48] sm:$0xff]  ;;  %v6149_v19 = vmul.f32 %v6146_v61, %v796_v42  ;;  %v381_v46 = vsel %vm7473_vm11, %v301_v21, %v346_v7  ;;  %v397_v15 = vsel %vm7474_vm4, %v301_v21, %v346_v7  ;;  %v6179_v44 = vld [vmem:[%s7041_s3 + $0x40] sm:$0xff]  ;;  %vm7475_vm4 = vmand %vm5974_vm1, %vm5981_vm10 }
 0x3e8   : > { %3468 = vmatprep.subr.mxu0 %v6072_v50  ;;  %v698_v51 = vmul.f32 %v674_v28, %v674_v28  ;;  %v832_v43 = vsub.f32 0.0, %v674_v28  ;;  %v1001_v16 = vsub.f32 %v6090_v35, %v6093_v58  ;;  %v412_v21 = vsub.f32 %v381_v46, %v397_v15  ;;  %vm1374_vm11 = vmand %vm6082_vm8, %vm6133_vm13  ;;  %v6198_v35 = vld [vmem:[%s7041_s3 + $0xb8] sm:$0xff] }
 0x3e9   : > { %3469 = vmatpush3.msra.mxu0 %v6098_v48  ;;  %v686_v39 = vmul.f32 %v6104_v22, %v6104_v22  ;;  %v1446_v7 = vsel %vm7475_vm4, %v6149_v19, 0.0  ;;  %v442_v5 = vadd.f32 %v5888_v25, %v381_v46  ;;  %vm7476_vm9 = vcmp.lt.f32.partialorder %v6104_v22, 0.0  ;;  %vm7477_vm10 = vmand %vm6065_vm15, %vm6113_vm5 }
 0x3ea   : > { %3470 = vmatprep.subr.mxu0 %v6120_v10  ;;  %v6203_v9 = vsel %vm7476_vm9, %v832_v43, %v674_v28  ;;  %1565 = vrot.lane.b32.xlu1 %v1446_v7, %s3881_s20  ;;  %v1494_v25 = vsel %vm7477_vm10, %v6149_v19, 0.0  ;;  %vm6215_vm4 = vcmp.ge.f32.partialorder %v1050_v27, 0.0  ;;  %v6222_v28 = vld [vmem:[%s7041_s3 + $0x38] sm:$0xff]  ;;  %vm7481_vm9 = vmand %vm5932_vm2, %vm5998_vm12  ;;  %vm6239_vm10 = vcmp.ge.f32.partialorder %v953_v8, 0.0  ;;  %v6258_v8 = vld [vmem:[%s7041_s3 + $0x30] sm:$0xff] }
 0x3eb   : > { %3471 = vmatpush3.msra.mxu0 %v6140_v14  ;;  %v6182_v42 = vadd.f32 %v698_v51, %v686_v39  ;;  %v6206_v51 = vand.u32 2147483647, %v6104_v22  ;;  %v7478_v39 = vmov 0  ;;  %7480 = vst [vmem:[#allocation5_spill] sm:$0xff] %v6222_v28  ;;  %v1458_v41 = vsel %vm7481_vm9, %v6149_v19, 0.0  ;;  %vm7482_vm5 = vmand %vm6106_vm14, %vm6078_vm3  ;;  %1709 = vrot.lane.b32.xlu0 %v1494_v25, %s3881_s20  ;;  %v3753_v25 = vpop.eup %3752  ;;  %v6471_v27 = vld [vmem:[%s7041_s3 + $0x80] sm:$0xff] }
 0x3ec   : > { %3472 = vmatprep.subr.mxu0 %v6164_v52  ;;  %v7479_v39 = vsel %vm6215_vm4, 4294967295, %v7478_v39  ;;  %v1518_v43 = vsel %vm7482_vm5, %v6149_v19, 0.0  ;;  %v457_v26 = vadd.f32 %v442_v5, %v397_v15  ;;  %v472_v46 = vmul.f32 2.0, %v412_v21  ;;  %7486 = vst [vmem:[#allocation7_spill] sm:$0xff] %v6258_v8  ;;  %vm6264_vm14 = vmxor %vm6215_vm4, %vm7420_vm7 }
 0x3ed   : > { %3473 = vmatpush3.msra.mxu0 %v6179_v44  ;;  %3754 = vrsqrt.f32 %v6182_v42  ;;  %v578_v49 = vrot.slane %v412_v21, 2  ;;  %v1506_v6 = vsel %vm1374_vm11, %v6149_v19, 0.0  ;;  %vm6268_vm2 = vcmp.ge.f32.partialorder %v1001_v16, 0.0  ;;  %vm1302_vm11 = vmand %vm5947_vm6, %vm6264_vm14  ;;  %7528 = vst [vmem:[#allocation18_spill] sm:$0xff] %v6471_v27 }
 0x3ee   : > { %3474 = vmatprep.subr.mxu0 %v6198_v35  ;;  %v1073_v15 = vmul.f32 -0.17364818, %v5958_v37  ;;  %v1109_v7 = vmul.f32 -0.5, %v5958_v37  ;;  %v511_v23 = vrot.slane %v472_v46, 1  ;;  %vm7492_vm8 = vcmask 1045504   ;;  %1613 = vrot.lane.b32.xlu1 %v1458_v41, %s3882_s26  ;;  %vm6299_vm12 = vmxor %vm6268_vm2, %vm7420_vm7  ;;  %v6309_v46 = vld [vmem:[%s7041_s3 + $0xa0] sm:$0xff] }
 0x3ef   : > { %3475 = vmatpush3.msra.mxu0 %v6222_v28  ;;  %v580_v16 = vsel %vm7492_vm8, %v578_v49, %v579_v2  ;;  %v644_v63 = vrot.slane %v457_v26, 2  ;;  %v784_v28 = vmul.f32 %v3753_v25, %v5972_v29  ;;  %1757 = vrot.lane.b32.xlu0 %v1506_v6, %s3882_s26  ;;  %v1145_v41 = vmul.f32 -0.76604444, %v5958_v37  ;;  %7496 = vst [vmem:[#allocation10_spill] sm:$0xff] %v6309_v46  ;;  %vm7500_vm3 = vmmov %vm7492_vm8 }
 0x3f0   : > { %3476 = vmatprep.subr.mxu0 %v6246_v18  ;;  %v6291_v18 = vld [vmem:[%s7041_s3 + $0x28] sm:$0xff]  ;;  %v1085_v2 = vsub.f32 %v1073_v15, %v6273_v62  ;;  %v7497_v49 = vrot.slane %v5963_v38, 1  ;;  %vm7498_vm13 = vcmask 1046528   ;;  %v7499_v25 = vrot.slane %v5960_v32, 2  ;;  %vm6342_vm8 = vmxor %vm6239_vm10, %vm7420_vm7 }
 0x3f1   : > { %3477 = vmatpush3.msra.mxu0 %v6258_v8  ;;  %v893_v8 = vmul.f32 0.34202015, %v6018_v57  ;;  %7493 = vst [vmem:[#allocation9_spill] sm:$0xff] %v6291_v18  ;;  %v1121_v57 = vsub.f32 %v1109_v7, %v6093_v58  ;;  %v1181_v58 = vmul.f32 -0.9396926, %v5958_v37  ;;  %v6327_v7 = vld [vmem:[%s7041_s3 + $0x20] sm:$0xff] }
 0x3f2   : > { %3478 = vmatprep.subr.mxu0 %v6280_v55  ;;  %v513_v6 = vsel %vm7498_vm13, %v511_v23, %v7497_v49  ;;  %v881_v15 = vmul.f32 0.9396926, %v5958_v37  ;;  %7501 = vst [vmem:[#allocation11_spill] sm:$0xff] %v6327_v7  ;;  %vm7502_vm9 = vcmp.eq.f32.partialorder %v5972_v29, inf  ;;  %vm6335_vm5 = vcmp.ge.f32.partialorder %v1085_v2, 0.0  ;;  %1805 = vrot.lane.b32.xlu1 %v1518_v43, %s3883_s28 }
 0x3f3   : > { %3479 = vmatpush3.msra.mxu0 %v6291_v18  ;;  %v646_v18 = vsel %vm7500_vm3, %v644_v63, %v7499_v25  ;;  %v786_v32 = vsel %vm7502_vm9, %v5972_v29, %v784_v28  ;;  %v540_v38 = vadd.f32 %v513_v6, %v412_v21  ;;  %v7503_v23 = vmov 0  ;;  %v6349_v25 = vld [vmem:[%s7041_s3 + $0x98] sm:$0xff] }
 0x3f4   : > { %3480 = vmatprep.subr.mxu0 %v6309_v46  ;;  %v6333_v63 = vsub.f32 %v457_v26, %v646_v18  ;;  %v7504_v23 = vsel %vm6335_vm5, 4294967295, %v7503_v23  ;;  %7507 = vst [vmem:[#allocation12_spill] sm:$0xff] %v6349_v25  ;;  %v7508_v21 = vand.u32 2147483648, %v5972_v29  ;;  %vm7509_vm13 = vcmp.eq.f32.partialorder %v5972_v29, 0.0  ;;  %v6369_v6 = vld [vmem:[%s7041_s3 + $0x18] sm:$0xff]  ;;  %v6375_v29 = vld [vmem:[%s7039_s1] sm:$0xff] }
 0x3f5   : > { %3481 = vmatpush3.msra.mxu0 %v6327_v7  ;;  %vm6361_vm9 = vcmp.ge.f32.partialorder %v1121_v57, 0.0  ;;  %v1157_v26 = vsub.f32 %v1145_v41, %v6087_v47  ;;  %v1193_v2 = vsub.f32 %v1181_v58, %v893_v8  ;;  %7512 = vst [vmem:[#allocation13_spill] sm:$0xff] %v6369_v6  ;;  %v6380_v57 = vadd.f32 %v580_v16, %v540_v38  ;;  %v6400_v16 = vld [vmem:[%s7041_s3 + $0x90] sm:$0xff] }
 0x3f6   : > { %3482 = vmatprep.subr.mxu0 %v6349_v25  ;;  %v789_v28 = vsel %vm7509_vm13, %v7508_v21, %v786_v32  ;;  %v697_v47 = vmul.f32 %v6333_v63, %v6333_v63  ;;  %v1470_v41 = vsel %vm1302_vm11, %v6149_v19, 0.0  ;;  %vm6393_vm13 = vmxor %vm6361_vm9, %vm7420_vm7  ;;  %7515 = vst [vmem:[#allocation14_spill] sm:$0xff] %v6400_v16  ;;  %v7518_v5 = vmov 0  ;;  %v6419_v21 = vld [vmem:[%s7041_s3 + $0x10] sm:$0xff] }
 0x3f7   : > { %3483 = vmatpush3.msra.mxu0 %v6369_v6  ;;  %v6378_v43 = vmul.f32 %v6375_v29, %v789_v28  ;;  %vm1349_vm6 = vmand %vm6335_vm5, %vm6393_vm13  ;;  %vm6407_vm14 = vcmp.ge.f32.partialorder %v1157_v26, 0.0  ;;  %vm6411_vm11 = vcmp.ge.f32.partialorder %v1193_v2, 0.0  ;;  %v905_v32 = vsub.f32 %v881_v15, %v893_v8  ;;  %7520 = vst [vmem:[#allocation15_spill] sm:$0xff] %v6419_v21  ;;  %1661 = vrot.lane.b32.xlu1 %v1470_v41, %s3883_s28 }
 0x3f8   : > { %3484 = vmatprep.subr.mxu0 %v6400_v16  ;;  %v7519_v5 = vsel %vm6411_vm11, 4294967295, %v7518_v5  ;;  %v1025_v38 = vmul.f32 0.17364818, %v5958_v37  ;;  %v685_v28 = vmul.f32 %v6380_v57, %v6380_v57  ;;  %vm6429_vm5 = vmxor %vm6411_vm11, %vm7420_vm7  ;;  %v6436_v37 = vld [vmem:[%s7041_s3 + $0x88] sm:$0xff]  ;;  %v781_v15 = vand.u32 2147483648, %v6182_v42 }
 0x3f9   : > { %3485 = vmatpush3.msra.mxu0 %v6419_v21  ;;  %7523 = vst [vmem:[#allocation16_spill] sm:$0xff] %v6436_v37  ;;  %v1493_v26 = vsel %vm1349_vm6, %v6378_v43, 0.0  ;;  %vm6442_vm3 = vcmp.ge.f32.partialorder %v905_v32, 0.0  ;;  %v6450_v21 = vld [vmem:[%s7041_s3 + $0x8] sm:$0xff]  ;;  %vm7527_vm6 = vmand %vm6239_vm10, %vm6299_vm12  ;;  %v940_v32 = vmul.f32 0.64278764, %v6203_v9 }
 0x3fa   : > { %3486 = vmatprep.subr.mxu0 %v6436_v37  ;;  %v1049_v58 = vsub.f32 %v1025_v38, %v6273_v62  ;;  %7526 = vst [vmem:[#allocation17_spill] sm:$0xff] %v6450_v21  ;;  %v6453_v37 = vadd.f32 %v697_v47, %v685_v28  ;;  %v1457_v41 = vsel %vm7527_vm6, %v6378_v43, 0.0  ;;  %1707 = vrot.lane.b32.xlu0 %v1493_v26, %s3881_s20  ;;  %v928_v62 = vmul.f32 0.76604444, %v6206_v51  ;;  %v3755_v47 = vpop.eup %3754  ;;  %vm1253_vm10 = vmand %vm6442_vm3, %vm6342_vm8 }
 0x3fb   : > { %3487 = vmatpush3.msra.mxu0 %v6450_v21  ;;  %v831_v13 = vsub.f32 0.0, %v6333_v63  ;;  %v7529_v38 = vmov 0  ;;  %v976_v28 = vmul.f32 0.5, %v6206_v51  ;;  %v988_v26 = vmul.f32 0.8660254, %v6203_v9  ;;  %v6488_v21 = vld [vmem:[%s7041_s3] sm:$0xff]  ;;  %1611 = vrot.lane.b32.xlu1 %v1457_v41, %s3882_s26 }
 0x3fc   : > { %3488 = vmatprep.subr.mxu0 %v6471_v27  ;;  %vm6479_vm12 = vcmp.ge.f32.partialorder %v1049_v58, 0.0  ;;  %7531 = vst [vmem:[#allocation19_spill] sm:$0xff] %v6488_v21  ;;  %v777_v49 = vmul.f32 %v3755_v47, %v6182_v42  ;;  %3756 = vrsqrt.f32 %v6453_v37  ;;  %v1036_v27 = vmul.f32 0.9848077, %v6203_v9 }
 0x3fd   : > { %v7530_v38 = vsel %vm6479_vm12, 4294967295, %v7529_v38  ;;  %3489 = vmatpush3.msra.mxu0 %v6488_v21  ;;  %vm6497_vm6 = vmxor %vm6479_vm12, %vm7420_vm7  ;;  %v6504_v16 = vand.u32 2147483647, %v6380_v57  ;;  %v1445_v47 = vsel %vm1253_vm10, %v6378_v43, 0.0  ;;  %v952_v21 = vsub.f32 %v928_v62, %v940_v32 }
 0x3fe   : > { %2602 = vmatmul.mubr.f32.vlgmr.msra.gmra.mxu0 %v5817_v11  ;;  %v1000_v6 = vsub.f32 %v976_v28, %v988_v26  ;;  %vm7534_vm13 = vcmp.eq.f32.partialorder %v6182_v42, inf  ;;  %vm7535_vm12 = vmand %vm6407_vm14, %vm6429_vm5  ;;  %1563 = vrot.lane.b32.xlu0 %v1445_v47, %s3881_s20  ;;  %v1072_v41 = vmul.f32 -0.17364818, %v6206_v51  ;;  %v1108_v62 = vmul.f32 -0.5, %v6206_v51 }
 0x3ff   : > { %v779_v25 = vsel %vm7534_vm13, %v6182_v42, %v777_v49  ;;  %v1517_v11 = vsel %vm7535_vm12, %v6378_v43, 0.0  ;;  %vm1361_vm10 = vmxor %vm6407_vm14, %vm7420_vm7  ;;  %v7536_v28 = vmov 0.0   ;;  %vm7537_vm13 = vcmp.eq.f32.partialorder %v6182_v42, 0.0 }
 0x400   : > { %3639 = vmatprep.subr.mxu0 %v7536_v28  ;;  %v782_v49 = vsel %vm7537_vm13, %v781_v15, %v779_v25  ;;  %vm1373_vm8 = vmand %vm6361_vm9, %vm1361_vm10  ;;  %vm6532_vm5 = vcmp.ge.f32.partialorder %v952_v21, 0.0  ;;  %vm6536_vm12 = vcmp.ge.f32.partialorder %v1000_v6, 0.0  ;;  %v892_v24 = vmul.f32 0.34202015, %v6203_v9  ;;  %3647 = vmatprep.mubr.msk.f32.mxu0 %vm7399_vm0, %v7536_v28 }
 0x401   : > { %vm7542_vm14 = vmand %vm6268_vm2, %vm6497_vm6  ;;  %v1505_v25 = vsel %vm1373_vm8, %v6378_v43, 0.0  ;;  %v1084_v9 = vsub.f32 %v1072_v41, %v1036_v27  ;;  %v1120_v6 = vsub.f32 %v1108_v62, %v988_v26  ;;  %vm7545_vm10 = vcmp.lt.f32.partialorder %v6380_v57, 0.0  ;;  %1803 = vrot.lane.b32.xlu1 %v1517_v11, %s3883_s28 }
 0x402   : > { %v1469_v42 = vsel %vm7542_vm14, %v6378_v43, 0.0  ;;  %vm6553_vm9 = vmxor %vm6536_vm12, %vm7420_vm7  ;;  %v843_v21 = vsel %vm7545_vm10, %v831_v13, %v6333_v63  ;;  %v1144_v20 = vmul.f32 -0.76604444, %v6206_v51  ;;  %v1180_v15 = vmul.f32 -0.9396926, %v6206_v51  ;;  %1755 = vrot.lane.b32.xlu0 %v1505_v25, %s3882_s26 }
 0x403   : > { %v880_v58 = vmul.f32 0.9396926, %v6206_v51  ;;  %v6565_v7 = vmul.f32 %v6146_v61, %v782_v49  ;;  %vm6572_vm8 = vcmp.ge.f32.partialorder %v1084_v9, 0.0  ;;  %v7546_v63 = vmov 0  ;;  %vm6584_vm13 = vmxor %vm6532_vm5, %vm7420_vm7 }
 0x404   : > { %v7547_v63 = vsel %vm6572_vm8, 4294967295, %v7546_v63  ;;  %vm6576_vm6 = vcmp.ge.f32.partialorder %v1120_v6, 0.0  ;;  %v1024_v26 = vmul.f32 0.17364818, %v6206_v51  ;;  %v1156_v11 = vsub.f32 %v1144_v20, %v940_v32  ;;  %vm7556_vm15 = vmand %vm6532_vm5, %vm6553_vm9 }
 0x405   : > { %v1192_v61 = vsub.f32 %v1180_v15, %v892_v24  ;;  %v904_v41 = vsub.f32 %v880_v58, %v892_v24  ;;  %vm1336_vm14 = vmxor %vm6576_vm6, %vm7420_vm7  ;;  %v987_v25 = vmul.f32 0.8660254, %v843_v21  ;;  %v1107_v9 = vmul.f32 -0.5, %v6504_v16  ;;  %1659 = vrot.lane.b32.xlu1 %v1469_v42, %s3883_s28 }
 0x406   : > { %v1048_v49 = vsub.f32 %v1024_v26, %v1036_v27  ;;  %vm1348_vm10 = vmand %vm6572_vm8, %vm1336_vm14  ;;  %vm6595_vm2 = vcmp.ge.f32.partialorder %v1156_v11, 0.0  ;;  %v7554_v32 = vmov 0  ;;  %v1035_v24 = vmul.f32 0.9848077, %v843_v21 }
 0x407   : > { %vm6599_vm4 = vcmp.ge.f32.partialorder %v1192_v61, 0.0  ;;  %v1071_v6 = vmul.f32 -0.17364818, %v6504_v16  ;;  %v1456_v27 = vsel %vm7556_vm15, %v6565_v7, 0.0  ;;  %v1492_v42 = vsel %vm1348_vm10, %v6565_v7, 0.0 }
 0x408   : > { %v7555_v32 = vsel %vm6599_vm4, 4294967295, %v7554_v32  ;;  %vm6614_vm14 = vmxor %vm6599_vm4, %vm7420_vm7  ;;  %vm6618_vm8 = vcmp.ge.f32.partialorder %v904_v41, 0.0  ;;  %1705 = vrot.lane.b32.xlu0 %v1492_v42, %s3881_s20  ;;  %vm6627_vm5 = vcmp.ge.f32.partialorder %v1048_v49, 0.0  ;;  %v7561_v8 = vmov 0 }
 0x409   : > { %v7562_v8 = vsel %vm6627_vm5, 4294967295, %v7561_v8  ;;  %v927_v18 = vmul.f32 0.76604444, %v6504_v16  ;;  %v939_v58 = vmul.f32 0.64278764, %v843_v21  ;;  %v975_v26 = vmul.f32 0.5, %v6504_v16  ;;  %v3757_v61 = vpop.eup %3756  ;;  %1609 = vrot.lane.b32.xlu1 %v1456_v27, %s3882_s26  ;;  %vm1252_vm15 = vmand %vm6618_vm8, %vm6584_vm13 }
 0x40a   : > { %v1119_v11 = vsub.f32 %v1107_v9, %v987_v25  ;;  %v774_v41 = vand.u32 2147483648, %v6453_v37  ;;  %v1083_v49 = vsub.f32 %v1071_v6, %v1035_v24  ;;  %v879_v42 = vmul.f32 0.9396926, %v6504_v16  ;;  %vm7563_vm10 = vmand %vm6595_vm2, %vm6614_vm14 }
 0x40b   : > { %v891_v46 = vmul.f32 0.34202015, %v843_v21  ;;  %v770_v55 = vmul.f32 %v3757_v61, %v6453_v37  ;;  %v1516_v9 = vsel %vm7563_vm10, %v6565_v7, 0.0  ;;  %v1444_v27 = vsel %vm1252_vm15, %v6565_v7, 0.0  ;;  %vm6653_vm9 = vmxor %vm6627_vm5, %vm7420_vm7 }
 0x40c   : > { %v999_v6 = vsub.f32 %v975_v26, %v987_v25  ;;  %1561 = vrot.lane.b32.xlu0 %v1444_v27, %s3881_s20  ;;  %vm1300_vm13 = vmand %vm6536_vm12, %vm6653_vm9  ;;  %v951_v21 = vsub.f32 %v927_v18, %v939_v58  ;;  %v1023_v20 = vmul.f32 0.17364818, %v6504_v16  ;;  %vm7566_vm14 = vcmp.eq.f32.partialorder %v6453_v37, inf }
 0x40d   : > { %v772_v61 = vsel %vm7566_vm14, %v6453_v37, %v770_v55  ;;  %vm1360_vm15 = vmxor %vm6595_vm2, %vm7420_vm7  ;;  %vm6669_vm10 = vcmp.ge.f32.partialorder %v1119_v11, 0.0  ;;  %vm7569_vm5 = vcmp.eq.f32.partialorder %v6453_v37, 0.0  ;;  %1801 = vrot.lane.b32.xlu1 %v1516_v9, %s3883_s28  ;;  %vm6678_vm9 = vcmp.ge.f32.partialorder %v1083_v49, 0.0 }
 0x40e   : > { %v775_v26 = vsel %vm7569_vm5, %v774_v41, %v772_v61  ;;  %vm1372_vm12 = vmand %vm6576_vm6, %vm1360_vm15  ;;  %v903_v55 = vsub.f32 %v879_v42, %v891_v46  ;;  %v1143_v51 = vmul.f32 -0.76604444, %v6504_v16  ;;  %v1468_v11 = vsel %vm1300_vm13, %v6565_v7, 0.0 }
 0x40f   : > { %v6684_v18 = vmul.f32 %v6375_v29, %v775_v26  ;;  %v1504_v37 = vsel %vm1372_vm12, %v6565_v7, 0.0  ;;  %vm6688_vm2 = vcmp.ge.f32.partialorder %v999_v6, 0.0  ;;  %vm1335_vm6 = vmxor %vm6669_vm10, %vm7420_vm7  ;;  %vm963_vm5 = vcmp.ge.f32.partialorder %v951_v21, 0.0 }
 0x410   : > { %1753 = vrot.lane.b32.xlu0 %v1504_v37, %s3882_s26  ;;  %v1047_v13 = vsub.f32 %v1023_v20, %v1035_v24  ;;  %v1179_v49 = vmul.f32 -0.9396926, %v6504_v16  ;;  %vm1347_vm14 = vmand %vm6678_vm9, %vm1335_vm6  ;;  %v1155_v42 = vsub.f32 %v1143_v51, %v939_v58  ;;  %vm6704_vm12 = vcmp.ge.f32.partialorder %v903_v55, 0.0 }
 0x411   : > { %1657 = vrot.lane.b32.xlu1 %v1468_v11, %s3883_s28  ;;  %v1491_v29 = vsel %vm1347_vm14, %v6684_v18, 0.0  ;;  %vm1263_vm13 = vmxor %vm6688_vm2, %vm7420_vm7  ;;  %v7582_v61 = vmov 0 }
 0x412   : > { %vm1275_vm15 = vmand %vm963_vm5, %vm1263_vm13  ;;  %vm6710_vm0 = vcmp.ge.f32.partialorder %v1047_v13, 0.0  ;;  %v1191_v27 = vsub.f32 %v1179_v49, %v891_v46  ;;  %vm1167_vm13 = vcmp.ge.f32.partialorder %v1155_v42, 0.0  ;;  %v7578_v46 = vmov 0 }
 0x413   : > { %v1455_v16 = vsel %vm1275_vm15, %v6684_v18, 0.0  ;;  %vm1239_vm6 = vmxor %vm963_vm5, %vm7420_vm7 }
 0x414   : > { %1703 = vrot.lane.b32.xlu0 %v1491_v29, %s3881_s20  ;;  %vm1251_vm14 = vmand %vm6704_vm12, %vm1239_vm6  ;;  %vm6725_vm11 = vcmp.ge.f32.partialorder %v1191_v27, 0.0 }
 0x415   : > { %1607 = vrot.lane.b32.xlu1 %v1455_v16, %s3882_s26  ;;  %v1443_v58 = vsel %vm1251_vm14, %v6684_v18, 0.0  ;;  %vm1287_vm4 = vmxor %vm6710_vm0, %vm7420_vm7  ;;  %v7579_v46 = vsel %vm6725_vm11, 4294967295, %v7578_v46 }
 0x416   : > { %vm1299_vm15 = vmand %vm6688_vm2, %vm1287_vm4 }
 0x417   : > { %v1467_v62 = vsel %vm1299_vm15, %v6684_v18, 0.0  ;;  %vm1359_vm5 = vmxor %vm1167_vm13, %vm7420_vm7 }
 0x418   : > { %1559 = vrot.lane.b32.xlu0 %v1443_v58, %s3881_s20  ;;  %vm1371_vm6 = vmand %vm6669_vm10, %vm1359_vm5  ;;  %vm869_vm5 = vcmp.eq.f32.partialorder %v5919_v53, 0.0  ;;  %s3681_s20 = smul.u32 192, %s3943_s25  ;;  %s3885_s25 = smov [#allocation2]  }
 0x419   : > { %1655 = vrot.lane.b32.xlu1 %v1467_v62, %s3883_s28  ;;  %v1503_v6 = vsel %vm1371_vm6, %v6684_v18, 0.0  ;;  %vm1383_vm14 = vmxor %vm6725_vm11, %vm7420_vm7  ;;  %s3819_s16 = sshll.u32 %s3885_s25, 4  ;;  %s3820_s16 = int_to_ptr.vmem [resolvable:$false] %s3819_s16 }
 0x41a   : > { %vm1395_vm4 = vmand %vm1167_vm13, %vm1383_vm14  ;;  %vm870_vm13 = vcmp.eq.f32.partialorder %v5844_v40, 0.0  ;;  %vm7588_vm14 = vnez %v7458_v45  ;;  %v3804_v45 = vld [vmem:[%s7041_s3 + $0x110] sm:$0xff]  ;;  %s6990_s9 = scalar_lea.hbm %s7044_s6, %s3681_s20  ;;  %s3821_s14 = scalar_lea.vmem %s3820_s16, 384 }
 0x41b   : > { %v1515_v21 = vsel %vm1395_vm4, %v6684_v18, 0.0  ;;  %vm1218_vm2 = vmxor %vm5974_vm1, %vm7420_vm7  ;;  %p3822_p0 = scmp.lt.s32.totalorder %s6985_s19, %s3820_s16  ;;  %p3823_p1 = scmp.lt.s32.totalorder %s3821_s14, %s3815_s11 }
 0x41c   : > { %1751 = vrot.lane.b32.xlu0 %v1503_v6, %s3882_s26  ;;  %vm1217_vm10 = vmxor %vm6442_vm3, %vm7420_vm7 }
 0x41d   : > { %vm6750_vm15 = vmxor %vm6618_vm8, %vm7420_vm7  ;;  %p3824_p2 = por %p3823_p1, %p3822_p0 }
 0x41e   : > { %vm6756_vm6 = vmor %vm1218_vm2, %vm870_vm13 }
 0x41f   : > { %v7583_v61 = vsel %vm6756_vm6, 4294967295, %v7582_v61  ;;  %vm6763_vm1 = vmxor %vm6678_vm9, %vm7420_vm7  ;;  %vm868_vm6 = vcmp.eq.f32.partialorder %v6104_v22, 0.0  ;;  %vm7589_vm9 = vnez %v7519_v5  ;;  %v3806_v22 = vld [vmem:[%s7041_s3 + $0x100] sm:$0xff]  ;;  %p3825_p3 = pnand %p3824_p2, %p3818_p13 }
 0x420   : > { %1799 = vrot.lane.b32.xlu0 %v1515_v21, %s3883_s28  ;;  %vm6767_vm3 = vmor %vm1217_vm10, %vm869_vm5 }
 0x421   : > { %vm1410_vm8 = vmxor %vm870_vm13, %vm7420_vm7 }
 0x422   : > { %vm1422_vm4 = vmand %vm7588_vm14, %vm1410_vm8  ;;  %vm867_vm8 = vcmp.eq.f32.partialorder %v6380_v57, 0.0  ;;  %vm7592_vm14 = vnez %v7555_v32 }
 0x423   : > { %3640 = vmatpush3.msk.msra.mxu0 %vm1422_vm4, %v6149_v19  ;;  %vm1409_vm2 = vmxor %vm869_vm5, %vm7420_vm7 }
 0x424   : > { %3641 = vmatprep.subr.mxu0 %v7536_v28  ;;  %vm1421_vm11 = vmand %vm7589_vm9, %vm1409_vm2  ;;  %vm7596_vm9 = vcmask 261120  }
 0x425   : > { %vm1215_vm10 = vmxor %vm6704_vm12, %vm7420_vm7  ;;  %3642 = vmatpush3.msk.msra.mxu0 %vm1421_vm11, %v6378_v43 }
 0x426   : > { %vm6786_vm13 = vmor %vm6750_vm15, %vm868_vm6  ;;  %3643 = vmatprep.subr.mxu0 %v7536_v28 }
 0x427   : > { %vm1408_vm5 = vmxor %vm868_vm6, %vm7420_vm7  ;;  %vm7595_vm6 = vnez %v7579_v46 }
 0x428   : > { %vm1420_vm4 = vmand %vm7592_vm14, %vm1408_vm5  ;;  %vm7598_vm5 = vnez %v7583_v61  ;;  %vm7600_vm14 = vcmask 523264  }
 0x429   : > { %3644 = vmatpush3.msk.msra.mxu0 %vm1420_vm4, %v6565_v7  ;;  %vm6800_vm12 = vmor %vm1215_vm10, %vm867_vm8  ;;  %vm7597_vm10 = vmmov 0   ;;  %vm7116_vm4 = vcmask 289792  }
 0x42a   : > { %3645 = vmatprep.subr.mxu0 %v7536_v28  ;;  %vm1407_vm15 = vmxor %vm867_vm8, %vm7420_vm7 }
 0x42b   : > { %vm1419_vm2 = vmand %vm7595_vm6, %vm1407_vm15  ;;  %vm7601_vm15 = vnez %v7462_v31 }
 0x42c   : > { %3646 = vmatpush3.msk.msra.mxu0 %vm1419_vm2, %v6684_v18  ;;  %vm7599_vm8 = vmmov %vm7596_vm9  ;;  %vm7602_vm2 = vnez %v7479_v39 }
 0x42d   : > { %3648 = vmatmul.mubr.msk.f32.vlgmr.msra.gmra.mxu0 %vm7596_vm9, %v5739_v12  ;;  %3650 = vmatprep.subr.mxu0 %v7536_v28  ;;  %v3805_v12 = vld [vmem:[%s7041_s3 + $0x108] sm:$0xff]  ;;  %vm1314_vm6 = vmxor %vm7601_vm15, %vm7420_vm7  ;;  %vm7606_vm15 = vcmask 293888  }
 0x42e   : > { %3651 = vmatpush3.msra.mxu0 %v5772_v4  ;;  %3658 = vmatprep.mubr.msk.f32.mxu0 %vm7597_vm10, %v7536_v28  ;;  %v1434_v4 = vsel %vm7598_vm5, %v6149_v19, 0.0  ;;  %vm1326_vm9 = vmand %vm7602_vm2, %vm1314_vm6  ;;  %vm7607_vm6 = vcmask 1043456  }
 0x42f   : > { %3652 = vmatprep.subr.mxu0 %v7536_v28  ;;  %v1482_v37 = vsel %vm1326_vm9, %v6149_v19, 0.0  ;;  %vm7603_vm5 = vmmov %vm7599_vm8 }
 0x430   : > { %3653 = vmatpush3.msra.mxu0 %v3804_v45 }
 0x431   : > { %3654 = vmatprep.subr.mxu0 %v7536_v28 }
 0x432   : > { %3655 = vmatpush3.msra.mxu0 %v3805_v12 }
 0x433   : > { %3656 = vmatprep.subr.mxu0 %v7536_v28 }
 0x434   : > { %3657 = vmatpush3.msra.mxu0 %v3806_v22 }
 0x435   : > { %3661 = vmatprep.subr.mxu0 %v7536_v28 }
 0x45c   : > { %v1566_v57 = vpop.permute.xlu1 %1565 }
 0x45d   : > { %v1831_v5 = vsel %vm7599_vm8, %v1434_v4, %v1566_v57  ;;  %v1710_v11 = vpop.permute.xlu0 %1709  ;;  %vm7604_vm8 = vmmov %vm7600_vm14 }
 0x460   : > { %v1614_v32 = vpop.permute.xlu1 %1613 }
 0x461   : > { %v6833_v15 = vsel %vm7600_vm14, %v1831_v5, %v1614_v32  ;;  %v1758_v29 = vpop.permute.xlu0 %1757  ;;  %vm7605_vm14 = vcmask 785408  }
 0x464   : > { %v1806_v16 = vpop.permute.xlu1 %1805 }
 0x469   : > { %v1662_v58 = vpop.permute.xlu1 %1661 }
 0x46c   : > { %v1708_v19 = vpop.permute.xlu0 %1707 }
 0x46d   : > { %v1612_v62 = vpop.permute.xlu1 %1611 }
 0x470   : > { %v1564_v27 = vpop.permute.xlu0 %1563 }
 0x473   : > { %v1804_v61 = vpop.permute.xlu1 %1803 }
 0x474   : > { %v1756_v46 = vpop.permute.xlu0 %1755 }
 0x477   : > { %v1660_v12 = vpop.permute.xlu1 %1659 }
 0x47a   : > { %v1706_v21 = vpop.permute.xlu0 %1705 }
 0x47e   : > { %v1562_v45 = vpop.permute.xlu0 %1561 }
 0x482   : > { %v1754_v4 = vpop.permute.xlu0 %1753 }
 0x48c   : > { %v2673_v25 = vpop.f32.mrf.mxu1 }
 0x48e   : > { %v3620_v26 = vpop.f32.mrf.mxu1 }
 0x48f   : > { %v1704_v26 = vpop.permute.xlu0 %1703 }
 0x49e   : > { %v2386_v47 = vpop.f32.mrf.mxu0 }
 0x49f   : > { %v2390_v55 = vmul.f32 %v2386_v47, %v5703_v59  ;;  %v1869_v59 = vsel %vm7603_vm5, %v1482_v37, %v1710_v11  ;;  %vm7608_vm5 = vnez %v7504_v23  ;;  %v1433_v23 = vsel %vm6767_vm3, %v6378_v43, 0.0 }
 0x4a0   : > { %v3598_v51 = vpop.f32.mrf.mxu0  ;;  %v1881_v9 = vsel %vm7604_vm8, %v1869_v59, %v1758_v29  ;;  %vm1313_vm8 = vmxor %vm7608_vm5, %vm7420_vm7 }
 0x4a1   : > { %2392 = vst.msk [vmem:[%s6839_s13] sm:$0xf] %vm7116_vm4, %v2390_v55  ;;  %v1893_v39 = vsel %vm7605_vm14, %v1881_v9, %v1806_v16  ;;  %vm7609_vm14 = vnez %v7547_v63  ;;  %v1560_v51 = vpop.permute.xlu0 %1559 }
 0x4a5   : > { %v1752_v2 = vpop.permute.xlu0 %1751 }
 0x4be   : > { %v3490_v41 = vpop.f32.mrf.mxu0 }
 0x4c0   : > { %v3491_v13 = vpop.f32.mrf.mxu0 }
 0x4c1   : > { %v3492_v49 = vadd.f32 %v3491_v13, %v3490_v41 }
 0x4c3   : > { %v6850_v42 = vadd.f32 %v3492_v49, %v2673_v25  ;;  %v1431_v49 = vsel %vm6800_vm12, %v6684_v18, 0.0 }
 0x4c5   : > { %v2677_v31 = vmul.f32 %v6850_v42, %v6850_v42 }
 0x4c7   : > { %3632 = vmatmul.mubr.msk.f32.vlgmr.msra.gmra.mxu1 %vm7606_vm15, %v2677_v31  ;;  %vm1312_vm15 = vmxor %vm7609_vm14, %vm7420_vm7 }
 0x4c8   : > { %3635 = vmatpush3.msk.msra.mxu1 %vm7607_vm6, %v5789_v60  ;;  %3636 = vmatprep.mubr.msk.f32.mxu1 %vm7597_vm10, %v7536_v28  ;;  %v1610_v60 = vpop.permute.xlu1 %1609  ;;  %vm7610_vm6 = vnez %v7530_v38  ;;  %v1432_v38 = vsel %vm6786_vm13, %v6565_v7, 0.0 }
 0x4c9   : > { %2861 = vmatprep.subr.mxu1 %v1893_v39  ;;  %vm1325_vm4 = vmand %vm7610_vm6, %vm1313_vm8 }
 0x4ca   : > { %v1481_v11 = vsel %vm1325_vm4, %v6378_v43, 0.0  ;;  %vm7614_vm4 = vmand %vm6710_vm0, %vm6763_vm1  ;;  %vm7620_vm0 = vcmask 785408  }
 0x4cb   : > { %v1857_v54 = vsel %vm7620_vm0, %v6833_v15, %v1662_v58  ;;  %vm7625_vm12 = vmmov %vm7620_vm0 }
 0x4cc   : > { %v1802_v55 = vpop.permute.xlu1 %1801 }
 0x4d0   : > { %v1658_v37 = vpop.permute.xlu1 %1657 }
 0x4d4   : > { %v1608_v59 = vpop.permute.xlu1 %1607 }
 0x4d8   : > { %v1656_v15 = vpop.permute.xlu1 %1655 }
 0x587   : > { %v2747_v6 = vpop.f32.mrf.mxu1 }
 0x588   : > { %3758 = vrsqrt.f32 %v2747_v6  ;;  %vm2753_vm2 = vcmp.eq.f32.partialorder %v2747_v6, inf  ;;  %v2756_v5 = vand.u32 2147483648, %v2747_v6  ;;  %vm2755_vm9 = vcmp.eq.f32.partialorder %v2747_v6, 0.0 }
 0x589   : > { %v3633_v20 = vpop.f32.mrf.mxu1 }
 0x58a   : > { %v3807_v20 = vld [vmem:[%s7040_s2] sm:$0xf] }
 0x595   : > { %v3759_v22 = vpop.eup %3758 }
 0x596   : > { %v2752_v57 = vmul.f32 %v3759_v22, %v2747_v6  ;;  %v3811_v22 = vld [vmem:[%s7042_s4 + $0x10] sm:$0xff] }
 0x598   : > { %v2754_v32 = vsel %vm2753_vm2, %v2747_v6, %v2752_v57  ;;  %vm7611_vm2 = vnez %v7562_v8  ;;  %v1479_v8 = vsel %vm7614_vm4, %v6684_v18, 0.0  ;;  %vm7629_vm4 = vmmov %vm7620_vm0  ;;  %v3812_v57 = vld [vmem:[%s7042_s4 + $0x8] sm:$0xff] }
 0x599   : > { %v2757_v25 = vsel %vm2755_vm9, %v2756_v5, %v2754_v32  ;;  %vm1324_vm11 = vmand %vm7611_vm2, %vm1312_vm15  ;;  %vm7612_vm9 = vcmask 261120   ;;  %vm7623_vm15 = vcmask 31744  }
 0x59a   : > { %v2758_v47 = vmax.f32 %v2757_v25, 1e-12  ;;  %v1480_v41 = vsel %vm1324_vm11, %v6565_v7, 0.0  ;;  %v1868_v13 = vsel %vm7612_vm9, %v1481_v11, %v1708_v19  ;;  %vm7613_vm7 = vmmov %vm7612_vm9  ;;  %vm7616_vm11 = vcmask 523264  }
 0x59b   : > { %v1830_v63 = vsel %vm7613_vm7, %v1433_v23, %v1564_v27  ;;  %vm7615_vm3 = vmmov %vm7613_vm7  ;;  %v1880_v40 = vsel %vm7616_vm11, %v1868_v13, %v1756_v46  ;;  %v1800_v27 = vpop.permute.xlu0 %1799 }
 0x59c   : > { %3760 = vrcp.f32 %v2758_v47  ;;  %v1867_v43 = vsel %vm7615_vm3, %v1480_v41, %v1706_v21  ;;  %vm7617_vm13 = vmmov %vm7615_vm3  ;;  %v1892_v53 = vsel %vm7625_vm12, %v1880_v40, %v1804_v61  ;;  %v3808_v61 = vld [vmem:[%s7041_s3 + $0xf8] sm:$0xff] }
 0x59d   : > { %v1829_v7 = vsel %vm7617_vm13, %v1432_v38, %v1562_v45  ;;  %vm7618_vm5 = vmmov %vm7616_vm11 }
 0x59e   : > { %v1843_v9 = vsel %vm7618_vm5, %v1830_v63, %v1612_v62  ;;  %vm7619_vm8 = vmmov %vm7615_vm3 }
 0x59f   : > { %v1866_v24 = vsel %vm7619_vm8, %v1479_v8, %v1704_v26  ;;  %vm7621_vm1 = vmmov %vm7618_vm5 }
 0x5a0   : > { %v1879_v31 = vsel %vm7621_vm1, %v1867_v43, %v1754_v4  ;;  %vm7622_vm14 = vmmov %vm7615_vm3  ;;  %v3810_v4 = vld [vmem:[%s7042_s4 + $0x18] sm:$0xff] }
 0x5a1   : > { %v1828_v16 = vsel %vm7622_vm14, %v1431_v49, %v1560_v51  ;;  %vm7624_vm6 = vmmov %vm7621_vm1  ;;  %v1891_v46 = vsel %vm7629_vm4, %v1879_v31, %v1802_v55  ;;  %vm7652_vm14 = vcmask 293888  }
 0x5a2   : > { %v1842_v18 = vsel %vm7624_vm6, %v1829_v7, %v1610_v60  ;;  %vm7626_vm2 = vmmov %vm7620_vm0  ;;  %v3813_v60 = vld [vmem:[%s7042_s4] sm:$0xff] }
 0x5a3   : > { %v1856_v39 = vsel %vm7626_vm2, %v1843_v9, %v1660_v12  ;;  %vm7627_vm9 = vmmov %vm7621_vm1  ;;  %v3809_v12 = vld [vmem:[%s7042_s4 + $0x20] sm:$0xf]  ;;  %vm7654_vm2 = vcmask 31744  }
 0x5a4   : > { %v1878_v19 = vsel %vm7627_vm9, %v1866_v24, %v1752_v2  ;;  %vm7628_vm7 = vmmov %vm7621_vm1  ;;  %vm7651_vm1 = vcmask 289792  }
 0x5a5   : > { %v1841_v58 = vsel %vm7628_vm7, %v1828_v16, %v1608_v59  ;;  %vm7630_vm3 = vmmov %vm7620_vm0 }
 0x5a6   : > { %v1855_v62 = vsel %vm7630_vm3, %v1842_v18, %v1658_v37  ;;  %vm7631_vm11 = vmmov %vm7620_vm0 }
 0x5a7   : > { %v1890_v6 = vsel %vm7631_vm11, %v1878_v19, %v1800_v27  ;;  %vm7632_vm13 = vmmov %vm7620_vm0  ;;  %vm7650_vm0 = vcmask 1043456  }
 0x5a8   : > { %v1854_v21 = vsel %vm7632_vm13, %v1841_v58, %v1656_v15  ;;  %vm7633_vm5 = vmmov %vm7619_vm8 }
 0x5a9   : > { %v3761_v29 = vpop.eup %3760  ;;  %vm7649_vm8 = vmmov %vm7633_vm5 }
 0x5aa   : > { %3637 = vmatmul.mubr.msk.f32.vlgmr.msra.gmra.mxu1 %vm7623_vm15, %v3761_v29  ;;  %vm7653_vm15 = vmmov %vm7650_vm0 }
 0x5ab   : > { %2862 = vmatpush1.msra.mxu1 %v1857_v54  ;;  %2901 = vmatprep.mubr.f32.mxu1 %v7536_v28 }
 0x5ac   : > { %2863 = vmatprep.subr.mxu1 %v1892_v53 }
 0x5ad   : > { %2864 = vmatpush1.msra.mxu1 %v1856_v39 }
 0x5ae   : > { %2865 = vmatprep.subr.mxu1 %v1891_v46 }
 0x5af   : > { %2866 = vmatpush1.msra.mxu1 %v1855_v62 }
 0x5b0   : > { %2867 = vmatprep.subr.mxu1 %v1890_v6 }
 0x5b1   : > { %2868 = vmatpush1.msra.mxu1 %v1854_v21 }
 0x5b2   : > { %3385 = vmatmul.mubr.msk.f32.vlgmr.msra.gmra.mxu1 %vm7633_vm5, %v3807_v20  ;;  %3511 = vmatprep.subr.mxu1 %v3808_v61 }
 0x5b3   : > { %3512 = vmatpush3.msra.mxu1 %v5914_v36  ;;  %v7634_v36 = vld [vmem:[#allocation5_spill] sm:$0xff] }
 0x5b4   : > { %3513 = vmatprep.subr.mxu1 %v5927_v30  ;;  %v7635_v30 = vld [vmem:[#allocation6_spill] sm:$0xff] }
 0x5b5   : > { %3514 = vmatpush3.msra.mxu1 %v5940_v0  ;;  %v7636_v0 = vld [vmem:[#allocation7_spill] sm:$0xff] }
 0x5b6   : > { %3515 = vmatprep.subr.mxu1 %v5954_v56  ;;  %v7637_v56 = vld [vmem:[#allocation8_spill] sm:$0xff] }
 0x5b7   : > { %3516 = vmatpush3.msra.mxu1 %v5969_v1  ;;  %v7638_v1 = vld [vmem:[#allocation9_spill] sm:$0xff] }
 0x5b8   : > { %3517 = vmatprep.subr.mxu1 %v5990_v17  ;;  %v7639_v17 = vld [vmem:[#allocation10_spill] sm:$0xff] }
 0x5b9   : > { %3518 = vmatpush3.msra.mxu1 %v6011_v34  ;;  %v7640_v34 = vld [vmem:[#allocation11_spill] sm:$0xff] }
 0x5ba   : > { %3519 = vmatprep.subr.mxu1 %v6031_v33  ;;  %v7641_v33 = vld [vmem:[#allocation12_spill] sm:$0xff] }
 0x5bb   : > { %3520 = vmatpush3.msra.mxu1 %v6055_v3  ;;  %v7642_v3 = vld [vmem:[#allocation13_spill] sm:$0xff] }
 0x5bc   : > { %3521 = vmatprep.subr.mxu1 %v6072_v50  ;;  %v7643_v50 = vld [vmem:[#allocation14_spill] sm:$0xff] }
 0x5bd   : > { %3522 = vmatpush3.msra.mxu1 %v6098_v48  ;;  %v7644_v48 = vld [vmem:[#allocation15_spill] sm:$0xff] }
 0x5be   : > { %3523 = vmatprep.subr.mxu1 %v6120_v10  ;;  %v7645_v10 = vld [vmem:[#allocation16_spill] sm:$0xff] }
 0x5bf   : > { %3524 = vmatpush3.msra.mxu1 %v6140_v14  ;;  %v7646_v14 = vld [vmem:[#allocation17_spill] sm:$0xff] }
 0x5c0   : > { %3525 = vmatprep.subr.mxu1 %v6164_v52  ;;  %v7647_v52 = vld [vmem:[#allocation18_spill] sm:$0xff] }
 0x5c1   : > { %3526 = vmatpush3.msra.mxu1 %v6179_v44  ;;  %v7648_v44 = vld [vmem:[#allocation19_spill] sm:$0xff] }
 0x5c2   : > { %3527 = vmatprep.subr.mxu1 %v6198_v35  ;;  %v2974_v35 = vpop.f32.mrf.mxu0 }
 0x5c3   : > { %3528 = vmatpush3.msra.mxu1 %v7634_v36  ;;  %3659 = vmatmul.mubr.msk.f32.vlgmr.msra.gmra.mxu0 %vm7649_vm8, %v2974_v35 }
 0x5c4   : > { %3529 = vmatprep.subr.mxu1 %v7635_v30  ;;  %v3649_v45 = vpop.f32.mrf.mxu0  ;;  %3662 = vmatpush3.msk.msra.mxu0 %vm7650_vm0, %v3809_v12 }
 0x5c5   : > { %3530 = vmatpush3.msra.mxu1 %v7636_v0  ;;  %3671 = vmatprep.mubr.msk.f32.mxu0 %vm7597_vm10, %v7536_v28 }
 0x5c6   : > { %3531 = vmatprep.subr.mxu1 %v7637_v56  ;;  %3663 = vmatprep.subr.mxu0 %v7536_v28 }
 0x5c7   : > { %3532 = vmatpush3.msra.mxu1 %v7638_v1  ;;  %3664 = vmatpush3.msra.mxu0 %v3810_v4 }
 0x5c8   : > { %3533 = vmatprep.subr.mxu1 %v7639_v17  ;;  %3665 = vmatprep.subr.mxu0 %v7536_v28 }
 0x5c9   : > { %3534 = vmatpush3.msra.mxu1 %v7640_v34  ;;  %3666 = vmatpush3.msra.mxu0 %v3811_v22 }
 0x5ca   : > { %3535 = vmatprep.subr.mxu1 %v7641_v33  ;;  %3667 = vmatprep.subr.mxu0 %v7536_v28 }
 0x5cb   : > { %3536 = vmatpush3.msra.mxu1 %v7642_v3  ;;  %3668 = vmatpush3.msra.mxu0 %v3812_v57 }
 0x5cc   : > { %3537 = vmatprep.subr.mxu1 %v7643_v50  ;;  %3669 = vmatprep.subr.mxu0 %v7536_v28 }
 0x5cd   : > { %3538 = vmatpush3.msra.mxu1 %v7644_v48  ;;  %3670 = vmatpush3.msra.mxu0 %v3813_v60 }
 0x5ce   : > { %3539 = vmatprep.subr.mxu1 %v7645_v10  ;;  %3674 = vmatprep.subr.mxu0 %v7536_v28 }
 0x5cf   : > { %3540 = vmatpush3.msra.mxu1 %v7646_v14 }
 0x5d0   : > { %3541 = vmatprep.subr.mxu1 %v7647_v52 }
 0x5d1   : > { %3542 = vmatpush3.msra.mxu1 %v7648_v44 }
 0x66a   : > { %v2830_v5 = vpop.f32.mrf.mxu1 }
 0x66b   : > { %v2834_v32 = vmul.f32 %v2830_v5, %v6850_v42  ;;  %v3814_v42 = vld [vmem:[%s7043_s5] sm:$0xf] }
 0x66c   : > { %v3638_v25 = vpop.f32.mrf.mxu1 }
 0x66d   : > { %3384 = vst.msk [vmem:[%s6839_s13 + $0x4] sm:$0xf] %vm7651_vm1, %v2834_v32 }
 0x672   : > { %v2903_v26 = vpop.f32.mrf.mxu1 }
 0x674   : > { %v2905_v47 = vpop.f32.mrf.mxu1 }
 0x675   : > { %3045 = vmatprep.mubr.f32.mxu1 %v2905_v47 }
 0x676   : > { %3046 = vmatmul.mubr.f32.vlgmr.msra.gmra.mxu1 %v2903_v26 }
 0x683   : > { %v3117_v55 = vpop.f32.mrf.mxu0 }
 0x685   : > { %v3660_v51 = vpop.f32.mrf.mxu0 }
 0x736   : > { %v3543_v11 = vpop.f32.mrf.mxu1 }
 0x738   : > { %v3544_v23 = vpop.f32.mrf.mxu1 }
 0x739   : > { %v3545_v37 = vadd.f32 %v3544_v23, %v3543_v11 }
 0x73b   : > { %v3118_v41 = vadd.f32 %v3545_v37, %v3117_v55 }
 0x73d   : > { %v3121_v13 = vmul.f32 %v3118_v41, %v3118_v41 }
 0x73f   : > { %3672 = vmatmul.mubr.msk.f32.vlgmr.msra.gmra.mxu0 %vm7652_vm14, %v3121_v13 }
 0x740   : > { %3675 = vmatpush3.msk.msra.mxu0 %vm7653_vm15, %v3814_v42  ;;  %3676 = vmatprep.mubr.msk.f32.mxu0 %vm7597_vm10, %v7536_v28  ;;  %vm7655_vm10 = vmmov %vm7651_vm1 }
 0x7ff   : > { %v3191_v38 = vpop.f32.mrf.mxu0 }
 0x800   : > { %3762 = vrsqrt.f32 %v3191_v38  ;;  %vm3197_vm6 = vcmp.eq.f32.partialorder %v3191_v38, inf  ;;  %v3200_v43 = vand.u32 2147483648, %v3191_v38  ;;  %vm3199_vm12 = vcmp.eq.f32.partialorder %v3191_v38, 0.0 }
 0x801   : > { %v3673_v63 = vpop.f32.mrf.mxu0 }
 0x80d   : > { %v3763_v8 = vpop.eup %3762 }
 0x80e   : > { %v3196_v2 = vmul.f32 %v3763_v8, %v3191_v38 }
 0x810   : > { %v3198_v59 = vsel %vm3197_vm6, %v3191_v38, %v3196_v2 }
 0x811   : > { %v3201_v49 = vsel %vm3199_vm12, %v3200_v43, %v3198_v59 }
 0x812   : > { %v3202_v40 = vmax.f32 %v3201_v49, 1e-12 }
 0x814   : > { %3764 = vrcp.f32 %v3202_v40 }
 0x821   : > { %v3765_v7 = vpop.eup %3764 }
 0x822   : > { %3677 = vmatmul.mubr.msk.f32.vlgmr.msra.gmra.mxu0 %vm7654_vm2, %v3765_v7 }
 0x8e2   : > { %v3274_v28 = vpop.f32.mrf.mxu0 }
 0x8e3   : > { %v3278_v29 = vmul.f32 %v3274_v28, %v3118_v41 }
 0x8e4   : > { %v3678_v9 = vpop.f32.mrf.mxu0 }
 0x8e5   : > { %3396 = vst.msk [vmem:[%s6839_s13 + $0x8] sm:$0xf] %vm7655_vm10, %v3278_v29 }
 0x8e6   : > { %3828 = shalt.err (!%p3825_p3)
}
 0x8e7   : > { %s3829_s12 = scalar_lea.hbm %s6990_s9, 192  ;;  %s3833_s17 = scalar_lea.hbm %s7044_s6, 384 }
 0x8e8   : > { %p3830_p4 = scmp.ne.s32.totalorder %s6990_s9, %s3829_s12  ;;  %p3834_p9 = scmp.lt.s32.totalorder %s6990_s9, %s7044_s6 }
 0x8e9   : > { %p3835_p10 = scmp.lt.s32.totalorder %s3833_s17, %s3829_s12 }
 0x8ea   : > { %p3831_p7 = pnand %p3830_p4, %p3960_p5 }
 0x8eb   : > { %p3836_p11 = por %p3835_p10, %p3834_p9 }
 0x8ec   : > { %p3832_p8 = pneg %p3831_p7 }
 0x8ee   : > { %p3837_p12 = pnand %p3836_p11, %p3832_p8 }
 0x8f0   : > { %3840 = shalt.err (!%p3837_p12)
}
 0x8f1   : > { %s3886_s28 = smov 4  }
 0x8f2   : > { %3682 = dma.vmem_to_hbm [thread:$0]  (%p3960_p5), %s6985_s19, 192, %s6990_s9, %s6996_s10, %s3882_s26, %s3882_s26, %s3886_s28  }
 0x8f3 PF: > { %p3688_p13 = scmp.ge.s32.totalorder %s3875_s24, 2  ;;  %s3310_s29 = sand.u32 1, %s3863_s21  }
 0x8f4   : > { %s3311_s11 = scalar_lea.sflag [#allocation3], %s3310_s29 }
 0x8f5   : > { %p3685_p0 = pnand %p3688_p13, %p3964_p6 }
 0x8f7   : > { %p3686_p1 = pneg %p3685_p0 }
 0x8f9   : > { %3858 = dma.done.wait (%p3686_p1), %s3311_s11, 192  }
 0x8fa   : > { %3860 = vsyncadd (%p3686_p1), %s3311_s11, 4294967104  ;;  %p16_p2 = scmp.ge.s32.totalorder %s3947_s27, 4   ;;  %s7656_s21 = smov %s3867_s22 }
 0x8fb   : > { %s7657_s22 = smov %s3871_s23  ;;  %s7658_s23 = smov %s3958_s30 }
 0x8fc   : > { %s7659_s24 = smov %s3947_s27  ;;  %18 = sbr.rel (!%p16_p2) target bundleno = 3 (0x3), region = 81 }
 0x901   :  { %3316 = vsyncpa [#allocation3], 1 }
 0x902   :  { %3318 = vsyncpa [#allocation3 + $0x1], 1 }

</bundles_post_ra>
